<compile_context>
chip_gen: v6e
topology: v6e:2x2x1
jax: 0.10.0
libtpu: 0.0.40
codegen_flags: <defaults>
</compile_context>

<pallas_src>
import functools

import jax
import jax.numpy as jnp
from jax import lax
from jax.experimental import pallas as pl
from jax.experimental.pallas import tpu as pltpu


def _gelu_tanh(x):
    # tanh-form GELU (|abs err| ~1e-3 vs. torch.nn.GELU()'s exact erf form).
    # TODO(synk): swap in an exact erf evaluation if bit-faithful GELU is required.
    c = 0.7978845608028654  # sqrt(2/pi)
    return 0.5 * x * (1.0 + jnp.tanh(c * (x + 0.044715 * (x * x * x))))


def middle_blocks_kernel(x_ref,
                         wpool_ref, bpool_ref, wmix_ref, wmixn_ref,
                         gamma_ref, beta_ref, lnw_ref, lnb_ref,
                         w1_ref, b1_ref, w2_ref, b2_ref,
                         o_ref, *, H, W, C, K, NBLK, S):
    HW = H * W
    pad = K // 2

    xf = x_ref[...].reshape(S * HW, C)                       # [S*HW, C] (layout no-op)

    # ---- hoisted, block/sample-invariant constants ----
    col = lax.broadcasted_iota(jnp.int32, (1, W, C), 1)      # column index along W
    wmask = []
    for kw in range(K):
        dw = kw - pad
        wmask.append(None if dw == 0 else (col >= -dw if dw < 0 else col < W - dw))
    zrows = jnp.zeros((pad, W, C), jnp.float32)              # H halo rows
    inv_hw = jnp.full((1, HW), 1.0 / HW, jnp.float32)        # avg-pool on the MXU
    inv_c = jnp.full((C, 1), 1.0 / C, jnp.float32)           # LN reductions on the MXU

    for blk in range(NBLK):
        # --------- per-sample DPAC gate + FGRN + dynamic depthwise KxK conv ---------
        conv_rows = []
        for s in range(S):
            xs = xf[s * HW:(s + 1) * HW]                     # [HW, C] tile-aligned slice
            x3d = xs.reshape(H, W, C)

            # DPAC: dual pooling + fused avg/max 1x1 convs + GELU gate.
            avgp = jnp.dot(inv_hw, xs, preferred_element_type=jnp.float32)    # [1, C]
            maxp = jnp.max(xs, axis=0, keepdims=True)                         # [1, C]
            pooled = jnp.concatenate([avgp, maxp], axis=1).astype(jnp.bfloat16)
            sgate = _gelu_tanh(
                jnp.dot(pooled, wpool_ref[blk],
                        preferred_element_type=jnp.float32) + bpool_ref[blk])  # [1, C]

            # FGRN, algebraically reduced: Gx[c] = |s[c]| * ||wmix[:, c]||_2.
            gx = jnp.abs(sgate) * wmixn_ref[blk]                               # [1, C]
            nx = gx / (jnp.mean(gx, axis=-1, keepdims=True) + 1e-6)
            coef = gamma_ref[blk] * (sgate * nx)                               # [1, C]
            filt = coef * wmix_ref[blk] + beta_ref[blk]                        # [K*K, C]

            # Dynamic depthwise KxK conv (stride 1, zero pad).  H halo = tile-aligned
            # zero-row concat; W shift = sublane roll (XLU) + boundary mask.  kw is
            # the outer loop so each shifted array is consumed immediately.
            xhp = jnp.concatenate([zrows, x3d, zrows], axis=0)   # [H+2*pad, W, C]
            acc = jnp.zeros((H, W, C), jnp.float32)
            for kw in range(K):
                dw = kw - pad
                if dw == 0:
                    sh = xhp
                else:
                    sh = jnp.where(wmask[kw],
                                   pltpu.roll(xhp, shift=(-dw) % W, axis=1), 0.0)
                for kh in range(K):
                    j = kh * K + kw
                    acc = acc + sh[kh:kh + H] * filt[j:j + 1, :]
            conv_rows.append(acc.reshape(HW, C))

        accf = conv_rows[0] if S == 1 else jnp.concatenate(conv_rows, axis=0)  # [S*HW, C]

        # --------- LayerNorm (channels_first -> normalize over C), sums on MXU ---------
        u = jnp.dot(accf, inv_c, preferred_element_type=jnp.float32)           # [S*HW, 1]
        d = accf - u
        v = jnp.dot(d * d, inv_c, preferred_element_type=jnp.float32)          # [S*HW, 1]
        y = d * lax.rsqrt(v + 1e-6) * lnw_ref[blk] + lnb_ref[blk]

        # --------- pwconv1 -> GELU -> pwconv2 -> residual (bf16 MXU operands) ---------
        z = jnp.dot(y.astype(jnp.bfloat16), w1_ref[blk],
                    preferred_element_type=jnp.float32) + b1_ref[blk]
        z = _gelu_tanh(z)
        z = jnp.dot(z.astype(jnp.bfloat16), w2_ref[blk],
                    preferred_element_type=jnp.float32) + b2_ref[blk]

        xf = xf + z

    o_ref[...] = xf.reshape(S, HW, C)                         # lane-dense output


PK_ORDER = ("wpool", "bpool", "wmix", "wmixn", "gamma", "beta",
            "lnw", "lnb", "w1", "b1", "w2", "b2")


def pack_block_params(params_list):
    """Stack per-block params along a leading block axis; fuse the avg/max 1x1 convs;
    precompute the FGRN per-channel filter norm; cast MXU weights to bf16."""
    st = lambda k: jnp.stack([p[k] for p in params_list])
    wmix = st("wmix")                                                    # [N, K*K, C]
    return dict(
        wpool=jnp.stack([jnp.concatenate([p["wavg"], p["wmax"]], axis=0)
                         for p in params_list]).astype(jnp.bfloat16),    # [N, 2C, C]
        bpool=jnp.stack([p["bavg"] + p["bmax"] for p in params_list]),   # [N, 1, C]
        wmix=wmix,
        wmixn=jnp.sqrt(jnp.sum(wmix * wmix, axis=1, keepdims=True)),     # [N, 1, C]
        gamma=st("gamma"), beta=st("beta"),
        lnw=st("lnw"), lnb=st("lnb"),
        w1=st("w1").astype(jnp.bfloat16), b1=st("b1"),
        w2=st("w2").astype(jnp.bfloat16), b2=st("b2"),
    )


def samples_per_step_for_device(batch):
    """Single-TC chips (v5e/v6e): fold the whole batch into one grid step.
    Multi-TC chips (v7x megacore, v4, ...): one sample per step so the 'parallel'
    grid axis can be sharded across TensorCores."""
    try:
        kind = jax.devices()[0].device_kind.lower()
    except Exception:
        return 1
    single_tc = any(t in kind for t in ("v5e", "v5 lite", "v5lite", "v6"))
    return batch if single_tc else 1


def middle_blocks_pallas(x_nhwc, pk, *, K=3, samples_per_step=1):
    B, H, W, C = x_nhwc.shape
    S = samples_per_step
    assert B % S == 0
    NBLK = pk["wpool"].shape[0]
    kernel = functools.partial(middle_blocks_kernel,
                               H=H, W=W, C=C, K=K, NBLK=NBLK, S=S)

    def full_spec(arr):
        nd = arr.ndim
        return pl.BlockSpec(arr.shape, lambda b, _nd=nd: (0,) * _nd)

    out_flat = pl.pallas_call(
        kernel,
        out_shape=jax.ShapeDtypeStruct((B, H * W, C), jnp.float32),
        grid_spec=pltpu.PrefetchScalarGridSpec(
            num_scalar_prefetch=0,
            grid=(B // S,),
            in_specs=[pl.BlockSpec((S, H, W, C), lambda b: (b, 0, 0, 0))]
                     + [full_spec(pk[k]) for k in PK_ORDER],
            out_specs=pl.BlockSpec((S, H * W, C), lambda b: (b, 0, 0)),
        ),
        compiler_params=pltpu.CompilerParams(
            dimension_semantics=("parallel",)),
    )(x_nhwc, *[pk[k] for k in PK_ORDER])
    return out_flat.reshape(B, H, W, C)


@functools.partial(jax.jit, static_argnames=("K", "samples_per_step"))
def middle_network_packed(x3_nchw, pk, *, K=3, samples_per_step=1):
    # TODO(synk): in an end-to-end NHWC pipeline these two transposes should be
    # dropped (each is an extra HBM round trip at this tiny activation size).
    x = jnp.transpose(x3_nchw, (0, 2, 3, 1)).astype(jnp.float32)   # NCHW -> NHWC
    y = middle_blocks_pallas(x, pk, K=K, samples_per_step=samples_per_step)
    return jnp.transpose(y, (0, 3, 1, 2))                          # NHWC -> NCHW


def middle_network(xs, params_list, *, K=3):
    """MiddleNetwork.forward: consumes xs[3], applies blk_nums MiddleBlocks, returns [out]."""
    pk = pack_block_params(params_list)        # pack/cast once; hoist in a real pipeline
    sps = samples_per_step_for_device(xs[3].shape[0])
    return [middle_network_packed(xs[3], pk, K=K, samples_per_step=sps)]


# ---------------- deterministic parameter init (shapes from __init__) ----------------
def init_block_params(key, C, K=3):
    ks = jax.random.split(key, 13)
    f = lambda k, shape, scale: scale * jax.random.normal(k, shape, jnp.float32)
    # 1x1 conv weights stored transposed ([Cin, Cout]) for channel-last matmuls;
    # wmix[j, c] == torch conv_mix.weight[c*K*K + j, 0, 0, 0].
    return dict(
        wavg=f(ks[0], (C, C), 0.05), bavg=f(ks[1], (1, C), 0.05),
        wmax=f(ks[2], (C, C), 0.05), bmax=f(ks[3], (1, C), 0.05),
        wmix=f(ks[4], (K * K, C), 0.3),
        gamma=f(ks[5], (1, C), 0.5), beta=f(ks[6], (1, C), 0.05),
        lnw=1.0 + f(ks[7], (1, C), 0.1), lnb=f(ks[8], (1, C), 0.05),
        w1=f(ks[9], (C, C), 0.05), b1=f(ks[10], (1, C), 0.05),
        w2=f(ks[11], (C, C), 0.05), b2=f(ks[12], (1, C), 0.05),
    )


# ---------------- pure-JAX reference (NHWC, exact GELU) for a smoke check ----------------
def middle_block_ref(x, p, K=3):
    B, H, W, C = x.shape
    xf = x.reshape(B, H * W, C)
    avgp = jnp.mean(xf, axis=1)
    maxp = jnp.max(xf, axis=1)
    s = jax.nn.gelu(avgp @ p["wavg"] + p["bavg"] + maxp @ p["wmax"] + p["bmax"],
                    approximate=False)                     # [B, C]
    wdyn = s[:, None, :] * p["wmix"][None]                 # [B, K*K, C]
    gx = jnp.sqrt(jnp.sum(wdyn ** 2, axis=1, keepdims=True))
    nx = gx / (jnp.mean(gx, axis=-1, keepdims=True) + 1e-6)
    filt = p["gamma"] * (wdyn * nx) + p["beta"]            # [B, K*K, C]

    def dwconv(xb, fb):
        rhs = fb.reshape(K, K, C)[:, :, None, :]           # HWIO, 1 in-chan per group
        return lax.conv_general_dilated(
            xb[None], rhs, (1, 1), [(K // 2, K // 2)] * 2,
            dimension_numbers=("NHWC", "HWIO", "NHWC"),
            feature_group_count=C)[0]

    y = jax.vmap(dwconv)(x, filt)
    u = jnp.mean(y, axis=-1, keepdims=True)
    v = jnp.mean((y - u) ** 2, axis=-1, keepdims=True)
    y = (y - u) / jnp.sqrt(v + 1e-6) * p["lnw"] + p["lnb"]
    z = jax.nn.gelu(y @ p["w1"] + p["b1"], approximate=False) @ p["w2"] + p["b2"]
    return x + z


if __name__ == "__main__":
    key = jax.random.PRNGKey(0)
    B, C, H, W = 2, 128, 8, 8          # embed_dims = [16, 32, 64, 128] -> dim = 128
    K, BLK_NUMS = 3, 3
    k_x, k_p = jax.random.split(key)

    x3 = jax.random.normal(k_x, (B, C, H, W), jnp.float32)
    xs = [jnp.zeros((B, 16, 64, 64), jnp.float32),   # unused pyramid levels
          jnp.zeros((B, 32, 32, 32), jnp.float32),   # (MiddleNetwork consumes x[3])
          jnp.zeros((B, 64, 16, 16), jnp.float32),
          x3]
    params = [init_block_params(k, C, K) for k in jax.random.split(k_p, BLK_NUMS)]

    outs = middle_network(xs, params, K=K)
    out = jax.block_until_ready(outs[0])
    assert out.shape == (B, C, H, W) and out.dtype == jnp.float32

    # smoke check against a pure-JAX reference (exact erf GELU, f32).  Tolerance
    # covers the tanh-GELU approximation + bf16 MXU operands used in the kernel.
    with jax.default_matmul_precision("highest"):
        ref = jnp.transpose(x3, (0, 2, 3, 1))
        for p in params:
            ref = middle_block_ref(ref, p, K)
        ref = jnp.transpose(ref, (0, 3, 1, 2))
    err = float(jnp.max(jnp.abs(out - ref)) / (jnp.max(jnp.abs(ref)) + 1e-6))
    assert err < 4e-2, f"mismatch vs reference: rel-max-err={err}"

    print("KERNEL_OK")
</pallas_src>

<mosaic_0001>
module attributes {stable_mosaic.version = 11 : i64} {
  func.func @middle_blocks_kernel(%arg0: i32, %arg1: memref<1x8x8x128xf32, #tpu.memory_space<vmem>>, %arg2: memref<3x256x128xbf16, #tpu.memory_space<vmem>>, %arg3: memref<3x1x128xf32, #tpu.memory_space<vmem>>, %arg4: memref<3x9x128xf32, #tpu.memory_space<vmem>>, %arg5: memref<3x1x128xf32, #tpu.memory_space<vmem>>, %arg6: memref<3x1x128xf32, #tpu.memory_space<vmem>>, %arg7: memref<3x1x128xf32, #tpu.memory_space<vmem>>, %arg8: memref<3x1x128xf32, #tpu.memory_space<vmem>>, %arg9: memref<3x1x128xf32, #tpu.memory_space<vmem>>, %arg10: memref<3x128x128xbf16, #tpu.memory_space<vmem>>, %arg11: memref<3x1x128xf32, #tpu.memory_space<vmem>>, %arg12: memref<3x128x128xbf16, #tpu.memory_space<vmem>>, %arg13: memref<3x1x128xf32, #tpu.memory_space<vmem>>, %arg14: memref<1x64x128xf32, #tpu.memory_space<vmem>>) attributes {dimension_semantics = [#tpu.dimension_semantics<parallel>], iteration_bounds = array<i64: 2>, scalar_prefetch = 0 : i64, scratch_operands = 0 : i64, tpu.core_type = #tpu.core_type<tc>, window_params = [{transform_indices = @transform_0, window_bounds = array<i64: 1, 8, 8, 128>}, {pipeline_mode = #tpu.pipeline_mode<synchronous>, transform_indices = @transform_1, window_bounds = array<i64: 3, 256, 128>}, {pipeline_mode = #tpu.pipeline_mode<synchronous>, transform_indices = @transform_2, window_bounds = array<i64: 3, 1, 128>}, {pipeline_mode = #tpu.pipeline_mode<synchronous>, transform_indices = @transform_3, window_bounds = array<i64: 3, 9, 128>}, {pipeline_mode = #tpu.pipeline_mode<synchronous>, transform_indices = @transform_4, window_bounds = array<i64: 3, 1, 128>}, {pipeline_mode = #tpu.pipeline_mode<synchronous>, transform_indices = @transform_5, window_bounds = array<i64: 3, 1, 128>}, {pipeline_mode = #tpu.pipeline_mode<synchronous>, transform_indices = @transform_6, window_bounds = array<i64: 3, 1, 128>}, {pipeline_mode = #tpu.pipeline_mode<synchronous>, transform_indices = @transform_7, window_bounds = array<i64: 3, 1, 128>}, {pipeline_mode = #tpu.pipeline_mode<synchronous>, transform_indices = @transform_8, window_bounds = array<i64: 3, 1, 128>}, {pipeline_mode = #tpu.pipeline_mode<synchronous>, transform_indices = @transform_9, window_bounds = array<i64: 3, 128, 128>}, {pipeline_mode = #tpu.pipeline_mode<synchronous>, transform_indices = @transform_10, window_bounds = array<i64: 3, 1, 128>}, {pipeline_mode = #tpu.pipeline_mode<synchronous>, transform_indices = @transform_11, window_bounds = array<i64: 3, 128, 128>}, {pipeline_mode = #tpu.pipeline_mode<synchronous>, transform_indices = @transform_12, window_bounds = array<i64: 3, 1, 128>}, {transform_indices = @transform_13, window_bounds = array<i64: 1, 64, 128>}]} {
    %c0 = arith.constant 0 : index
    %c0_0 = arith.constant 0 : index
    %c0_1 = arith.constant 0 : index
    %c0_2 = arith.constant 0 : index
    %0 = vector.load %arg1[%c0, %c0_0, %c0_1, %c0_2] : memref<1x8x8x128xf32, #tpu.memory_space<vmem>>, vector<1x8x8x128xf32>
    %1 = vector.shape_cast %0 : vector<1x8x8x128xf32> to vector<64x128xf32>
    %2 = tpu.iota {dimensions = array<i32: 1>} : vector<1x8x128xi32>
    %c1_i32 = arith.constant 1 : i32
    %3 = vector.broadcast %c1_i32 : i32 to vector<1x8x128xi32>
    %4 = arith.cmpi sge, %2, %3 : vector<1x8x128xi32>
    %c7_i32 = arith.constant 7 : i32
    %5 = vector.broadcast %c7_i32 : i32 to vector<1x8x128xi32>
    %6 = arith.cmpi slt, %2, %5 : vector<1x8x128xi32>
    %cst = arith.constant 0.000000e+00 : f32
    %7 = vector.broadcast %cst : f32 to vector<1x8x128xf32>
    %cst_3 = arith.constant 1.562500e-02 : f32
    %8 = vector.broadcast %cst_3 : f32 to vector<1x64xf32>
    %cst_4 = arith.constant 7.812500e-03 : f32
    %9 = vector.broadcast %cst_4 : f32 to vector<128x1xf32>
    %10 = vector.shape_cast %1 : vector<64x128xf32> to vector<8x8x128xf32>
    %cst_5 = arith.constant dense<0.000000e+00> : vector<1x128xf32>
    %11 = tpu.matmul %8, %1, %cst_5 {dimension_numbers = #tpu.dot_dimension_numbers<[1], [0], [0], [1], [0, 0, 1, 1], [], []>} : vector<1x64xf32>, vector<64x128xf32>, vector<1x128xf32> -> vector<1x128xf32>
    %cst_6 = arith.constant dense<0xFF800000> : vector<128xf32>
    %12 = vector.multi_reduction <maximumf>, %1, %cst_6 [0] : vector<64x128xf32> to vector<128xf32>
    %13 = vector.shape_cast %12 : vector<128xf32> to vector<1x128xf32>
    %14 = tpu.concatenate %11, %13 in 1 : vector<1x128xf32>, vector<1x128xf32> -> vector<1x256xf32>
    %15 = arith.truncf %14 : vector<1x256xf32> to vector<1x256xbf16>
    %c0_7 = arith.constant 0 : index
    %c0_8 = arith.constant 0 : index
    %c0_9 = arith.constant 0 : index
    %16 = vector.load %arg2[%c0_7, %c0_8, %c0_9] : memref<3x256x128xbf16, #tpu.memory_space<vmem>>, vector<1x256x128xbf16>
    %17 = vector.shape_cast %16 : vector<1x256x128xbf16> to vector<256x128xbf16>
    %cst_10 = arith.constant dense<0.000000e+00> : vector<1x128xf32>
    %18 = tpu.matmul %15, %17, %cst_10 {dimension_numbers = #tpu.dot_dimension_numbers<[1], [0], [0], [1], [0, 0, 1, 1], [], []>} : vector<1x256xbf16>, vector<256x128xbf16>, vector<1x128xf32> -> vector<1x128xf32>
    %c0_11 = arith.constant 0 : index
    %c0_12 = arith.constant 0 : index
    %c0_13 = arith.constant 0 : index
    %19 = vector.load %arg3[%c0_11, %c0_12, %c0_13] : memref<3x1x128xf32, #tpu.memory_space<vmem>>, vector<1x1x128xf32>
    %20 = vector.shape_cast %19 : vector<1x1x128xf32> to vector<1x128xf32>
    %21 = arith.addf %18, %20 : vector<1x128xf32>
    %cst_14 = arith.constant 5.000000e-01 : f32
    %22 = vector.broadcast %cst_14 : f32 to vector<1x128xf32>
    %23 = arith.mulf %22, %21 : vector<1x128xf32>
    %24 = arith.mulf %21, %21 : vector<1x128xf32>
    %25 = arith.mulf %24, %21 : vector<1x128xf32>
    %cst_15 = arith.constant 4.471500e-02 : f32
    %26 = vector.broadcast %cst_15 : f32 to vector<1x128xf32>
    %27 = arith.mulf %26, %25 : vector<1x128xf32>
    %28 = arith.addf %21, %27 : vector<1x128xf32>
    %cst_16 = arith.constant 0.797884583 : f32
    %29 = vector.broadcast %cst_16 : f32 to vector<1x128xf32>
    %30 = arith.mulf %29, %28 : vector<1x128xf32>
    %31 = math.tanh %30 : vector<1x128xf32>
    %cst_17 = arith.constant 1.000000e+00 : f32
    %32 = vector.broadcast %cst_17 : f32 to vector<1x128xf32>
    %33 = arith.addf %32, %31 : vector<1x128xf32>
    %34 = arith.mulf %23, %33 : vector<1x128xf32>
    %35 = math.absf %34 : vector<1x128xf32>
    %c0_18 = arith.constant 0 : index
    %c0_19 = arith.constant 0 : index
    %c0_20 = arith.constant 0 : index
    %36 = vector.load %arg5[%c0_18, %c0_19, %c0_20] : memref<3x1x128xf32, #tpu.memory_space<vmem>>, vector<1x1x128xf32>
    %37 = vector.shape_cast %36 : vector<1x1x128xf32> to vector<1x128xf32>
    %38 = arith.mulf %35, %37 : vector<1x128xf32>
    %cst_21 = arith.constant dense<0.000000e+00> : vector<1xf32>
    %39 = vector.multi_reduction <add>, %38, %cst_21 [1] : vector<1x128xf32> to vector<1xf32>
    %40 = vector.shape_cast %39 : vector<1xf32> to vector<1x1xf32>
    %cst_22 = arith.constant 1.280000e+02 : f32
    %41 = vector.broadcast %cst_22 : f32 to vector<1x1xf32>
    %42 = arith.divf %40, %41 : vector<1x1xf32>
    %cst_23 = arith.constant 9.99999997E-7 : f32
    %43 = vector.broadcast %cst_23 : f32 to vector<1x1xf32>
    %44 = arith.addf %42, %43 : vector<1x1xf32>
    %45 = vector.broadcast %44 : vector<1x1xf32> to vector<1x128xf32>
    %46 = arith.divf %38, %45 : vector<1x128xf32>
    %c0_24 = arith.constant 0 : index
    %c0_25 = arith.constant 0 : index
    %c0_26 = arith.constant 0 : index
    %47 = vector.load %arg6[%c0_24, %c0_25, %c0_26] : memref<3x1x128xf32, #tpu.memory_space<vmem>>, vector<1x1x128xf32>
    %48 = vector.shape_cast %47 : vector<1x1x128xf32> to vector<1x128xf32>
    %49 = arith.mulf %34, %46 : vector<1x128xf32>
    %50 = arith.mulf %48, %49 : vector<1x128xf32>
    %c0_27 = arith.constant 0 : index
    %c0_28 = arith.constant 0 : index
    %c0_29 = arith.constant 0 : index
    %51 = vector.load %arg4[%c0_27, %c0_28, %c0_29] : memref<3x9x128xf32, #tpu.memory_space<vmem>>, vector<1x9x128xf32>
    %52 = vector.shape_cast %51 : vector<1x9x128xf32> to vector<9x128xf32>
    %53 = vector.broadcast %50 : vector<1x128xf32> to vector<9x128xf32>
    %54 = arith.mulf %53, %52 : vector<9x128xf32>
    %c0_30 = arith.constant 0 : index
    %c0_31 = arith.constant 0 : index
    %c0_32 = arith.constant 0 : index
    %55 = vector.load %arg7[%c0_30, %c0_31, %c0_32] : memref<3x1x128xf32, #tpu.memory_space<vmem>>, vector<1x1x128xf32>
    %56 = vector.shape_cast %55 : vector<1x1x128xf32> to vector<1x128xf32>
    %57 = vector.broadcast %56 : vector<1x128xf32> to vector<9x128xf32>
    %58 = arith.addf %54, %57 : vector<9x128xf32>
    %59 = tpu.concatenate %7, %10, %7 in 0 : vector<1x8x128xf32>, vector<8x8x128xf32>, vector<1x8x128xf32> -> vector<10x8x128xf32>
    %cst_33 = arith.constant 0.000000e+00 : f32
    %60 = vector.broadcast %cst_33 : f32 to vector<8x8x128xf32>
    %c1_i32_34 = arith.constant 1 : i32
    %61 = tpu.dynamic_rotate %59 by %c1_i32_34 dim 1 : vector<10x8x128xf32>, i32 -> vector<10x8x128xf32>
    %cst_35 = arith.constant 0.000000e+00 : f32
    %62 = vector.shape_cast %4 : vector<1x8x128xi1> to vector<1x8x128xi1>
    %63 = vector.broadcast %62 : vector<1x8x128xi1> to vector<10x8x128xi1>
    %64 = vector.broadcast %cst_35 : f32 to vector<10x8x128xf32>
    %65 = arith.select %63, %61, %64 : vector<10x8x128xi1>, vector<10x8x128xf32>
    %66 = vector.extract_strided_slice %65 {offsets = [0, 0, 0], sizes = [8, 8, 128], strides = [1, 1, 1]} : vector<10x8x128xf32> to vector<8x8x128xf32>
    %67 = vector.extract_strided_slice %58 {offsets = [0, 0], sizes = [1, 128], strides = [1, 1]} : vector<9x128xf32> to vector<1x128xf32>
    %68 = vector.shape_cast %67 : vector<1x128xf32> to vector<1x1x128xf32>
    %69 = vector.broadcast %68 : vector<1x1x128xf32> to vector<8x8x128xf32>
    %70 = arith.mulf %66, %69 : vector<8x8x128xf32>
    %71 = arith.addf %60, %70 : vector<8x8x128xf32>
    %72 = vector.extract_strided_slice %65 {offsets = [1, 0, 0], sizes = [8, 8, 128], strides = [1, 1, 1]} : vector<10x8x128xf32> to vector<8x8x128xf32>
    %73 = vector.extract_strided_slice %58 {offsets = [3, 0], sizes = [1, 128], strides = [1, 1]} : vector<9x128xf32> to vector<1x128xf32>
    %74 = vector.shape_cast %73 : vector<1x128xf32> to vector<1x1x128xf32>
    %75 = vector.broadcast %74 : vector<1x1x128xf32> to vector<8x8x128xf32>
    %76 = arith.mulf %72, %75 : vector<8x8x128xf32>
    %77 = arith.addf %71, %76 : vector<8x8x128xf32>
    %78 = vector.extract_strided_slice %65 {offsets = [2, 0, 0], sizes = [8, 8, 128], strides = [1, 1, 1]} : vector<10x8x128xf32> to vector<8x8x128xf32>
    %79 = vector.extract_strided_slice %58 {offsets = [6, 0], sizes = [1, 128], strides = [1, 1]} : vector<9x128xf32> to vector<1x128xf32>
    %80 = vector.shape_cast %79 : vector<1x128xf32> to vector<1x1x128xf32>
    %81 = vector.broadcast %80 : vector<1x1x128xf32> to vector<8x8x128xf32>
    %82 = arith.mulf %78, %81 : vector<8x8x128xf32>
    %83 = arith.addf %77, %82 : vector<8x8x128xf32>
    %84 = vector.extract_strided_slice %59 {offsets = [0, 0, 0], sizes = [8, 8, 128], strides = [1, 1, 1]} : vector<10x8x128xf32> to vector<8x8x128xf32>
    %85 = vector.extract_strided_slice %58 {offsets = [1, 0], sizes = [1, 128], strides = [1, 1]} : vector<9x128xf32> to vector<1x128xf32>
    %86 = vector.shape_cast %85 : vector<1x128xf32> to vector<1x1x128xf32>
    %87 = vector.broadcast %86 : vector<1x1x128xf32> to vector<8x8x128xf32>
    %88 = arith.mulf %84, %87 : vector<8x8x128xf32>
    %89 = arith.addf %83, %88 : vector<8x8x128xf32>
    %90 = vector.extract_strided_slice %59 {offsets = [1, 0, 0], sizes = [8, 8, 128], strides = [1, 1, 1]} : vector<10x8x128xf32> to vector<8x8x128xf32>
    %91 = vector.extract_strided_slice %58 {offsets = [4, 0], sizes = [1, 128], strides = [1, 1]} : vector<9x128xf32> to vector<1x128xf32>
    %92 = vector.shape_cast %91 : vector<1x128xf32> to vector<1x1x128xf32>
    %93 = vector.broadcast %92 : vector<1x1x128xf32> to vector<8x8x128xf32>
    %94 = arith.mulf %90, %93 : vector<8x8x128xf32>
    %95 = arith.addf %89, %94 : vector<8x8x128xf32>
    %96 = vector.extract_strided_slice %59 {offsets = [2, 0, 0], sizes = [8, 8, 128], strides = [1, 1, 1]} : vector<10x8x128xf32> to vector<8x8x128xf32>
    %97 = vector.extract_strided_slice %58 {offsets = [7, 0], sizes = [1, 128], strides = [1, 1]} : vector<9x128xf32> to vector<1x128xf32>
    %98 = vector.shape_cast %97 : vector<1x128xf32> to vector<1x1x128xf32>
    %99 = vector.broadcast %98 : vector<1x1x128xf32> to vector<8x8x128xf32>
    %100 = arith.mulf %96, %99 : vector<8x8x128xf32>
    %101 = arith.addf %95, %100 : vector<8x8x128xf32>
    %c7_i32_36 = arith.constant 7 : i32
    %102 = tpu.dynamic_rotate %59 by %c7_i32_36 dim 1 : vector<10x8x128xf32>, i32 -> vector<10x8x128xf32>
    %cst_37 = arith.constant 0.000000e+00 : f32
    %103 = vector.shape_cast %6 : vector<1x8x128xi1> to vector<1x8x128xi1>
    %104 = vector.broadcast %103 : vector<1x8x128xi1> to vector<10x8x128xi1>
    %105 = vector.broadcast %cst_37 : f32 to vector<10x8x128xf32>
    %106 = arith.select %104, %102, %105 : vector<10x8x128xi1>, vector<10x8x128xf32>
    %107 = vector.extract_strided_slice %106 {offsets = [0, 0, 0], sizes = [8, 8, 128], strides = [1, 1, 1]} : vector<10x8x128xf32> to vector<8x8x128xf32>
    %108 = vector.extract_strided_slice %58 {offsets = [2, 0], sizes = [1, 128], strides = [1, 1]} : vector<9x128xf32> to vector<1x128xf32>
    %109 = vector.shape_cast %108 : vector<1x128xf32> to vector<1x1x128xf32>
    %110 = vector.broadcast %109 : vector<1x1x128xf32> to vector<8x8x128xf32>
    %111 = arith.mulf %107, %110 : vector<8x8x128xf32>
    %112 = arith.addf %101, %111 : vector<8x8x128xf32>
    %113 = vector.extract_strided_slice %106 {offsets = [1, 0, 0], sizes = [8, 8, 128], strides = [1, 1, 1]} : vector<10x8x128xf32> to vector<8x8x128xf32>
    %114 = vector.extract_strided_slice %58 {offsets = [5, 0], sizes = [1, 128], strides = [1, 1]} : vector<9x128xf32> to vector<1x128xf32>
    %115 = vector.shape_cast %114 : vector<1x128xf32> to vector<1x1x128xf32>
    %116 = vector.broadcast %115 : vector<1x1x128xf32> to vector<8x8x128xf32>
    %117 = arith.mulf %113, %116 : vector<8x8x128xf32>
    %118 = arith.addf %112, %117 : vector<8x8x128xf32>
    %119 = vector.extract_strided_slice %106 {offsets = [2, 0, 0], sizes = [8, 8, 128], strides = [1, 1, 1]} : vector<10x8x128xf32> to vector<8x8x128xf32>
    %120 = vector.extract_strided_slice %58 {offsets = [8, 0], sizes = [1, 128], strides = [1, 1]} : vector<9x128xf32> to vector<1x128xf32>
    %121 = vector.shape_cast %120 : vector<1x128xf32> to vector<1x1x128xf32>
    %122 = vector.broadcast %121 : vector<1x1x128xf32> to vector<8x8x128xf32>
    %123 = arith.mulf %119, %122 : vector<8x8x128xf32>
    %124 = arith.addf %118, %123 : vector<8x8x128xf32>
    %125 = vector.shape_cast %124 : vector<8x8x128xf32> to vector<64x128xf32>
    %cst_38 = arith.constant dense<0.000000e+00> : vector<64x1xf32>
    %126 = tpu.matmul %125, %9, %cst_38 {dimension_numbers = #tpu.dot_dimension_numbers<[1], [0], [0], [1], [0, 0, 1, 1], [], []>} : vector<64x128xf32>, vector<128x1xf32>, vector<64x1xf32> -> vector<64x1xf32>
    %127 = vector.broadcast %126 : vector<64x1xf32> to vector<64x128xf32>
    %128 = arith.subf %125, %127 : vector<64x128xf32>
    %129 = arith.mulf %128, %128 : vector<64x128xf32>
    %cst_39 = arith.constant dense<0.000000e+00> : vector<64x1xf32>
    %130 = tpu.matmul %129, %9, %cst_39 {dimension_numbers = #tpu.dot_dimension_numbers<[1], [0], [0], [1], [0, 0, 1, 1], [], []>} : vector<64x128xf32>, vector<128x1xf32>, vector<64x1xf32> -> vector<64x1xf32>
    %cst_40 = arith.constant 9.99999997E-7 : f32
    %131 = vector.broadcast %cst_40 : f32 to vector<64x1xf32>
    %132 = arith.addf %130, %131 : vector<64x1xf32>
    %133 = math.rsqrt %132 : vector<64x1xf32>
    %134 = vector.broadcast %133 : vector<64x1xf32> to vector<64x128xf32>
    %135 = arith.mulf %128, %134 : vector<64x128xf32>
    %c0_41 = arith.constant 0 : index
    %c0_42 = arith.constant 0 : index
    %c0_43 = arith.constant 0 : index
    %136 = vector.load %arg8[%c0_41, %c0_42, %c0_43] : memref<3x1x128xf32, #tpu.memory_space<vmem>>, vector<1x1x128xf32>
    %137 = vector.shape_cast %136 : vector<1x1x128xf32> to vector<1x128xf32>
    %138 = vector.broadcast %137 : vector<1x128xf32> to vector<64x128xf32>
    %139 = arith.mulf %135, %138 : vector<64x128xf32>
    %c0_44 = arith.constant 0 : index
    %c0_45 = arith.constant 0 : index
    %c0_46 = arith.constant 0 : index
    %140 = vector.load %arg9[%c0_44, %c0_45, %c0_46] : memref<3x1x128xf32, #tpu.memory_space<vmem>>, vector<1x1x128xf32>
    %141 = vector.shape_cast %140 : vector<1x1x128xf32> to vector<1x128xf32>
    %142 = vector.broadcast %141 : vector<1x128xf32> to vector<64x128xf32>
    %143 = arith.addf %139, %142 : vector<64x128xf32>
    %144 = arith.truncf %143 : vector<64x128xf32> to vector<64x128xbf16>
    %c0_47 = arith.constant 0 : index
    %c0_48 = arith.constant 0 : index
    %c0_49 = arith.constant 0 : index
    %145 = vector.load %arg10[%c0_47, %c0_48, %c0_49] : memref<3x128x128xbf16, #tpu.memory_space<vmem>>, vector<1x128x128xbf16>
    %146 = vector.shape_cast %145 : vector<1x128x128xbf16> to vector<128x128xbf16>
    %cst_50 = arith.constant dense<0.000000e+00> : vector<64x128xf32>
    %147 = tpu.matmul %144, %146, %cst_50 {dimension_numbers = #tpu.dot_dimension_numbers<[1], [0], [0], [1], [0, 0, 1, 1], [], []>} : vector<64x128xbf16>, vector<128x128xbf16>, vector<64x128xf32> -> vector<64x128xf32>
    %c0_51 = arith.constant 0 : index
    %c0_52 = arith.constant 0 : index
    %c0_53 = arith.constant 0 : index
    %148 = vector.load %arg11[%c0_51, %c0_52, %c0_53] : memref<3x1x128xf32, #tpu.memory_space<vmem>>, vector<1x1x128xf32>
    %149 = vector.shape_cast %148 : vector<1x1x128xf32> to vector<1x128xf32>
    %150 = vector.broadcast %149 : vector<1x128xf32> to vector<64x128xf32>
    %151 = arith.addf %147, %150 : vector<64x128xf32>
    %cst_54 = arith.constant 5.000000e-01 : f32
    %152 = vector.broadcast %cst_54 : f32 to vector<64x128xf32>
    %153 = arith.mulf %152, %151 : vector<64x128xf32>
    %154 = arith.mulf %151, %151 : vector<64x128xf32>
    %155 = arith.mulf %154, %151 : vector<64x128xf32>
    %cst_55 = arith.constant 4.471500e-02 : f32
    %156 = vector.broadcast %cst_55 : f32 to vector<64x128xf32>
    %157 = arith.mulf %156, %155 : vector<64x128xf32>
    %158 = arith.addf %151, %157 : vector<64x128xf32>
    %cst_56 = arith.constant 0.797884583 : f32
    %159 = vector.broadcast %cst_56 : f32 to vector<64x128xf32>
    %160 = arith.mulf %159, %158 : vector<64x128xf32>
    %161 = math.tanh %160 : vector<64x128xf32>
    %cst_57 = arith.constant 1.000000e+00 : f32
    %162 = vector.broadcast %cst_57 : f32 to vector<64x128xf32>
    %163 = arith.addf %162, %161 : vector<64x128xf32>
    %164 = arith.mulf %153, %163 : vector<64x128xf32>
    %165 = arith.truncf %164 : vector<64x128xf32> to vector<64x128xbf16>
    %c0_58 = arith.constant 0 : index
    %c0_59 = arith.constant 0 : index
    %c0_60 = arith.constant 0 : index
    %166 = vector.load %arg12[%c0_58, %c0_59, %c0_60] : memref<3x128x128xbf16, #tpu.memory_space<vmem>>, vector<1x128x128xbf16>
    %167 = vector.shape_cast %166 : vector<1x128x128xbf16> to vector<128x128xbf16>
    %cst_61 = arith.constant dense<0.000000e+00> : vector<64x128xf32>
    %168 = tpu.matmul %165, %167, %cst_61 {dimension_numbers = #tpu.dot_dimension_numbers<[1], [0], [0], [1], [0, 0, 1, 1], [], []>} : vector<64x128xbf16>, vector<128x128xbf16>, vector<64x128xf32> -> vector<64x128xf32>
    %c0_62 = arith.constant 0 : index
    %c0_63 = arith.constant 0 : index
    %c0_64 = arith.constant 0 : index
    %169 = vector.load %arg13[%c0_62, %c0_63, %c0_64] : memref<3x1x128xf32, #tpu.memory_space<vmem>>, vector<1x1x128xf32>
    %170 = vector.shape_cast %169 : vector<1x1x128xf32> to vector<1x128xf32>
    %171 = vector.broadcast %170 : vector<1x128xf32> to vector<64x128xf32>
    %172 = arith.addf %168, %171 : vector<64x128xf32>
    %173 = arith.addf %1, %172 : vector<64x128xf32>
    %174 = vector.shape_cast %173 : vector<64x128xf32> to vector<8x8x128xf32>
    %cst_65 = arith.constant dense<0.000000e+00> : vector<1x128xf32>
    %175 = tpu.matmul %8, %173, %cst_65 {dimension_numbers = #tpu.dot_dimension_numbers<[1], [0], [0], [1], [0, 0, 1, 1], [], []>} : vector<1x64xf32>, vector<64x128xf32>, vector<1x128xf32> -> vector<1x128xf32>
    %cst_66 = arith.constant dense<0xFF800000> : vector<128xf32>
    %176 = vector.multi_reduction <maximumf>, %173, %cst_66 [0] : vector<64x128xf32> to vector<128xf32>
    %177 = vector.shape_cast %176 : vector<128xf32> to vector<1x128xf32>
    %178 = tpu.concatenate %175, %177 in 1 : vector<1x128xf32>, vector<1x128xf32> -> vector<1x256xf32>
    %179 = arith.truncf %178 : vector<1x256xf32> to vector<1x256xbf16>
    %c1 = arith.constant 1 : index
    %c0_67 = arith.constant 0 : index
    %c0_68 = arith.constant 0 : index
    %180 = vector.load %arg2[%c1, %c0_67, %c0_68] : memref<3x256x128xbf16, #tpu.memory_space<vmem>>, vector<1x256x128xbf16>
    %181 = vector.shape_cast %180 : vector<1x256x128xbf16> to vector<256x128xbf16>
    %cst_69 = arith.constant dense<0.000000e+00> : vector<1x128xf32>
    %182 = tpu.matmul %179, %181, %cst_69 {dimension_numbers = #tpu.dot_dimension_numbers<[1], [0], [0], [1], [0, 0, 1, 1], [], []>} : vector<1x256xbf16>, vector<256x128xbf16>, vector<1x128xf32> -> vector<1x128xf32>
    %c1_70 = arith.constant 1 : index
    %c0_71 = arith.constant 0 : index
    %c0_72 = arith.constant 0 : index
    %183 = vector.load %arg3[%c1_70, %c0_71, %c0_72] : memref<3x1x128xf32, #tpu.memory_space<vmem>>, vector<1x1x128xf32>
    %184 = vector.shape_cast %183 : vector<1x1x128xf32> to vector<1x128xf32>
    %185 = arith.addf %182, %184 : vector<1x128xf32>
    %cst_73 = arith.constant 5.000000e-01 : f32
    %186 = vector.broadcast %cst_73 : f32 to vector<1x128xf32>
    %187 = arith.mulf %186, %185 : vector<1x128xf32>
    %188 = arith.mulf %185, %185 : vector<1x128xf32>
    %189 = arith.mulf %188, %185 : vector<1x128xf32>
    %cst_74 = arith.constant 4.471500e-02 : f32
    %190 = vector.broadcast %cst_74 : f32 to vector<1x128xf32>
    %191 = arith.mulf %190, %189 : vector<1x128xf32>
    %192 = arith.addf %185, %191 : vector<1x128xf32>
    %cst_75 = arith.constant 0.797884583 : f32
    %193 = vector.broadcast %cst_75 : f32 to vector<1x128xf32>
    %194 = arith.mulf %193, %192 : vector<1x128xf32>
    %195 = math.tanh %194 : vector<1x128xf32>
    %cst_76 = arith.constant 1.000000e+00 : f32
    %196 = vector.broadcast %cst_76 : f32 to vector<1x128xf32>
    %197 = arith.addf %196, %195 : vector<1x128xf32>
    %198 = arith.mulf %187, %197 : vector<1x128xf32>
    %199 = math.absf %198 : vector<1x128xf32>
    %c1_77 = arith.constant 1 : index
    %c0_78 = arith.constant 0 : index
    %c0_79 = arith.constant 0 : index
    %200 = vector.load %arg5[%c1_77, %c0_78, %c0_79] : memref<3x1x128xf32, #tpu.memory_space<vmem>>, vector<1x1x128xf32>
    %201 = vector.shape_cast %200 : vector<1x1x128xf32> to vector<1x128xf32>
    %202 = arith.mulf %199, %201 : vector<1x128xf32>
    %cst_80 = arith.constant dense<0.000000e+00> : vector<1xf32>
    %203 = vector.multi_reduction <add>, %202, %cst_80 [1] : vector<1x128xf32> to vector<1xf32>
    %204 = vector.shape_cast %203 : vector<1xf32> to vector<1x1xf32>
    %cst_81 = arith.constant 1.280000e+02 : f32
    %205 = vector.broadcast %cst_81 : f32 to vector<1x1xf32>
    %206 = arith.divf %204, %205 : vector<1x1xf32>
    %cst_82 = arith.constant 9.99999997E-7 : f32
    %207 = vector.broadcast %cst_82 : f32 to vector<1x1xf32>
    %208 = arith.addf %206, %207 : vector<1x1xf32>
    %209 = vector.broadcast %208 : vector<1x1xf32> to vector<1x128xf32>
    %210 = arith.divf %202, %209 : vector<1x128xf32>
    %c1_83 = arith.constant 1 : index
    %c0_84 = arith.constant 0 : index
    %c0_85 = arith.constant 0 : index
    %211 = vector.load %arg6[%c1_83, %c0_84, %c0_85] : memref<3x1x128xf32, #tpu.memory_space<vmem>>, vector<1x1x128xf32>
    %212 = vector.shape_cast %211 : vector<1x1x128xf32> to vector<1x128xf32>
    %213 = arith.mulf %198, %210 : vector<1x128xf32>
    %214 = arith.mulf %212, %213 : vector<1x128xf32>
    %c1_86 = arith.constant 1 : index
    %c0_87 = arith.constant 0 : index
    %c0_88 = arith.constant 0 : index
    %215 = vector.load %arg4[%c1_86, %c0_87, %c0_88] : memref<3x9x128xf32, #tpu.memory_space<vmem>>, vector<1x9x128xf32>
    %216 = vector.shape_cast %215 : vector<1x9x128xf32> to vector<9x128xf32>
    %217 = vector.broadcast %214 : vector<1x128xf32> to vector<9x128xf32>
    %218 = arith.mulf %217, %216 : vector<9x128xf32>
    %c1_89 = arith.constant 1 : index
    %c0_90 = arith.constant 0 : index
    %c0_91 = arith.constant 0 : index
    %219 = vector.load %arg7[%c1_89, %c0_90, %c0_91] : memref<3x1x128xf32, #tpu.memory_space<vmem>>, vector<1x1x128xf32>
    %220 = vector.shape_cast %219 : vector<1x1x128xf32> to vector<1x128xf32>
    %221 = vector.broadcast %220 : vector<1x128xf32> to vector<9x128xf32>
    %222 = arith.addf %218, %221 : vector<9x128xf32>
    %223 = tpu.concatenate %7, %174, %7 in 0 : vector<1x8x128xf32>, vector<8x8x128xf32>, vector<1x8x128xf32> -> vector<10x8x128xf32>
    %cst_92 = arith.constant 0.000000e+00 : f32
    %224 = vector.broadcast %cst_92 : f32 to vector<8x8x128xf32>
    %c1_i32_93 = arith.constant 1 : i32
    %225 = tpu.dynamic_rotate %223 by %c1_i32_93 dim 1 : vector<10x8x128xf32>, i32 -> vector<10x8x128xf32>
    %cst_94 = arith.constant 0.000000e+00 : f32
    %226 = vector.shape_cast %4 : vector<1x8x128xi1> to vector<1x8x128xi1>
    %227 = vector.broadcast %226 : vector<1x8x128xi1> to vector<10x8x128xi1>
    %228 = vector.broadcast %cst_94 : f32 to vector<10x8x128xf32>
    %229 = arith.select %227, %225, %228 : vector<10x8x128xi1>, vector<10x8x128xf32>
    %230 = vector.extract_strided_slice %229 {offsets = [0, 0, 0], sizes = [8, 8, 128], strides = [1, 1, 1]} : vector<10x8x128xf32> to vector<8x8x128xf32>
    %231 = vector.extract_strided_slice %222 {offsets = [0, 0], sizes = [1, 128], strides = [1, 1]} : vector<9x128xf32> to vector<1x128xf32>
    %232 = vector.shape_cast %231 : vector<1x128xf32> to vector<1x1x128xf32>
    %233 = vector.broadcast %232 : vector<1x1x128xf32> to vector<8x8x128xf32>
    %234 = arith.mulf %230, %233 : vector<8x8x128xf32>
    %235 = arith.addf %224, %234 : vector<8x8x128xf32>
    %236 = vector.extract_strided_slice %229 {offsets = [1, 0, 0], sizes = [8, 8, 128], strides = [1, 1, 1]} : vector<10x8x128xf32> to vector<8x8x128xf32>
    %237 = vector.extract_strided_slice %222 {offsets = [3, 0], sizes = [1, 128], strides = [1, 1]} : vector<9x128xf32> to vector<1x128xf32>
    %238 = vector.shape_cast %237 : vector<1x128xf32> to vector<1x1x128xf32>
    %239 = vector.broadcast %238 : vector<1x1x128xf32> to vector<8x8x128xf32>
    %240 = arith.mulf %236, %239 : vector<8x8x128xf32>
    %241 = arith.addf %235, %240 : vector<8x8x128xf32>
    %242 = vector.extract_strided_slice %229 {offsets = [2, 0, 0], sizes = [8, 8, 128], strides = [1, 1, 1]} : vector<10x8x128xf32> to vector<8x8x128xf32>
    %243 = vector.extract_strided_slice %222 {offsets = [6, 0], sizes = [1, 128], strides = [1, 1]} : vector<9x128xf32> to vector<1x128xf32>
    %244 = vector.shape_cast %243 : vector<1x128xf32> to vector<1x1x128xf32>
    %245 = vector.broadcast %244 : vector<1x1x128xf32> to vector<8x8x128xf32>
    %246 = arith.mulf %242, %245 : vector<8x8x128xf32>
    %247 = arith.addf %241, %246 : vector<8x8x128xf32>
    %248 = vector.extract_strided_slice %223 {offsets = [0, 0, 0], sizes = [8, 8, 128], strides = [1, 1, 1]} : vector<10x8x128xf32> to vector<8x8x128xf32>
    %249 = vector.extract_strided_slice %222 {offsets = [1, 0], sizes = [1, 128], strides = [1, 1]} : vector<9x128xf32> to vector<1x128xf32>
    %250 = vector.shape_cast %249 : vector<1x128xf32> to vector<1x1x128xf32>
    %251 = vector.broadcast %250 : vector<1x1x128xf32> to vector<8x8x128xf32>
    %252 = arith.mulf %248, %251 : vector<8x8x128xf32>
    %253 = arith.addf %247, %252 : vector<8x8x128xf32>
    %254 = vector.extract_strided_slice %223 {offsets = [1, 0, 0], sizes = [8, 8, 128], strides = [1, 1, 1]} : vector<10x8x128xf32> to vector<8x8x128xf32>
    %255 = vector.extract_strided_slice %222 {offsets = [4, 0], sizes = [1, 128], strides = [1, 1]} : vector<9x128xf32> to vector<1x128xf32>
    %256 = vector.shape_cast %255 : vector<1x128xf32> to vector<1x1x128xf32>
    %257 = vector.broadcast %256 : vector<1x1x128xf32> to vector<8x8x128xf32>
    %258 = arith.mulf %254, %257 : vector<8x8x128xf32>
    %259 = arith.addf %253, %258 : vector<8x8x128xf32>
    %260 = vector.extract_strided_slice %223 {offsets = [2, 0, 0], sizes = [8, 8, 128], strides = [1, 1, 1]} : vector<10x8x128xf32> to vector<8x8x128xf32>
    %261 = vector.extract_strided_slice %222 {offsets = [7, 0], sizes = [1, 128], strides = [1, 1]} : vector<9x128xf32> to vector<1x128xf32>
    %262 = vector.shape_cast %261 : vector<1x128xf32> to vector<1x1x128xf32>
    %263 = vector.broadcast %262 : vector<1x1x128xf32> to vector<8x8x128xf32>
    %264 = arith.mulf %260, %263 : vector<8x8x128xf32>
    %265 = arith.addf %259, %264 : vector<8x8x128xf32>
    %c7_i32_95 = arith.constant 7 : i32
    %266 = tpu.dynamic_rotate %223 by %c7_i32_95 dim 1 : vector<10x8x128xf32>, i32 -> vector<10x8x128xf32>
    %cst_96 = arith.constant 0.000000e+00 : f32
    %267 = vector.shape_cast %6 : vector<1x8x128xi1> to vector<1x8x128xi1>
    %268 = vector.broadcast %267 : vector<1x8x128xi1> to vector<10x8x128xi1>
    %269 = vector.broadcast %cst_96 : f32 to vector<10x8x128xf32>
    %270 = arith.select %268, %266, %269 : vector<10x8x128xi1>, vector<10x8x128xf32>
    %271 = vector.extract_strided_slice %270 {offsets = [0, 0, 0], sizes = [8, 8, 128], strides = [1, 1, 1]} : vector<10x8x128xf32> to vector<8x8x128xf32>
    %272 = vector.extract_strided_slice %222 {offsets = [2, 0], sizes = [1, 128], strides = [1, 1]} : vector<9x128xf32> to vector<1x128xf32>
    %273 = vector.shape_cast %272 : vector<1x128xf32> to vector<1x1x128xf32>
    %274 = vector.broadcast %273 : vector<1x1x128xf32> to vector<8x8x128xf32>
    %275 = arith.mulf %271, %274 : vector<8x8x128xf32>
    %276 = arith.addf %265, %275 : vector<8x8x128xf32>
    %277 = vector.extract_strided_slice %270 {offsets = [1, 0, 0], sizes = [8, 8, 128], strides = [1, 1, 1]} : vector<10x8x128xf32> to vector<8x8x128xf32>
    %278 = vector.extract_strided_slice %222 {offsets = [5, 0], sizes = [1, 128], strides = [1, 1]} : vector<9x128xf32> to vector<1x128xf32>
    %279 = vector.shape_cast %278 : vector<1x128xf32> to vector<1x1x128xf32>
    %280 = vector.broadcast %279 : vector<1x1x128xf32> to vector<8x8x128xf32>
    %281 = arith.mulf %277, %280 : vector<8x8x128xf32>
    %282 = arith.addf %276, %281 : vector<8x8x128xf32>
    %283 = vector.extract_strided_slice %270 {offsets = [2, 0, 0], sizes = [8, 8, 128], strides = [1, 1, 1]} : vector<10x8x128xf32> to vector<8x8x128xf32>
    %284 = vector.extract_strided_slice %222 {offsets = [8, 0], sizes = [1, 128], strides = [1, 1]} : vector<9x128xf32> to vector<1x128xf32>
    %285 = vector.shape_cast %284 : vector<1x128xf32> to vector<1x1x128xf32>
    %286 = vector.broadcast %285 : vector<1x1x128xf32> to vector<8x8x128xf32>
    %287 = arith.mulf %283, %286 : vector<8x8x128xf32>
    %288 = arith.addf %282, %287 : vector<8x8x128xf32>
    %289 = vector.shape_cast %288 : vector<8x8x128xf32> to vector<64x128xf32>
    %cst_97 = arith.constant dense<0.000000e+00> : vector<64x1xf32>
    %290 = tpu.matmul %289, %9, %cst_97 {dimension_numbers = #tpu.dot_dimension_numbers<[1], [0], [0], [1], [0, 0, 1, 1], [], []>} : vector<64x128xf32>, vector<128x1xf32>, vector<64x1xf32> -> vector<64x1xf32>
    %291 = vector.broadcast %290 : vector<64x1xf32> to vector<64x128xf32>
    %292 = arith.subf %289, %291 : vector<64x128xf32>
    %293 = arith.mulf %292, %292 : vector<64x128xf32>
    %cst_98 = arith.constant dense<0.000000e+00> : vector<64x1xf32>
    %294 = tpu.matmul %293, %9, %cst_98 {dimension_numbers = #tpu.dot_dimension_numbers<[1], [0], [0], [1], [0, 0, 1, 1], [], []>} : vector<64x128xf32>, vector<128x1xf32>, vector<64x1xf32> -> vector<64x1xf32>
    %cst_99 = arith.constant 9.99999997E-7 : f32
    %295 = vector.broadcast %cst_99 : f32 to vector<64x1xf32>
    %296 = arith.addf %294, %295 : vector<64x1xf32>
    %297 = math.rsqrt %296 : vector<64x1xf32>
    %298 = vector.broadcast %297 : vector<64x1xf32> to vector<64x128xf32>
    %299 = arith.mulf %292, %298 : vector<64x128xf32>
    %c1_100 = arith.constant 1 : index
    %c0_101 = arith.constant 0 : index
    %c0_102 = arith.constant 0 : index
    %300 = vector.load %arg8[%c1_100, %c0_101, %c0_102] : memref<3x1x128xf32, #tpu.memory_space<vmem>>, vector<1x1x128xf32>
    %301 = vector.shape_cast %300 : vector<1x1x128xf32> to vector<1x128xf32>
    %302 = vector.broadcast %301 : vector<1x128xf32> to vector<64x128xf32>
    %303 = arith.mulf %299, %302 : vector<64x128xf32>
    %c1_103 = arith.constant 1 : index
    %c0_104 = arith.constant 0 : index
    %c0_105 = arith.constant 0 : index
    %304 = vector.load %arg9[%c1_103, %c0_104, %c0_105] : memref<3x1x128xf32, #tpu.memory_space<vmem>>, vector<1x1x128xf32>
    %305 = vector.shape_cast %304 : vector<1x1x128xf32> to vector<1x128xf32>
    %306 = vector.broadcast %305 : vector<1x128xf32> to vector<64x128xf32>
    %307 = arith.addf %303, %306 : vector<64x128xf32>
    %308 = arith.truncf %307 : vector<64x128xf32> to vector<64x128xbf16>
    %c1_106 = arith.constant 1 : index
    %c0_107 = arith.constant 0 : index
    %c0_108 = arith.constant 0 : index
    %309 = vector.load %arg10[%c1_106, %c0_107, %c0_108] : memref<3x128x128xbf16, #tpu.memory_space<vmem>>, vector<1x128x128xbf16>
    %310 = vector.shape_cast %309 : vector<1x128x128xbf16> to vector<128x128xbf16>
    %cst_109 = arith.constant dense<0.000000e+00> : vector<64x128xf32>
    %311 = tpu.matmul %308, %310, %cst_109 {dimension_numbers = #tpu.dot_dimension_numbers<[1], [0], [0], [1], [0, 0, 1, 1], [], []>} : vector<64x128xbf16>, vector<128x128xbf16>, vector<64x128xf32> -> vector<64x128xf32>
    %c1_110 = arith.constant 1 : index
    %c0_111 = arith.constant 0 : index
    %c0_112 = arith.constant 0 : index
    %312 = vector.load %arg11[%c1_110, %c0_111, %c0_112] : memref<3x1x128xf32, #tpu.memory_space<vmem>>, vector<1x1x128xf32>
    %313 = vector.shape_cast %312 : vector<1x1x128xf32> to vector<1x128xf32>
    %314 = vector.broadcast %313 : vector<1x128xf32> to vector<64x128xf32>
    %315 = arith.addf %311, %314 : vector<64x128xf32>
    %cst_113 = arith.constant 5.000000e-01 : f32
    %316 = vector.broadcast %cst_113 : f32 to vector<64x128xf32>
    %317 = arith.mulf %316, %315 : vector<64x128xf32>
    %318 = arith.mulf %315, %315 : vector<64x128xf32>
    %319 = arith.mulf %318, %315 : vector<64x128xf32>
    %cst_114 = arith.constant 4.471500e-02 : f32
    %320 = vector.broadcast %cst_114 : f32 to vector<64x128xf32>
    %321 = arith.mulf %320, %319 : vector<64x128xf32>
    %322 = arith.addf %315, %321 : vector<64x128xf32>
    %cst_115 = arith.constant 0.797884583 : f32
    %323 = vector.broadcast %cst_115 : f32 to vector<64x128xf32>
    %324 = arith.mulf %323, %322 : vector<64x128xf32>
    %325 = math.tanh %324 : vector<64x128xf32>
    %cst_116 = arith.constant 1.000000e+00 : f32
    %326 = vector.broadcast %cst_116 : f32 to vector<64x128xf32>
    %327 = arith.addf %326, %325 : vector<64x128xf32>
    %328 = arith.mulf %317, %327 : vector<64x128xf32>
    %329 = arith.truncf %328 : vector<64x128xf32> to vector<64x128xbf16>
    %c1_117 = arith.constant 1 : index
    %c0_118 = arith.constant 0 : index
    %c0_119 = arith.constant 0 : index
    %330 = vector.load %arg12[%c1_117, %c0_118, %c0_119] : memref<3x128x128xbf16, #tpu.memory_space<vmem>>, vector<1x128x128xbf16>
    %331 = vector.shape_cast %330 : vector<1x128x128xbf16> to vector<128x128xbf16>
    %cst_120 = arith.constant dense<0.000000e+00> : vector<64x128xf32>
    %332 = tpu.matmul %329, %331, %cst_120 {dimension_numbers = #tpu.dot_dimension_numbers<[1], [0], [0], [1], [0, 0, 1, 1], [], []>} : vector<64x128xbf16>, vector<128x128xbf16>, vector<64x128xf32> -> vector<64x128xf32>
    %c1_121 = arith.constant 1 : index
    %c0_122 = arith.constant 0 : index
    %c0_123 = arith.constant 0 : index
    %333 = vector.load %arg13[%c1_121, %c0_122, %c0_123] : memref<3x1x128xf32, #tpu.memory_space<vmem>>, vector<1x1x128xf32>
    %334 = vector.shape_cast %333 : vector<1x1x128xf32> to vector<1x128xf32>
    %335 = vector.broadcast %334 : vector<1x128xf32> to vector<64x128xf32>
    %336 = arith.addf %332, %335 : vector<64x128xf32>
    %337 = arith.addf %173, %336 : vector<64x128xf32>
    %338 = vector.shape_cast %337 : vector<64x128xf32> to vector<8x8x128xf32>
    %cst_124 = arith.constant dense<0.000000e+00> : vector<1x128xf32>
    %339 = tpu.matmul %8, %337, %cst_124 {dimension_numbers = #tpu.dot_dimension_numbers<[1], [0], [0], [1], [0, 0, 1, 1], [], []>} : vector<1x64xf32>, vector<64x128xf32>, vector<1x128xf32> -> vector<1x128xf32>
    %cst_125 = arith.constant dense<0xFF800000> : vector<128xf32>
    %340 = vector.multi_reduction <maximumf>, %337, %cst_125 [0] : vector<64x128xf32> to vector<128xf32>
    %341 = vector.shape_cast %340 : vector<128xf32> to vector<1x128xf32>
    %342 = tpu.concatenate %339, %341 in 1 : vector<1x128xf32>, vector<1x128xf32> -> vector<1x256xf32>
    %343 = arith.truncf %342 : vector<1x256xf32> to vector<1x256xbf16>
    %c2 = arith.constant 2 : index
    %c0_126 = arith.constant 0 : index
    %c0_127 = arith.constant 0 : index
    %344 = vector.load %arg2[%c2, %c0_126, %c0_127] : memref<3x256x128xbf16, #tpu.memory_space<vmem>>, vector<1x256x128xbf16>
    %345 = vector.shape_cast %344 : vector<1x256x128xbf16> to vector<256x128xbf16>
    %cst_128 = arith.constant dense<0.000000e+00> : vector<1x128xf32>
    %346 = tpu.matmul %343, %345, %cst_128 {dimension_numbers = #tpu.dot_dimension_numbers<[1], [0], [0], [1], [0, 0, 1, 1], [], []>} : vector<1x256xbf16>, vector<256x128xbf16>, vector<1x128xf32> -> vector<1x128xf32>
    %c2_129 = arith.constant 2 : index
    %c0_130 = arith.constant 0 : index
    %c0_131 = arith.constant 0 : index
    %347 = vector.load %arg3[%c2_129, %c0_130, %c0_131] : memref<3x1x128xf32, #tpu.memory_space<vmem>>, vector<1x1x128xf32>
    %348 = vector.shape_cast %347 : vector<1x1x128xf32> to vector<1x128xf32>
    %349 = arith.addf %346, %348 : vector<1x128xf32>
    %cst_132 = arith.constant 5.000000e-01 : f32
    %350 = vector.broadcast %cst_132 : f32 to vector<1x128xf32>
    %351 = arith.mulf %350, %349 : vector<1x128xf32>
    %352 = arith.mulf %349, %349 : vector<1x128xf32>
    %353 = arith.mulf %352, %349 : vector<1x128xf32>
    %cst_133 = arith.constant 4.471500e-02 : f32
    %354 = vector.broadcast %cst_133 : f32 to vector<1x128xf32>
    %355 = arith.mulf %354, %353 : vector<1x128xf32>
    %356 = arith.addf %349, %355 : vector<1x128xf32>
    %cst_134 = arith.constant 0.797884583 : f32
    %357 = vector.broadcast %cst_134 : f32 to vector<1x128xf32>
    %358 = arith.mulf %357, %356 : vector<1x128xf32>
    %359 = math.tanh %358 : vector<1x128xf32>
    %cst_135 = arith.constant 1.000000e+00 : f32
    %360 = vector.broadcast %cst_135 : f32 to vector<1x128xf32>
    %361 = arith.addf %360, %359 : vector<1x128xf32>
    %362 = arith.mulf %351, %361 : vector<1x128xf32>
    %363 = math.absf %362 : vector<1x128xf32>
    %c2_136 = arith.constant 2 : index
    %c0_137 = arith.constant 0 : index
    %c0_138 = arith.constant 0 : index
    %364 = vector.load %arg5[%c2_136, %c0_137, %c0_138] : memref<3x1x128xf32, #tpu.memory_space<vmem>>, vector<1x1x128xf32>
    %365 = vector.shape_cast %364 : vector<1x1x128xf32> to vector<1x128xf32>
    %366 = arith.mulf %363, %365 : vector<1x128xf32>
    %cst_139 = arith.constant dense<0.000000e+00> : vector<1xf32>
    %367 = vector.multi_reduction <add>, %366, %cst_139 [1] : vector<1x128xf32> to vector<1xf32>
    %368 = vector.shape_cast %367 : vector<1xf32> to vector<1x1xf32>
    %cst_140 = arith.constant 1.280000e+02 : f32
    %369 = vector.broadcast %cst_140 : f32 to vector<1x1xf32>
    %370 = arith.divf %368, %369 : vector<1x1xf32>
    %cst_141 = arith.constant 9.99999997E-7 : f32
    %371 = vector.broadcast %cst_141 : f32 to vector<1x1xf32>
    %372 = arith.addf %370, %371 : vector<1x1xf32>
    %373 = vector.broadcast %372 : vector<1x1xf32> to vector<1x128xf32>
    %374 = arith.divf %366, %373 : vector<1x128xf32>
    %c2_142 = arith.constant 2 : index
    %c0_143 = arith.constant 0 : index
    %c0_144 = arith.constant 0 : index
    %375 = vector.load %arg6[%c2_142, %c0_143, %c0_144] : memref<3x1x128xf32, #tpu.memory_space<vmem>>, vector<1x1x128xf32>
    %376 = vector.shape_cast %375 : vector<1x1x128xf32> to vector<1x128xf32>
    %377 = arith.mulf %362, %374 : vector<1x128xf32>
    %378 = arith.mulf %376, %377 : vector<1x128xf32>
    %c2_145 = arith.constant 2 : index
    %c0_146 = arith.constant 0 : index
    %c0_147 = arith.constant 0 : index
    %379 = vector.load %arg4[%c2_145, %c0_146, %c0_147] : memref<3x9x128xf32, #tpu.memory_space<vmem>>, vector<1x9x128xf32>
    %380 = vector.shape_cast %379 : vector<1x9x128xf32> to vector<9x128xf32>
    %381 = vector.broadcast %378 : vector<1x128xf32> to vector<9x128xf32>
    %382 = arith.mulf %381, %380 : vector<9x128xf32>
    %c2_148 = arith.constant 2 : index
    %c0_149 = arith.constant 0 : index
    %c0_150 = arith.constant 0 : index
    %383 = vector.load %arg7[%c2_148, %c0_149, %c0_150] : memref<3x1x128xf32, #tpu.memory_space<vmem>>, vector<1x1x128xf32>
    %384 = vector.shape_cast %383 : vector<1x1x128xf32> to vector<1x128xf32>
    %385 = vector.broadcast %384 : vector<1x128xf32> to vector<9x128xf32>
    %386 = arith.addf %382, %385 : vector<9x128xf32>
    %387 = tpu.concatenate %7, %338, %7 in 0 : vector<1x8x128xf32>, vector<8x8x128xf32>, vector<1x8x128xf32> -> vector<10x8x128xf32>
    %cst_151 = arith.constant 0.000000e+00 : f32
    %388 = vector.broadcast %cst_151 : f32 to vector<8x8x128xf32>
    %c1_i32_152 = arith.constant 1 : i32
    %389 = tpu.dynamic_rotate %387 by %c1_i32_152 dim 1 : vector<10x8x128xf32>, i32 -> vector<10x8x128xf32>
    %cst_153 = arith.constant 0.000000e+00 : f32
    %390 = vector.shape_cast %4 : vector<1x8x128xi1> to vector<1x8x128xi1>
    %391 = vector.broadcast %390 : vector<1x8x128xi1> to vector<10x8x128xi1>
    %392 = vector.broadcast %cst_153 : f32 to vector<10x8x128xf32>
    %393 = arith.select %391, %389, %392 : vector<10x8x128xi1>, vector<10x8x128xf32>
    %394 = vector.extract_strided_slice %393 {offsets = [0, 0, 0], sizes = [8, 8, 128], strides = [1, 1, 1]} : vector<10x8x128xf32> to vector<8x8x128xf32>
    %395 = vector.extract_strided_slice %386 {offsets = [0, 0], sizes = [1, 128], strides = [1, 1]} : vector<9x128xf32> to vector<1x128xf32>
    %396 = vector.shape_cast %395 : vector<1x128xf32> to vector<1x1x128xf32>
    %397 = vector.broadcast %396 : vector<1x1x128xf32> to vector<8x8x128xf32>
    %398 = arith.mulf %394, %397 : vector<8x8x128xf32>
    %399 = arith.addf %388, %398 : vector<8x8x128xf32>
    %400 = vector.extract_strided_slice %393 {offsets = [1, 0, 0], sizes = [8, 8, 128], strides = [1, 1, 1]} : vector<10x8x128xf32> to vector<8x8x128xf32>
    %401 = vector.extract_strided_slice %386 {offsets = [3, 0], sizes = [1, 128], strides = [1, 1]} : vector<9x128xf32> to vector<1x128xf32>
    %402 = vector.shape_cast %401 : vector<1x128xf32> to vector<1x1x128xf32>
    %403 = vector.broadcast %402 : vector<1x1x128xf32> to vector<8x8x128xf32>
    %404 = arith.mulf %400, %403 : vector<8x8x128xf32>
    %405 = arith.addf %399, %404 : vector<8x8x128xf32>
    %406 = vector.extract_strided_slice %393 {offsets = [2, 0, 0], sizes = [8, 8, 128], strides = [1, 1, 1]} : vector<10x8x128xf32> to vector<8x8x128xf32>
    %407 = vector.extract_strided_slice %386 {offsets = [6, 0], sizes = [1, 128], strides = [1, 1]} : vector<9x128xf32> to vector<1x128xf32>
    %408 = vector.shape_cast %407 : vector<1x128xf32> to vector<1x1x128xf32>
    %409 = vector.broadcast %408 : vector<1x1x128xf32> to vector<8x8x128xf32>
    %410 = arith.mulf %406, %409 : vector<8x8x128xf32>
    %411 = arith.addf %405, %410 : vector<8x8x128xf32>
    %412 = vector.extract_strided_slice %387 {offsets = [0, 0, 0], sizes = [8, 8, 128], strides = [1, 1, 1]} : vector<10x8x128xf32> to vector<8x8x128xf32>
    %413 = vector.extract_strided_slice %386 {offsets = [1, 0], sizes = [1, 128], strides = [1, 1]} : vector<9x128xf32> to vector<1x128xf32>
    %414 = vector.shape_cast %413 : vector<1x128xf32> to vector<1x1x128xf32>
    %415 = vector.broadcast %414 : vector<1x1x128xf32> to vector<8x8x128xf32>
    %416 = arith.mulf %412, %415 : vector<8x8x128xf32>
    %417 = arith.addf %411, %416 : vector<8x8x128xf32>
    %418 = vector.extract_strided_slice %387 {offsets = [1, 0, 0], sizes = [8, 8, 128], strides = [1, 1, 1]} : vector<10x8x128xf32> to vector<8x8x128xf32>
    %419 = vector.extract_strided_slice %386 {offsets = [4, 0], sizes = [1, 128], strides = [1, 1]} : vector<9x128xf32> to vector<1x128xf32>
    %420 = vector.shape_cast %419 : vector<1x128xf32> to vector<1x1x128xf32>
    %421 = vector.broadcast %420 : vector<1x1x128xf32> to vector<8x8x128xf32>
    %422 = arith.mulf %418, %421 : vector<8x8x128xf32>
    %423 = arith.addf %417, %422 : vector<8x8x128xf32>
    %424 = vector.extract_strided_slice %387 {offsets = [2, 0, 0], sizes = [8, 8, 128], strides = [1, 1, 1]} : vector<10x8x128xf32> to vector<8x8x128xf32>
    %425 = vector.extract_strided_slice %386 {offsets = [7, 0], sizes = [1, 128], strides = [1, 1]} : vector<9x128xf32> to vector<1x128xf32>
    %426 = vector.shape_cast %425 : vector<1x128xf32> to vector<1x1x128xf32>
    %427 = vector.broadcast %426 : vector<1x1x128xf32> to vector<8x8x128xf32>
    %428 = arith.mulf %424, %427 : vector<8x8x128xf32>
    %429 = arith.addf %423, %428 : vector<8x8x128xf32>
    %c7_i32_154 = arith.constant 7 : i32
    %430 = tpu.dynamic_rotate %387 by %c7_i32_154 dim 1 : vector<10x8x128xf32>, i32 -> vector<10x8x128xf32>
    %cst_155 = arith.constant 0.000000e+00 : f32
    %431 = vector.shape_cast %6 : vector<1x8x128xi1> to vector<1x8x128xi1>
    %432 = vector.broadcast %431 : vector<1x8x128xi1> to vector<10x8x128xi1>
    %433 = vector.broadcast %cst_155 : f32 to vector<10x8x128xf32>
    %434 = arith.select %432, %430, %433 : vector<10x8x128xi1>, vector<10x8x128xf32>
    %435 = vector.extract_strided_slice %434 {offsets = [0, 0, 0], sizes = [8, 8, 128], strides = [1, 1, 1]} : vector<10x8x128xf32> to vector<8x8x128xf32>
    %436 = vector.extract_strided_slice %386 {offsets = [2, 0], sizes = [1, 128], strides = [1, 1]} : vector<9x128xf32> to vector<1x128xf32>
    %437 = vector.shape_cast %436 : vector<1x128xf32> to vector<1x1x128xf32>
    %438 = vector.broadcast %437 : vector<1x1x128xf32> to vector<8x8x128xf32>
    %439 = arith.mulf %435, %438 : vector<8x8x128xf32>
    %440 = arith.addf %429, %439 : vector<8x8x128xf32>
    %441 = vector.extract_strided_slice %434 {offsets = [1, 0, 0], sizes = [8, 8, 128], strides = [1, 1, 1]} : vector<10x8x128xf32> to vector<8x8x128xf32>
    %442 = vector.extract_strided_slice %386 {offsets = [5, 0], sizes = [1, 128], strides = [1, 1]} : vector<9x128xf32> to vector<1x128xf32>
    %443 = vector.shape_cast %442 : vector<1x128xf32> to vector<1x1x128xf32>
    %444 = vector.broadcast %443 : vector<1x1x128xf32> to vector<8x8x128xf32>
    %445 = arith.mulf %441, %444 : vector<8x8x128xf32>
    %446 = arith.addf %440, %445 : vector<8x8x128xf32>
    %447 = vector.extract_strided_slice %434 {offsets = [2, 0, 0], sizes = [8, 8, 128], strides = [1, 1, 1]} : vector<10x8x128xf32> to vector<8x8x128xf32>
    %448 = vector.extract_strided_slice %386 {offsets = [8, 0], sizes = [1, 128], strides = [1, 1]} : vector<9x128xf32> to vector<1x128xf32>
    %449 = vector.shape_cast %448 : vector<1x128xf32> to vector<1x1x128xf32>
    %450 = vector.broadcast %449 : vector<1x1x128xf32> to vector<8x8x128xf32>
    %451 = arith.mulf %447, %450 : vector<8x8x128xf32>
    %452 = arith.addf %446, %451 : vector<8x8x128xf32>
    %453 = vector.shape_cast %452 : vector<8x8x128xf32> to vector<64x128xf32>
    %cst_156 = arith.constant dense<0.000000e+00> : vector<64x1xf32>
    %454 = tpu.matmul %453, %9, %cst_156 {dimension_numbers = #tpu.dot_dimension_numbers<[1], [0], [0], [1], [0, 0, 1, 1], [], []>} : vector<64x128xf32>, vector<128x1xf32>, vector<64x1xf32> -> vector<64x1xf32>
    %455 = vector.broadcast %454 : vector<64x1xf32> to vector<64x128xf32>
    %456 = arith.subf %453, %455 : vector<64x128xf32>
    %457 = arith.mulf %456, %456 : vector<64x128xf32>
    %cst_157 = arith.constant dense<0.000000e+00> : vector<64x1xf32>
    %458 = tpu.matmul %457, %9, %cst_157 {dimension_numbers = #tpu.dot_dimension_numbers<[1], [0], [0], [1], [0, 0, 1, 1], [], []>} : vector<64x128xf32>, vector<128x1xf32>, vector<64x1xf32> -> vector<64x1xf32>
    %cst_158 = arith.constant 9.99999997E-7 : f32
    %459 = vector.broadcast %cst_158 : f32 to vector<64x1xf32>
    %460 = arith.addf %458, %459 : vector<64x1xf32>
    %461 = math.rsqrt %460 : vector<64x1xf32>
    %462 = vector.broadcast %461 : vector<64x1xf32> to vector<64x128xf32>
    %463 = arith.mulf %456, %462 : vector<64x128xf32>
    %c2_159 = arith.constant 2 : index
    %c0_160 = arith.constant 0 : index
    %c0_161 = arith.constant 0 : index
    %464 = vector.load %arg8[%c2_159, %c0_160, %c0_161] : memref<3x1x128xf32, #tpu.memory_space<vmem>>, vector<1x1x128xf32>
    %465 = vector.shape_cast %464 : vector<1x1x128xf32> to vector<1x128xf32>
    %466 = vector.broadcast %465 : vector<1x128xf32> to vector<64x128xf32>
    %467 = arith.mulf %463, %466 : vector<64x128xf32>
    %c2_162 = arith.constant 2 : index
    %c0_163 = arith.constant 0 : index
    %c0_164 = arith.constant 0 : index
    %468 = vector.load %arg9[%c2_162, %c0_163, %c0_164] : memref<3x1x128xf32, #tpu.memory_space<vmem>>, vector<1x1x128xf32>
    %469 = vector.shape_cast %468 : vector<1x1x128xf32> to vector<1x128xf32>
    %470 = vector.broadcast %469 : vector<1x128xf32> to vector<64x128xf32>
    %471 = arith.addf %467, %470 : vector<64x128xf32>
    %472 = arith.truncf %471 : vector<64x128xf32> to vector<64x128xbf16>
    %c2_165 = arith.constant 2 : index
    %c0_166 = arith.constant 0 : index
    %c0_167 = arith.constant 0 : index
    %473 = vector.load %arg10[%c2_165, %c0_166, %c0_167] : memref<3x128x128xbf16, #tpu.memory_space<vmem>>, vector<1x128x128xbf16>
    %474 = vector.shape_cast %473 : vector<1x128x128xbf16> to vector<128x128xbf16>
    %cst_168 = arith.constant dense<0.000000e+00> : vector<64x128xf32>
    %475 = tpu.matmul %472, %474, %cst_168 {dimension_numbers = #tpu.dot_dimension_numbers<[1], [0], [0], [1], [0, 0, 1, 1], [], []>} : vector<64x128xbf16>, vector<128x128xbf16>, vector<64x128xf32> -> vector<64x128xf32>
    %c2_169 = arith.constant 2 : index
    %c0_170 = arith.constant 0 : index
    %c0_171 = arith.constant 0 : index
    %476 = vector.load %arg11[%c2_169, %c0_170, %c0_171] : memref<3x1x128xf32, #tpu.memory_space<vmem>>, vector<1x1x128xf32>
    %477 = vector.shape_cast %476 : vector<1x1x128xf32> to vector<1x128xf32>
    %478 = vector.broadcast %477 : vector<1x128xf32> to vector<64x128xf32>
    %479 = arith.addf %475, %478 : vector<64x128xf32>
    %cst_172 = arith.constant 5.000000e-01 : f32
    %480 = vector.broadcast %cst_172 : f32 to vector<64x128xf32>
    %481 = arith.mulf %480, %479 : vector<64x128xf32>
    %482 = arith.mulf %479, %479 : vector<64x128xf32>
    %483 = arith.mulf %482, %479 : vector<64x128xf32>
    %cst_173 = arith.constant 4.471500e-02 : f32
    %484 = vector.broadcast %cst_173 : f32 to vector<64x128xf32>
    %485 = arith.mulf %484, %483 : vector<64x128xf32>
    %486 = arith.addf %479, %485 : vector<64x128xf32>
    %cst_174 = arith.constant 0.797884583 : f32
    %487 = vector.broadcast %cst_174 : f32 to vector<64x128xf32>
    %488 = arith.mulf %487, %486 : vector<64x128xf32>
    %489 = math.tanh %488 : vector<64x128xf32>
    %cst_175 = arith.constant 1.000000e+00 : f32
    %490 = vector.broadcast %cst_175 : f32 to vector<64x128xf32>
    %491 = arith.addf %490, %489 : vector<64x128xf32>
    %492 = arith.mulf %481, %491 : vector<64x128xf32>
    %493 = arith.truncf %492 : vector<64x128xf32> to vector<64x128xbf16>
    %c2_176 = arith.constant 2 : index
    %c0_177 = arith.constant 0 : index
    %c0_178 = arith.constant 0 : index
    %494 = vector.load %arg12[%c2_176, %c0_177, %c0_178] : memref<3x128x128xbf16, #tpu.memory_space<vmem>>, vector<1x128x128xbf16>
    %495 = vector.shape_cast %494 : vector<1x128x128xbf16> to vector<128x128xbf16>
    %cst_179 = arith.constant dense<0.000000e+00> : vector<64x128xf32>
    %496 = tpu.matmul %493, %495, %cst_179 {dimension_numbers = #tpu.dot_dimension_numbers<[1], [0], [0], [1], [0, 0, 1, 1], [], []>} : vector<64x128xbf16>, vector<128x128xbf16>, vector<64x128xf32> -> vector<64x128xf32>
    %c2_180 = arith.constant 2 : index
    %c0_181 = arith.constant 0 : index
    %c0_182 = arith.constant 0 : index
    %497 = vector.load %arg13[%c2_180, %c0_181, %c0_182] : memref<3x1x128xf32, #tpu.memory_space<vmem>>, vector<1x1x128xf32>
    %498 = vector.shape_cast %497 : vector<1x1x128xf32> to vector<1x128xf32>
    %499 = vector.broadcast %498 : vector<1x128xf32> to vector<64x128xf32>
    %500 = arith.addf %496, %499 : vector<64x128xf32>
    %501 = arith.addf %337, %500 : vector<64x128xf32>
    %502 = vector.shape_cast %501 : vector<64x128xf32> to vector<1x64x128xf32>
    %c0_183 = arith.constant 0 : index
    %c0_184 = arith.constant 0 : index
    %c0_185 = arith.constant 0 : index
    %503 = vector.load %arg14[%c0_183, %c0_184, %c0_185] : memref<1x64x128xf32, #tpu.memory_space<vmem>>, vector<1x64x128xf32>
    tpu.vector_store %arg14[%c0_183, %c0_184, %c0_185], %502 {strides = array<i32>} : memref<1x64x128xf32, #tpu.memory_space<vmem>>, vector<1x64x128xf32>,
    return
  }
  func.func @transform_0(%arg0: i32) -> (i32, i32, i32, i32) {
    %c0_i32 = arith.constant 0 : i32
    %c0_i32_0 = arith.constant 0 : i32
    %c0_i32_1 = arith.constant 0 : i32
    %c0_i32_2 = arith.constant 0 : i32
    return %arg0, %c0_i32, %c0_i32_0, %c0_i32_1 : i32, i32, i32, i32
  }
  func.func @transform_1(%arg0: i32) -> (i32, i32, i32) {
    %c0_i32 = arith.constant 0 : i32
    %c0_i32_0 = arith.constant 0 : i32
    %c0_i32_1 = arith.constant 0 : i32
    %c0_i32_2 = arith.constant 0 : i32
    return %c0_i32, %c0_i32_0, %c0_i32_1 : i32, i32, i32
  }
  func.func @transform_2(%arg0: i32) -> (i32, i32, i32) {
    %c0_i32 = arith.constant 0 : i32
    %c0_i32_0 = arith.constant 0 : i32
    %c0_i32_1 = arith.constant 0 : i32
    %c0_i32_2 = arith.constant 0 : i32
    return %c0_i32, %c0_i32_0, %c0_i32_1 : i32, i32, i32
  }
  func.func @transform_3(%arg0: i32) -> (i32, i32, i32) {
    %c0_i32 = arith.constant 0 : i32
    %c0_i32_0 = arith.constant 0 : i32
    %c0_i32_1 = arith.constant 0 : i32
    %c0_i32_2 = arith.constant 0 : i32
    return %c0_i32, %c0_i32_0, %c0_i32_1 : i32, i32, i32
  }
  func.func @transform_4(%arg0: i32) -> (i32, i32, i32) {
    %c0_i32 = arith.constant 0 : i32
    %c0_i32_0 = arith.constant 0 : i32
    %c0_i32_1 = arith.constant 0 : i32
    %c0_i32_2 = arith.constant 0 : i32
    return %c0_i32, %c0_i32_0, %c0_i32_1 : i32, i32, i32
  }
  func.func @transform_5(%arg0: i32) -> (i32, i32, i32) {
    %c0_i32 = arith.constant 0 : i32
    %c0_i32_0 = arith.constant 0 : i32
    %c0_i32_1 = arith.constant 0 : i32
    %c0_i32_2 = arith.constant 0 : i32
    return %c0_i32, %c0_i32_0, %c0_i32_1 : i32, i32, i32
  }
  func.func @transform_6(%arg0: i32) -> (i32, i32, i32) {
    %c0_i32 = arith.constant 0 : i32
    %c0_i32_0 = arith.constant 0 : i32
    %c0_i32_1 = arith.constant 0 : i32
    %c0_i32_2 = arith.constant 0 : i32
    return %c0_i32, %c0_i32_0, %c0_i32_1 : i32, i32, i32
  }
  func.func @transform_7(%arg0: i32) -> (i32, i32, i32) {
    %c0_i32 = arith.constant 0 : i32
    %c0_i32_0 = arith.constant 0 : i32
    %c0_i32_1 = arith.constant 0 : i32
    %c0_i32_2 = arith.constant 0 : i32
    return %c0_i32, %c0_i32_0, %c0_i32_1 : i32, i32, i32
  }
  func.func @transform_8(%arg0: i32) -> (i32, i32, i32) {
    %c0_i32 = arith.constant 0 : i32
    %c0_i32_0 = arith.constant 0 : i32
    %c0_i32_1 = arith.constant 0 : i32
    %c0_i32_2 = arith.constant 0 : i32
    return %c0_i32, %c0_i32_0, %c0_i32_1 : i32, i32, i32
  }
  func.func @transform_9(%arg0: i32) -> (i32, i32, i32) {
    %c0_i32 = arith.constant 0 : i32
    %c0_i32_0 = arith.constant 0 : i32
    %c0_i32_1 = arith.constant 0 : i32
    %c0_i32_2 = arith.constant 0 : i32
    return %c0_i32, %c0_i32_0, %c0_i32_1 : i32, i32, i32
  }
  func.func @transform_10(%arg0: i32) -> (i32, i32, i32) {
    %c0_i32 = arith.constant 0 : i32
    %c0_i32_0 = arith.constant 0 : i32
    %c0_i32_1 = arith.constant 0 : i32
    %c0_i32_2 = arith.constant 0 : i32
    return %c0_i32, %c0_i32_0, %c0_i32_1 : i32, i32, i32
  }
  func.func @transform_11(%arg0: i32) -> (i32, i32, i32) {
    %c0_i32 = arith.constant 0 : i32
    %c0_i32_0 = arith.constant 0 : i32
    %c0_i32_1 = arith.constant 0 : i32
    %c0_i32_2 = arith.constant 0 : i32
    return %c0_i32, %c0_i32_0, %c0_i32_1 : i32, i32, i32
  }
  func.func @transform_12(%arg0: i32) -> (i32, i32, i32) {
    %c0_i32 = arith.constant 0 : i32
    %c0_i32_0 = arith.constant 0 : i32
    %c0_i32_1 = arith.constant 0 : i32
    %c0_i32_2 = arith.constant 0 : i32
    return %c0_i32, %c0_i32_0, %c0_i32_1 : i32, i32, i32
  }
  func.func @transform_13(%arg0: i32) -> (i32, i32, i32) {
    %c0_i32 = arith.constant 0 : i32
    %c0_i32_0 = arith.constant 0 : i32
    %c0_i32_1 = arith.constant 0 : i32
    return %arg0, %c0_i32, %c0_i32_0 : i32, i32, i32
  }
}

</mosaic_0001>

<bundles_post_ra>
// kernel: middle_network_packed.1
= control target key start
LH: loop header
LB: loop body
LE: loop exit
PB: predicated region body
PF: predicated region fallthrough
CT: control target
= control target key end

     0   :  { %s7432_s0 = inlined_call_operand.hbm [shape: f32[2,8,8,128], index: 0, kind: input, shape index: {}]   ;;  %s7433_s1 = inlined_call_operand.hbm [shape: bf16[3,256,128], index: 1, kind: input, shape index: {}]   ;;  %s7434_s2 = inlined_call_operand.vmem [shape: f32[3,1,128], index: 2, kind: input, shape index: {}]   ;;  %s7435_s3 = inlined_call_operand.vmem [shape: f32[3,9,128], index: 3, kind: input, shape index: {}]   ;;  %s7436_s4 = inlined_call_operand.vmem [shape: f32[3,1,128], index: 4, kind: input, shape index: {}]   ;;  %s7437_s5 = inlined_call_operand.vmem [shape: f32[3,1,128], index: 5, kind: input, shape index: {}]   ;;  %s7438_s6 = inlined_call_operand.vmem [shape: f32[3,1,128], index: 6, kind: input, shape index: {}]   ;;  %s7439_s7 = inlined_call_operand.vmem [shape: f32[3,1,128], index: 7, kind: input, shape index: {}]   ;;  %s7440_s8 = inlined_call_operand.vmem [shape: f32[3,1,128], index: 8, kind: input, shape index: {}]   ;;  %s7441_s9 = inlined_call_operand.hbm [shape: bf16[3,128,128], index: 9, kind: input, shape index: {}]   ;;  %s7442_s10 = inlined_call_operand.vmem [shape: f32[3,1,128], index: 10, kind: input, shape index: {}]   ;;  %s7443_s11 = inlined_call_operand.hbm [shape: bf16[3,128,128], index: 11, kind: input, shape index: {}]   ;;  %s7444_s12 = inlined_call_operand.vmem [shape: f32[3,1,128], index: 12, kind: input, shape index: {}]   ;;  %s7445_s13 = inlined_call_operand.hbm [shape: f32[2,64,128], index: 13, kind: output, shape index: {}]  }
   0x1   :  { %7453 = sst [smem:[#allocation19_spill]] %s7433_s1 }
   0x2   :  { %7454 = sst [smem:[#allocation20_spill]] %s7441_s9 }
   0x3   :  { %7455 = sst [smem:[#allocation21_spill]] %s7443_s11 }
   0x4   :  { %18 = vsyncpa [#allocation3], 0 }
   0x5   :  { %20 = vsyncpa [#allocation3 + $0x1], 0 }
   0x6   :  { %21 = vsyncpa [#allocation6], 0 }
   0x7   :  { %22 = vsyncpa [#allocation9], 0 }
   0x8   :  { %23 = vsyncpa [#allocation4], 0 }
   0x9   :  { %25 = vsyncpa [#allocation4 + $0x1], 0  ;;  %s5831_s25 = smov 0   ;;  %s5833_s26 = smov 0  }
   0xa   :  { %s5835_s27 = smov 0   ;;  %s5837_s28 = smov 0  }
   0xb LB: > { %7456 = sst [smem:[#allocation15_spill]] %s5731_s25  ;;  %s5852_s29 = sadd.s32 4294967295, %s5743_s28   ;;  %s5743_s28 = sphi %s5837_s28, %s7486_s28   ;;  %s5739_s27 = sphi %s5835_s27, %s7482_s27   ;;  %s5735_s26 = sphi %s5833_s26, %s7485_s26   ;;  %s5731_s25 = sphi %s5831_s25, %s7484_s25  }
   0xc   : > { %7457 = sst [smem:[#allocation16_spill]] %s5739_s27  ;;  %s4333_s30 = sadd.s32 4294967294, %s5743_s28  }
   0xd   : > { %p51_p0 = scmp.ne.s32.totalorder %s5735_s26, %s5731_s25  ;;  %p7447_p1 = scmp.eq.s32.totalorder %s5852_s29, 0 }
   0xe   : > { %p333_p3 = scmp.eq.s32.totalorder %s4333_s30, 1  ;;  %p4334_p5 = scmp.ge.s32.totalorder %s5743_s28, 1 }
   0xf   : > { %p5861_p4 = por %p7447_p1, %p51_p0  ;;  %p340_p7 = scmp.lt.s32.totalorder %s5743_s28, 3 }
  0x10   : > { %p5866_p6 = por %p333_p3, %p51_p0  ;;  %s5745_s17 = smov [#allocation5]  }
  0x11   : > { %s7458_s14 = scalar_select %p5861_p4, 1, 0 }
  0x12   : > { %s7459_s15 = scalar_select %p5866_p6, 1, 0 }
  0x13   : > { %p5871_p8 = pnand %p4334_p5, %p340_p7  ;;  %s352_s18 = sshll.u32 %s5745_s17, 4  ;;  %s353_s18 = int_to_ptr.vmem [resolvable:$true] %s352_s18 }
  0x14   : > { %7460 = sst [smem:[#allocation17_spill]] %s7459_s15  ;;  %s5746_s20 = smov [#allocation7]  }
  0x15   : > { %s7461_s16 = scalar_select %p5871_p8, 1, 0 }
  0x16   : > { %p5279_p9 = pneg %p5871_p8  ;;  %s386_s21 = sshll.u32 %s5746_s20, 4  ;;  %s387_s21 = int_to_ptr.vmem [resolvable:$true] %s386_s21 }
  0x17   : > { %s5747_s22 = smov [#allocation8]   ;;  %s5576_s24 = scalar_lea.vmem %s353_s18, 6144 }
  0x18   : > { %p5880_p11 = pnand %p5279_p9, %p7447_p1  ;;  %s402_s23 = sshll.u32 %s5747_s22, 4  ;;  %s403_s23 = int_to_ptr.vmem [resolvable:$true] %s402_s23 }
  0x19   : > { %p5577_p13 = scmp.ne.s32.totalorder %s353_s18, %s5576_s24  ;;  %p5584_p5 = scmp.lt.s32.totalorder %s353_s18, %s353_s18 }
  0x1a   : > { %p5567_p12 = pneg %p5880_p11  ;;  %p5585_p7 = scmp.lt.s32.totalorder %s5576_s24, %s5576_s24 }
  0x1c   : > { %p5579_p0 = pnand %p5577_p13, %p5567_p12  ;;  %p5586_p9 = por %p5585_p7, %p5584_p5 }
  0x1e   : > { %p5580_p3 = pneg %p5579_p0 }
  0x20   : > { %p5587_p10 = pnand %p5586_p9, %p5580_p3 }
  0x22   : > { %5590 = shalt.err (!%p5587_p10)
}
  0x23   : > { %s5748_s30 = smov 64   ;;  %s5749_s17 = smov 4  }
  0x24   : > { %s7463_s1 = sld [smem:[#allocation19_spill]]  ;;  %s5602_s15 = scalar_lea.vmem %s387_s21, 3072 }
  0x25   : > { %p5603_p1 = scmp.ne.s32.totalorder %s387_s21, %s5602_s15  ;;  %p5610_p2 = scmp.lt.s32.totalorder %s387_s21, %s387_s21 }
  0x26   : > { %p5611_p6 = scmp.lt.s32.totalorder %s5602_s15, %s5602_s15 }
  0x27   : > { %p5605_p13 = pnand %p5603_p1, %p5567_p12 }
  0x28   : > { %p5612_p5 = por %p5611_p6, %p5610_p2 }
  0x29   : > { %p5606_p0 = pneg %p5605_p13 }
  0x2a   : > { %5282 = dma.hbm_to_vmem [thread:$0]  (!%p5880_p11), %s7463_s1, 6144, %s353_s18, [#allocation6], %s5748_s30, %s5748_s30, %s5749_s17  }
  0x2b   : > { %p5613_p3 = pnand %p5612_p5, %p5606_p0 }
  0x2d   : > { %5616 = shalt.err (!%p5613_p3)
}
  0x2e   : > { %s7464_s9 = sld [smem:[#allocation20_spill]]  ;;  %s5628_s18 = scalar_lea.vmem %s403_s23, 3072 }
  0x2f   : > { %p5629_p10 = scmp.ne.s32.totalorder %s403_s23, %s5628_s18  ;;  %p5636_p9 = scmp.lt.s32.totalorder %s403_s23, %s403_s23 }
  0x30   : > { %p5637_p13 = scmp.lt.s32.totalorder %s5628_s18, %s5628_s18 }
  0x31   : > { %p5631_p7 = pnand %p5629_p10, %p5567_p12 }
  0x32   : > { %p5638_p4 = por %p5637_p13, %p5636_p9 }
  0x33   : > { %p5632_p1 = pneg %p5631_p7 }
  0x34   : > { %5285 = dma.hbm_to_vmem [thread:$0]  (!%p5880_p11), %s7464_s9, 3072, %s387_s21, [#allocation6], %s5748_s30, %s5748_s30, %s5749_s17  }
  0x35   : > { %p5639_p2 = pnand %p5638_p4, %p5632_p1 }
  0x37   : > { %5642 = shalt.err (!%p5639_p2)
}
  0x38   : > { %s7465_s11 = sld [smem:[#allocation21_spill]]  ;;  %s5911_s25 = sadd.s32 1, %s5743_s28  }
  0x39   : > { %s35_s21 = ssub.s32 %s5743_s28, %s5911_s25  ;;  %s38_s19 = sadd.s32 1, %s5739_s27 }
  0x3a   : > { %p36_p4 = scmp.eq.s32.totalorder %s35_s21, 0  ;;  %p45_p6 = scmp.ne.s32.totalorder %s5739_s27, %s5735_s26 }
  0x3b   : > { %p46_p12 = scmp.eq.s32.totalorder %s5743_s28, 0  ;;  %p5300_p0 = scmp.lt.s32.totalorder %s5743_s28, 2 }
  0x3c   : > { %s5921_s22 = scalar_select %p36_p4, %s5739_s27, %s38_s19  }
  0x3d   : > { %p47_p5 = por %p46_p12, %p45_p6  ;;  %p7467_p3 = scmp.eq.s32.totalorder %s5852_s29, 1 }
  0x3e   : > { %5288 = dma.hbm_to_vmem [thread:$0]  (!%p5880_p11), %s7465_s11, 3072, %s403_s23, [#allocation9], %s5748_s30, %s5748_s30, %s5749_s17  }
  0x3f   : > { %7466 = sst [smem:[#allocation18_spill]] %s5921_s22  ;;  %p5925_p10 = por %p7467_p3, %p45_p6 }
  0x40   : > { %s419_s18 = sand.u32 1, %s5739_s27   ;;  %s4487_s15 = sshll.u32 %s5743_s28, 10 }
  0x41   : > { %s7468_s24 = scalar_select %p5925_p10, 1, 0 }
  0x42   : > { %s4339_s23 = sshll.u32 %s419_s18, 6  ;;  %s5934_s20 = scalar_lea.hbm %s7432_s0, %s4487_s15 }
  0x43   : > { %s423_s21 = scalar_lea.vmem [#allocation2], %s4339_s23  ;;  %p5936_p11 = pnand %p5300_p0, %p47_p5 }
  0x44   : > { %s430_s19 = sshll.u32 %s423_s21, 4  ;;  %s5942_s9 = scalar_lea.sflag [#allocation3], %s419_s18  ;;  %s5940_s19 = int_to_ptr.vmem [resolvable:$true] %s430_s19 }
  0x45   : > { %s5643_s11 = scalar_lea.hbm %s5934_s20, 1024  ;;  %p5645_p1 = pneg %p5936_p11 }
  0x46   : > { %p5644_p7 = scmp.ne.s32.totalorder %s5934_s20, %s5643_s11  ;;  %s5648_s23 = scalar_lea.hbm %s7432_s0, 2048 }
  0x47   : > { %p5649_p2 = scmp.lt.s32.totalorder %s5934_s20, %s7432_s0  ;;  %p5650_p4 = scmp.lt.s32.totalorder %s5648_s23, %s5643_s11 }
  0x48   : > { %p5646_p9 = pnand %p5645_p1, %p5644_p7 }
  0x49   : > { %p5651_p6 = por %p5650_p4, %p5649_p2 }
  0x4a   : > { %p5647_p13 = pneg %p5646_p9 }
  0x4c   : > { %p5652_p12 = pnand %p5651_p6, %p5647_p13 }
  0x4e   : > { %5655 = shalt.err (!%p5652_p12)
}
  0x4f   : > { %s5656_s18 = scalar_lea.vmem %s5940_s19, 1024  ;;  %s5750_s22 = smov [#allocation2]  }
  0x50   : > { %p5657_p0 = scmp.ne.s32.totalorder %s5940_s19, %s5656_s18  ;;  %s5661_s27 = sshll.u32 %s5750_s22, 4  ;;  %s5662_s27 = int_to_ptr.vmem [resolvable:$false] %s5661_s27 }
  0x51   : > { %s5663_s15 = scalar_lea.vmem %s5662_s27, 2048  ;;  %p5664_p7 = scmp.lt.s32.totalorder %s5940_s19, %s5662_s27 }
  0x52   : > { %p5659_p5 = pnand %p5657_p0, %p5645_p1  ;;  %p5665_p9 = scmp.lt.s32.totalorder %s5663_s15, %s5656_s18 }
  0x54   : > { %p5660_p3 = pneg %p5659_p5  ;;  %p5666_p10 = por %p5665_p9, %p5664_p7 }
  0x56   : > { %p5667_p8 = pnand %p5666_p10, %p5660_p3 }
  0x58   : > { %5670 = shalt.err (!%p5667_p8)
}
  0x59   : > { %s5751_s11 = smov 128   ;;  %s5752_s30 = smov 8  }
  0x5a   : > { %5292 = dma.hbm_to_vmem [thread:$0]  (!%p5936_p11), %s5934_s20, 1024, %s5940_s19, %s5942_s9, %s5751_s11, %s5751_s11, %s5752_s30  }
  0x5b   : > { %p7470_p1 = scmp.ne.s32.totalorder %s7461_s16, 0 }
  0x5c   : > { %s5966_s22 = sand.u32 (!%p7470_p1), 1, %s5735_s26   ;;  %p7471_p8 = scmp.ne.s32.totalorder (!%p7470_p1), %s7458_s14, 0 }
  0x5d   : > { %442 = sbr.rel (%p7470_p1) target bundleno = 5399 (0x1517), region = 72  ;;  %s4343_s27 = sshll.u32 (!%p7470_p1), %s5966_s22, 6 }
  0x5e   : > { %s445_s23 = scalar_lea.sflag (!%p7470_p1), [#allocation3], %s5966_s22  ;;  %s5972_s17 = scalar_lea.vmem (!%p7470_p1), [#allocation2], %s4343_s27 }
  0x62   : > { %5714 = dma.done.wait (%p7471_p8), %s445_s23, 1024  }
  0x63   : > { %5716 = vsyncadd (%p7471_p8), %s445_s23, 4294966272  ;;  %p7472_p10 = scmp.eq.s32.totalorder %s5852_s29, 0 }
  0x65   : > { %5718 = dma.done.wait (%p7472_p10), [#allocation6], 9216   ;;  %p7473_p11 = pmov %p7472_p10 }
  0x66   : > { %p7474_p13 = pmov %p7472_p10 }
  0x67   : > { %5720 = vsyncadd (%p7473_p11), [#allocation6], 4294958080 }
  0x68   : > { %5722 = dma.done.wait (%p7474_p13), [#allocation9], 3072   ;;  %p7475_p2 = pmov %p7472_p10 }
  0x69   : > { %v5753_v0 = vmov 0.0   ;;  %vm5754_vm0 = vmmov 0   ;;  %v5990_v1 = vld [vmem:[%s5972_s17 + $0x38] sm:$0xff]  ;;  %v5993_v2 = vld [vmem:[%s5972_s17 + $0x30] sm:$0xff]  ;;  %v5998_v3 = vld [vmem:[%s5972_s17 + $0x28] sm:$0xff]  ;;  %vm516_vm1 = vcmask 523264  }
  0x6a   : > { %5724 = vsyncadd (%p7475_p2), [#allocation9], 4294964224  ;;  %4798 = vmatprep.subr.mxu0 %v5753_v0  ;;  %4814 = vmatprep.mubr.msk.f32.mxu0 %vm5754_vm0, %v5753_v0  ;;  %v6001_v4 = vld [vmem:[%s5972_s17 + $0x20] sm:$0xff]  ;;  %v5353_v5 = vld [vmem:[#allocation5 + $0x78] sm:$0xff]   ;;  %v5755_v18 = vmov 0.015625   ;;  %vm786_vm2 = vcmask 1040384  }
  0x6b   : > { %4799 = vmatpush3.msra.mxu0 %v5990_v1  ;;  %v6006_v6 = vld [vmem:[%s5972_s17 + $0x18] sm:$0xff]  ;;  %4498 = vmatprep.subr.bf16.mxu1 %v5353_v5  ;;  %v5355_v8 = vld [vmem:[#allocation5 + $0x70] sm:$0xff]   ;;  %v5357_v10 = vld [vmem:[#allocation5 + $0x68] sm:$0xff]   ;;  %v5756_v63 = vmov 0.0078125   ;;  %v5757_v5 = vmov 0   ;;  %s502_s15 = scalar_lea.vmem [#allocation10], %s4343_s27 }
  0x6c   : > { %4800 = vmatprep.subr.mxu0 %v5753_v0  ;;  %v5354_v7 = vld [vmem:[#allocation5 + $0x38] sm:$0xff]   ;;  %v5356_v9 = vld [vmem:[#allocation5 + $0x30] sm:$0xff]   ;;  %v6017_v12 = vld [vmem:[%s5972_s17 + $0x8] sm:$0xff]  ;;  %v593_v28 = vmax.f32 %v6006_v6, %v5990_v1  ;;  %5352 = vset.pattern.permute.xlu1 %v5757_v5  ;;  %s4231_s27 = sshll.u32 %s502_s15, 4  ;;  %s4488_s11 = sshll.u32 %s5852_s29, 10  ;;  %s7382_s27 = int_to_ptr.vmem [resolvable:$true] %s4231_s27 }
  0x6d   : > { %4801 = vmatpush3.msra.mxu0 %v5993_v2  ;;  %4499 = vmatpush3.bf16.msra.mxu1 %v5354_v7  ;;  %v6013_v11 = vld [vmem:[%s5972_s17 + $0x10] sm:$0xff]  ;;  %v5358_v13 = vld [vmem:[#allocation5 + $0x28] sm:$0xff]   ;;  %v5359_v14 = vld [vmem:[#allocation5 + $0x60] sm:$0xff]   ;;  %v591_v26 = vmax.f32 %v6017_v12, %v5998_v3  ;;  %s7388_s1 = scalar_lea.hbm %s7445_s13, %s4488_s11  ;;  %s4218_s29 = scalar_lea.sflag [#allocation4], %s5966_s22 }
  0x6e   : > { %4802 = vmatprep.subr.mxu0 %v5753_v0  ;;  %4500 = vmatprep.subr.bf16.mxu1 %v5355_v8  ;;  %v6023_v15 = vld [vmem:[%s5972_s17] sm:$0xff]  ;;  %v5361_v17 = vld [vmem:[#allocation5 + $0x58] sm:$0xff]   ;;  %v5363_v20 = vld [vmem:[#allocation5 + $0x50] sm:$0xff]   ;;  %v592_v27 = vmax.f32 %v6013_v11, %v5993_v2  ;;  %s5671_s9 = scalar_lea.vmem %s7382_s27, 1024  ;;  %p7476_p6 = scmp.ne.s32.totalorder %s7468_s24, 0 }
  0x6f   : > { %4803 = vmatpush3.msra.mxu0 %v5998_v3  ;;  %v5360_v16 = vld [vmem:[#allocation5 + $0x20] sm:$0xff]   ;;  %v5362_v19 = vld [vmem:[#allocation5 + $0x18] sm:$0xff]   ;;  %v5364_v21 = vld [vmem:[#allocation5 + $0x10] sm:$0xff]   ;;  %v590_v25 = vmax.f32 %v6023_v15, %v6001_v4  ;;  %5351 = vset.pattern.permute.xlu0 %v5757_v5  ;;  %p5672_p4 = scmp.ne.s32.totalorder %s7382_s27, %s5671_s9  ;;  %s5758_s14 = smov [#allocation10]  }
  0x70   : > { %4804 = vmatprep.subr.mxu0 %v5753_v0  ;;  %v5365_v22 = vld [vmem:[#allocation5 + $0x48] sm:$0xff]   ;;  %v5367_v24 = vld [vmem:[#allocation5 + $0x40] sm:$0xff]   ;;  %v595_v30 = vmax.f32 %v592_v27, %v593_v28  ;;  %v956_v28 = vrot.slane %v6023_v15, 1  ;;  %s5675_s16 = sshll.u32 %s5758_s14, 4  ;;  %s5676_s16 = int_to_ptr.vmem [resolvable:$false] %s5675_s16 }
  0x71   : > { %4805 = vmatpush3.msra.mxu0 %v6001_v4  ;;  %4501 = vmatpush3.bf16.msra.mxu1 %v5356_v9  ;;  %v5366_v23 = vld [vmem:[#allocation5 + $0x8] sm:$0xff]   ;;  %v594_v29 = vmax.f32 %v590_v25, %v591_v26  ;;  %v5368_v37 = vld [vmem:[#allocation5] sm:$0xff]   ;;  %p5673_p12 = pnand %p5672_p4, %p7476_p6  ;;  %s5677_s20 = scalar_lea.vmem %s5676_s16, 2048 }
  0x72   : > { %4806 = vmatprep.subr.mxu0 %v5753_v0  ;;  %4502 = vmatprep.subr.bf16.mxu1 %v5357_v10  ;;  %v637_v44 = vld [vmem:[%s7434_s2] sm:$0x1]  ;;  %v512_v10 = vlaneseq  ;;  %p5678_p5 = scmp.lt.s32.totalorder %s7382_s27, %s5676_s16  ;;  %p5679_p3 = scmp.lt.s32.totalorder %s5677_s20, %s5671_s9 }
  0x73   : > { %4807 = vmatpush3.msra.mxu0 %v6006_v6  ;;  %v596_v31 = vmax.f32 %v594_v29, %v595_v30  ;;  %v784_v59 = vld [vmem:[%s7436_s4] sm:$0x1]  ;;  %v957_v29 = vrot.slane %v6017_v12, 1  ;;  %v819_v30 = vrot.slane %v6013_v11, 7  ;;  %p5674_p0 = pneg %p5673_p12 }
  0x74   : > { %4808 = vmatprep.subr.mxu0 %v5753_v0  ;;  %v798_v27 = vld [vmem:[%s7435_s3] sm:$0xff]  ;;  %p5680_p7 = por %p5679_p3, %p5678_p5 }
  0x75   : > { %4809 = vmatpush3.msra.mxu0 %v6013_v11  ;;  %4503 = vmatpush3.bf16.msra.mxu1 %v5358_v13  ;;  %v597_v32 = vrot.slane %v596_v31, 4  ;;  %v6115_v13 = vshrl.u32 %v512_v10, 7 }
  0x76   : > { %4810 = vmatprep.subr.mxu0 %v5753_v0  ;;  %4504 = vmatprep.subr.bf16.mxu1 %v5359_v14  ;;  %p5681_p9 = pnand %p5680_p7, %p5674_p0 }
  0x77   : > { %4811 = vmatpush3.msra.mxu0 %v6017_v12  ;;  %v598_v33 = vmax.f32 %v596_v31, %v597_v32  ;;  %vm514_vm3 = vcmp.ge.s32.totalorder %v6115_v13, 1  ;;  %v6132_v25 = vsub.s32 6, %v6115_v13  ;;  %v6135_v26 = vsub.s32 1, %v6115_v13  ;;  %v799_v31 = vld [vmem:[%s7435_s3 + $0x8] sm:$0x1] }
  0x78   : > { %4812 = vmatprep.subr.mxu0 %v5753_v0  ;;  %vm515_vm4 = vcmp.lt.s32.totalorder %v6115_v13, 7 }
  0x79   : > { %4813 = vmatpush3.msra.mxu0 %v6023_v15  ;;  %4505 = vmatpush3.bf16.msra.mxu1 %v5360_v16  ;;  %v599_v34 = vrot.slane %v598_v33, 2 }
  0x7a   : > { %4815 = vmatmul.mubr.msk.f32.vlgmr.msra.gmra.mxu0 %vm516_vm1, %v5755_v18  ;;  %4506 = vmatprep.subr.bf16.mxu1 %v5361_v17  ;;  %v795_v17 = vld [vmem:[%s7437_s5] sm:$0x1] }
  0x7b   : > { %v600_v35 = vmax.f32 %v598_v33, %v599_v34  ;;  %4817 = vmatprep.subr.mxu0 %v5756_v63  ;;  %v958_v33 = vrot.slane %v6013_v11, 1  ;;  %v820_v34 = vrot.slane %v6006_v6, 7 }
  0x7c   : > { %4818 = vmatpush3.msra.mxu0 %v5756_v63 }
  0x7d   : > { %4507 = vmatpush3.bf16.msra.mxu1 %v5362_v19  ;;  %v601_v36 = vrot.slane %v600_v35, 1  ;;  %4819 = vmatprep.subr.mxu0 %v5756_v63  ;;  %v6122_v19 = vsub.s32 0, %v6115_v13 }
  0x7e   : > { %4508 = vmatprep.subr.bf16.mxu1 %v5363_v20  ;;  %4820 = vmatpush3.msra.mxu0 %v5756_v63 }
  0x7f   : > { %v602_v38 = vmax.f32 %v600_v35, %v601_v36  ;;  %4821 = vmatprep.subr.mxu0 %v5756_v63  ;;  %v959_v35 = vrot.slane %v6006_v6, 1  ;;  %v4365_v36 = vld [vmem:[%s7438_s6] ss:$0 sm:$0xff] }
  0x80   : > { %4822 = vmatpush3.msra.mxu0 %v5756_v63 }
  0x81   : > { %4509 = vmatpush3.bf16.msra.mxu1 %v5364_v21  ;;  %v604_v39 = vpack.c.bf16 %v602_v38, %v602_v38  ;;  %4823 = vmatprep.subr.mxu0 %v5756_v63  ;;  %v817_v21 = vrot.slane %v6023_v15, 7  ;;  %v6157_v38 = vsub.s32 4, %v6115_v13 }
  0x82   : > { %4510 = vmatprep.subr.bf16.mxu1 %v5365_v22  ;;  %4824 = vmatpush3.msra.mxu0 %v5756_v63  ;;  %v6128_v22 = vsub.s32 3, %v6115_v13 }
  0x83   : > { %766 = vmatprep.mubr.bf16.mxu1 %v604_v39  ;;  %4825 = vmatprep.subr.mxu0 %v5756_v63  ;;  %v6160_v39 = vsub.s32 7, %v6115_v13 }
  0x84   : > { %4826 = vmatpush3.msra.mxu0 %v5756_v63 }
  0x85   : > { %4511 = vmatpush3.bf16.msra.mxu1 %v5366_v23  ;;  %4827 = vmatprep.subr.mxu0 %v5756_v63 }
  0x86   : > { %4512 = vmatprep.subr.bf16.mxu1 %v5367_v24  ;;  %4828 = vmatpush3.msra.mxu0 %v5756_v63  ;;  %v818_v24 = vrot.slane %v6017_v12, 7 }
  0x87   : > { %4829 = vmatprep.subr.mxu0 %v5756_v63 }
  0x88   : > { %4830 = vmatpush3.msra.mxu0 %v5756_v63 }
  0x89   : > { %4513 = vmatpush3.bf16.msra.mxu1 %v5368_v37  ;;  %4831 = vmatprep.subr.mxu0 %v5756_v63  ;;  %v828_v37 = vsel %vm514_vm3, %v817_v21, 0.0 }
  0x8a   : > { %4861 = vmatprep.subr.mxu1 %v5756_v63  ;;  %4832 = vmatpush3.msra.mxu0 %v5756_v63 }
  0x8b   : > { %4833 = vmatprep.subr.mxu0 %v5756_v63 }
  0x8c   : > { %4834 = vmatpush3.msra.mxu0 %v5756_v63 }
  0x8d   : > { %4835 = vmatprep.subr.mxu0 %v5756_v63 }
  0x8e   : > { %4836 = vmatpush3.msra.mxu0 %v5756_v63 }
  0x8f   : > { %4837 = vmatprep.subr.mxu0 %v5756_v63 }
  0x90   : > { %4838 = vmatpush3.msra.mxu0 %v5756_v63 }
  0x91   : > { %4839 = vmatprep.subr.mxu0 %v5756_v63 }
  0x92   : > { %4840 = vmatpush3.msra.mxu0 %v5756_v63 }
  0x93   : > { %4841 = vmatprep.subr.mxu0 %v5756_v63 }
  0x94   : > { %4842 = vmatpush3.msra.mxu0 %v5756_v63 }
  0x95   : > { %4843 = vmatprep.subr.mxu0 %v5756_v63 }
  0x96   : > { %4844 = vmatpush3.msra.mxu0 %v5756_v63 }
  0x97   : > { %4845 = vmatprep.subr.mxu0 %v5756_v63 }
  0x98   : > { %4846 = vmatpush3.msra.mxu0 %v5756_v63 }
  0x99   : > { %4847 = vmatprep.subr.mxu0 %v5756_v63 }
  0x9a   : > { %4848 = vmatpush3.msra.mxu0 %v5756_v63 }
 0x13a   : > { %v586_v40 = vpop.f32.mrf.mxu0 }
 0x13b   : > { %v603_v41 = vpack.c.bf16 %v586_v40, %v586_v40  ;;  %v821_v40 = vrot.slane %v6001_v4, 7 }
 0x13c   : > { %v4816_v42 = vpop.f32.mrf.mxu0 }
 0x13d   : > { %767 = vmatmul.mubr.bf16.vlgmr.msra.gmra.mxu1 %v603_v41  ;;  %v829_v42 = vsel %vm514_vm3, %v818_v24, 0.0 }
 0x13e   : > { %4862 = vmatpush3.msra.mxu1 %v5756_v63 }
 0x13f   : > { %4863 = vmatprep.subr.mxu1 %v5756_v63 }
 0x140   : > { %4864 = vmatpush3.msra.mxu1 %v5756_v63 }
 0x141   : > { %4865 = vmatprep.subr.mxu1 %v5756_v63 }
 0x142   : > { %4866 = vmatpush3.msra.mxu1 %v5756_v63 }
 0x143   : > { %4867 = vmatprep.subr.mxu1 %v5756_v63 }
 0x144   : > { %4868 = vmatpush3.msra.mxu1 %v5756_v63 }
 0x145   : > { %4869 = vmatprep.subr.mxu1 %v5756_v63 }
 0x146   : > { %4870 = vmatpush3.msra.mxu1 %v5756_v63 }
 0x147   : > { %4871 = vmatprep.subr.mxu1 %v5756_v63 }
 0x148   : > { %4872 = vmatpush3.msra.mxu1 %v5756_v63 }
 0x149   : > { %4873 = vmatprep.subr.mxu1 %v5756_v63 }
 0x14a   : > { %4874 = vmatpush3.msra.mxu1 %v5756_v63 }
 0x14b   : > { %4875 = vmatprep.subr.mxu1 %v5756_v63 }
 0x14c   : > { %4876 = vmatpush3.msra.mxu1 %v5756_v63 }
 0x14d   : > { %4877 = vmatprep.subr.mxu1 %v5756_v63 }
 0x14e   : > { %4878 = vmatpush3.msra.mxu1 %v5756_v63 }
 0x14f   : > { %4879 = vmatprep.subr.mxu1 %v5756_v63 }
 0x150   : > { %4880 = vmatpush3.msra.mxu1 %v5756_v63 }
 0x151   : > { %4881 = vmatprep.subr.mxu1 %v5756_v63 }
 0x152   : > { %4882 = vmatpush3.msra.mxu1 %v5756_v63 }
 0x153   : > { %4883 = vmatprep.subr.mxu1 %v5756_v63 }
 0x154   : > { %4884 = vmatpush3.msra.mxu1 %v5756_v63 }
 0x155   : > { %4885 = vmatprep.subr.mxu1 %v5756_v63 }
 0x156   : > { %4886 = vmatpush3.msra.mxu1 %v5756_v63 }
 0x157   : > { %4887 = vmatprep.subr.mxu1 %v5756_v63 }
 0x158   : > { %4888 = vmatpush3.msra.mxu1 %v5756_v63 }
 0x159   : > { %4889 = vmatprep.subr.mxu1 %v5756_v63 }
 0x15a   : > { %4890 = vmatpush3.msra.mxu1 %v5756_v63 }
 0x15b   : > { %4891 = vmatprep.subr.mxu1 %v5756_v63 }
 0x15c   : > { %4892 = vmatpush3.msra.mxu1 %v5756_v63 }
 0x1fd   : > { %v4514_v43 = vpop.f32.mrf.mxu1 }
 0x1ff   : > { %v4515_v45 = vpop.f32.mrf.mxu1 }
 0x200   : > { %v4516_v46 = vadd.f32 %v4515_v45, %v4514_v43  ;;  %v6166_v43 = vsub.s32 2, %v6115_v13 }
 0x201   : > { %v4517_v47 = vpop.f32.mrf.mxu1 }
 0x202   : > { %v769_v48 = vadd.f32 %v4516_v46, %v637_v44  ;;  %v6169_v44 = vsub.s32 5, %v6115_v13  ;;  %v967_v46 = vsel %vm515_vm4, %v956_v28, 0.0  ;;  %v6175_v47 = vsel %vm515_vm4, %v957_v29, 0.0 }
 0x203   : > { %v4518_v49 = vpop.f32.mrf.mxu1 }
 0x204   : > { %v775_v50 = vmul.f32 %v769_v48, %v769_v48  ;;  %v774_v56 = vmul.f32 0.5, %v769_v48 }
 0x206   : > { %v776_v51 = vmul.f32 %v775_v50, %v769_v48  ;;  %v6181_v50 = vsel %vm515_vm4, %v958_v33, 0.0 }
 0x208   : > { %v777_v52 = vmul.f32 0.044715, %v776_v51  ;;  %v6185_v51 = vsel %vm514_vm3, %v820_v34, 0.0 }
 0x20a   : > { %v778_v53 = vadd.f32 %v777_v52, %v769_v48  ;;  %v830_v48 = vsel %vm514_vm3, %v819_v30, 0.0  ;;  %v6189_v52 = vsel %vm515_vm4, %v959_v35, 0.0 }
 0x20c   : > { %v779_v54 = vmul.f32 0.7978846, %v778_v53  ;;  %v6193_v53 = vsel %vm514_vm3, %v821_v40, 0.0 }
 0x20e   : > { %5449 = vtanh.f32 %v779_v54  ;;  %v960_v54 = vrot.slane %v6001_v4, 1 }
 0x21b   : > { %v5450_v55 = vpop.eup %5449 }
 0x21c   : > { %v781_v57 = vadd.f32 1.0, %v5450_v55  ;;  %v822_v55 = vrot.slane %v5998_v3, 7 }
 0x21e   : > { %v6041_v58 = vmul.f32 %v781_v57, %v774_v56  ;;  %v961_v56 = vrot.slane %v5998_v3, 1 }
 0x220   : > { %v783_v60 = vand.u32 2147483647, %v6041_v58 }
 0x222   : > { %v6047_v61 = vmul.f32 %v784_v59, %v783_v60  ;;  %v823_v60 = vrot.slane %v5993_v2, 7  ;;  %v6224_v2 = vsel %vm515_vm4, %v960_v54, 0.0 }
 0x224   : > { %v787_v62 = vsel %vm786_vm2, %v6047_v61, 0.0  ;;  %v6240_v24 = vsel %vm514_vm3, %v823_v60, 0.0 }
 0x225   : > { %788 = vadd.xlane.f32.xlu0 %v787_v62 }
 0x2ae   : > { %v789_v7 = vpop.xlane.xlu0 %788 }
 0x2af   : > { %v791_v8 = vmul.f32 0.0078125, %v789_v7  ;;  %v824_v7 = vrot.slane %v5990_v1, 7  ;;  %v6232_v1 = vsel %vm515_vm4, %v961_v56, 0.0 }
 0x2b1   : > { %v792_v9 = vadd.f32 1e-06, %v791_v8  ;;  %v6254_v34 = vsel %vm514_vm3, %v824_v7, 0.0 }
 0x2b3   : > { %5451 = vrcp.f32 %v792_v9 }
 0x2c0   : > { %v5452_v14 = vpop.eup %5451 }
 0x2c1   : > { %v794_v16 = vmul.f32 %v5452_v14, %v6047_v61 }
 0x2c3   : > { %v796_v20 = vmul.f32 %v794_v16, %v6041_v58 }
 0x2c5   : > { %v797_v23 = vmul.f32 %v796_v20, %v795_v17  ;;  %v6228_v17 = vsel %vm514_vm3, %v822_v55, 0.0 }
 0x2c7   : > { %v804_v32 = vrot.slane %v797_v23, %v6122_v19 }
 0x2c9   : > { %v806_v41 = vmul.f32 %v804_v32, %v798_v27  ;;  %v807_v45 = vmul.f32 %v804_v32, %v799_v31 }
 0x2cb   : > { %v815_v49 = vadd.f32 %v4365_v36, %v806_v41  ;;  %v816_v61 = vadd.f32 %v4365_v36, %v807_v45 }
 0x2cd   : > { %v6199_v57 = vrot.slane %v815_v49, %v6122_v19  ;;  %v6202_v58 = vrot.slane %v815_v49, %v6128_v22  ;;  %v6205_v59 = vrot.slane %v815_v49, %v6132_v25  ;;  %v6209_v62 = vrot.slane %v815_v49, %v6135_v26 }
 0x2ce   : > { %v6212_v5 = vrot.slane %v815_v49, %v6157_v38  ;;  %v6220_v16 = vrot.slane %v815_v49, %v6160_v39  ;;  %v6236_v23 = vrot.slane %v815_v49, %v6166_v43  ;;  %v6243_v27 = vrot.slane %v816_v61, %v6122_v19 }
 0x2cf   : > { %v840_v8 = vmul.f32 0.0, %v6199_v57  ;;  %v841_v9 = vmul.f32 %v6199_v57, %v828_v37  ;;  %v860_v10 = vmul.f32 %v6202_v58, %v828_v37  ;;  %v861_v14 = vmul.f32 %v6202_v58, %v829_v42 }
 0x2d0   : > { %v880_v21 = vmul.f32 %v6205_v59, %v829_v42  ;;  %v6246_v28 = vrot.slane %v815_v49, %v6169_v44  ;;  %v881_v30 = vmul.f32 %v6205_v59, %v830_v48  ;;  %v900_v32 = vmul.f32 0.0, %v6209_v62 }
 0x2d1   : > { %v868_v20 = vadd.f32 %v860_v10, %v840_v8  ;;  %v869_v29 = vadd.f32 %v861_v14, %v841_v9  ;;  %v920_v33 = vmul.f32 %v6212_v5, %v6023_v15  ;;  %v940_v35 = vmul.f32 %v6220_v16, %v6017_v12 }
 0x2d2   : > { %v901_v37 = vmul.f32 %v6209_v62, %v6023_v15  ;;  %v842_v40 = vmul.f32 %v6199_v57, %v829_v42  ;;  %v979_v45 = vmul.f32 0.0, %v6236_v23  ;;  %v980_v49 = vmul.f32 %v6236_v23, %v967_v46 }
 0x2d3   : > { %v888_v31 = vadd.f32 %v880_v21, %v868_v20  ;;  %v889_v36 = vadd.f32 %v881_v30, %v869_v29  ;;  %v862_v54 = vmul.f32 %v6202_v58, %v830_v48  ;;  %v999_v55 = vmul.f32 %v6246_v28, %v967_v46 }
 0x2d4   : > { %v1019_v56 = vmul.f32 %v6243_v27, %v6175_v47  ;;  %v921_v61 = vmul.f32 %v6212_v5, %v6017_v12  ;;  %v1000_v15 = vmul.f32 %v6246_v28, %v6175_v47  ;;  %v882_v8 = vmul.f32 %v6205_v59, %v6185_v51 }
 0x2d5   : > { %v908_v41 = vadd.f32 %v900_v32, %v888_v31  ;;  %v909_v60 = vadd.f32 %v901_v37, %v889_v36  ;;  %v870_v42 = vadd.f32 %v862_v54, %v842_v40  ;;  %v941_v10 = vmul.f32 %v6220_v16, %v6013_v11 }
 0x2d6   : > { %v843_v46 = vmul.f32 %v6199_v57, %v830_v48  ;;  %v863_v14 = vmul.f32 %v6202_v58, %v6185_v51  ;;  %v1020_v21 = vmul.f32 %v6243_v27, %v6181_v50  ;;  %v902_v30 = vmul.f32 %v6209_v62, %v6017_v12 }
 0x2d7   : > { %v928_v7 = vadd.f32 %v920_v33, %v908_v41  ;;  %v929_v9 = vadd.f32 %v921_v61, %v909_v60  ;;  %v890_v29 = vadd.f32 %v882_v8, %v870_v42  ;;  %v922_v32 = vmul.f32 %v6212_v5, %v6013_v11 }
 0x2d8   : > { %v871_v33 = vadd.f32 %v863_v14, %v843_v46  ;;  %v883_v36 = vmul.f32 %v6205_v59, %v6193_v53  ;;  %v903_v40 = vmul.f32 %v6209_v62, %v6013_v11  ;;  %v844_v12 = vmul.f32 %v6199_v57, %v6185_v51 }
 0x2d9   : > { %v948_v20 = vadd.f32 %v940_v35, %v928_v7  ;;  %v949_v31 = vadd.f32 %v941_v10, %v929_v9  ;;  %v910_v37 = vadd.f32 %v902_v30, %v890_v29  ;;  %v942_v35 = vmul.f32 %v6220_v16, %v6006_v6 }
 0x2da   : > { %v891_v54 = vadd.f32 %v883_v36, %v871_v33  ;;  %v864_v60 = vmul.f32 %v6202_v58, %v6193_v53  ;;  %v923_v42 = vmul.f32 %v6212_v5, %v6006_v6  ;;  %v884_v11 = vmul.f32 %v6205_v59, %v6228_v17 }
 0x2db   : > { %v987_v48 = vadd.f32 %v979_v45, %v948_v20  ;;  %v988_v41 = vadd.f32 %v980_v49, %v949_v31  ;;  %v930_v7 = vadd.f32 %v922_v32, %v910_v37  ;;  %v981_v45 = vmul.f32 %v6236_v23, %v6175_v47 }
 0x2dc   : > { %v911_v9 = vadd.f32 %v903_v40, %v891_v54  ;;  %v872_v10 = vadd.f32 %v864_v60, %v844_v12  ;;  %v1001_v46 = vmul.f32 %v6246_v28, %v6181_v50  ;;  %v845_v30 = vmul.f32 %v6199_v57, %v6193_v53 }
 0x2dd   : > { %v1007_v61 = vadd.f32 %v999_v55, %v987_v48  ;;  %v1008_v8 = vadd.f32 %v1000_v15, %v988_v41  ;;  %v950_v51 = vadd.f32 %v942_v35, %v930_v7  ;;  %v943_v55 = vmul.f32 %v6220_v16, %v6001_v4 }
 0x2de   : > { %v931_v47 = vadd.f32 %v923_v42, %v911_v9  ;;  %v892_v20 = vadd.f32 %v884_v11, %v872_v10  ;;  %v904_v15 = vmul.f32 %v6209_v62, %v6006_v6  ;;  %v865_v31 = vmul.f32 %v6202_v58, %v6228_v17  ;;  %v6344_v10 = vld [vmem:[%s5972_s17 + $0x28] sm:$0xff] }
 0x2df   : > { %v6300_v49 = vadd.f32 %v1019_v56, %v1007_v61  ;;  %v6306_v14 = vadd.f32 %v1020_v21, %v1008_v8  ;;  %v989_v29 = vadd.f32 %v981_v45, %v950_v51  ;;  %v1021_v56 = vmul.f32 %v6243_v27, %v6189_v52 }
 0x2e0   : > { %v951_v21 = vadd.f32 %v943_v55, %v931_v47  ;;  %v982_v32 = vmul.f32 %v6236_v23, %v6181_v50  ;;  %v912_v33 = vadd.f32 %v904_v15, %v892_v20  ;;  %v924_v6 = vmul.f32 %v6212_v5, %v6001_v4 }
 0x2e1   : > { %4849 = vmatprep.mubr.f32.mxu0 %v6300_v49  ;;  %v1009_v36 = vadd.f32 %v1001_v46, %v989_v29  ;;  %v1002_v48 = vmul.f32 %v6246_v28, %v6189_v52  ;;  %v873_v37 = vadd.f32 %v865_v31, %v845_v30  ;;  %v885_v53 = vmul.f32 %v6205_v59, %v6240_v24 }
 0x2e2   : > { %4850 = vmatmul.mubr.f32.vlgmr.msra.gmra.mxu0 %v6306_v14  ;;  %v990_v35 = vadd.f32 %v982_v32, %v951_v21  ;;  %v1022_v40 = vmul.f32 %v6243_v27, %v6224_v2  ;;  %v932_v41 = vadd.f32 %v924_v6, %v912_v33  ;;  %v944_v50 = vmul.f32 %v6220_v16, %v5998_v3 }
 0x2e3   : > { %v6330_v54 = vadd.f32 %v1021_v56, %v1009_v36  ;;  %v893_v12 = vadd.f32 %v885_v53, %v873_v37  ;;  %v905_v60 = vmul.f32 %v6209_v62, %v6001_v4  ;;  %v846_v61 = vmul.f32 %v6199_v57, %v6228_v17  ;;  %v6349_v17 = vld [vmem:[%s5972_s17 + $0x30] sm:$0xff] }
 0x2e4   : > { %v1010_v7 = vadd.f32 %v1002_v48, %v990_v35  ;;  %v952_v45 = vadd.f32 %v944_v50, %v932_v41  ;;  %v983_v42 = vmul.f32 %v6236_v23, %v6189_v52  ;;  %v866_v8 = vmul.f32 %v6202_v58, %v6240_v24 }
 0x2e5   : > { %4852 = vmatprep.mubr.f32.mxu0 %v6330_v54  ;;  %v1003_v3 = vmul.f32 %v6246_v28, %v6224_v2  ;;  %v913_v9 = vadd.f32 %v905_v60, %v893_v12  ;;  %v925_v4 = vmul.f32 %v6344_v10, %v6212_v5  ;;  %v962_v11 = vrot.slane %v6349_v17, 1 }
 0x2e6   : > { %v6352_v51 = vadd.f32 %v1022_v40, %v1010_v7  ;;  %v991_v52 = vadd.f32 %v983_v42, %v952_v45  ;;  %v874_v46 = vadd.f32 %v866_v8, %v846_v61  ;;  %v886_v55 = vmul.f32 %v6205_v59, %v6254_v34 }
 0x2e7   : > { %v1023_v47 = vmul.f32 %v6243_v27, %v6232_v1  ;;  %v933_v20 = vadd.f32 %v925_v4, %v913_v9  ;;  %v945_v15 = vmul.f32 %v6349_v17, %v6220_v16  ;;  %v847_v29 = vmul.f32 %v6199_v57, %v6240_v24 }
 0x2e8   : > { %4853 = vmatmul.mubr.f32.gmra.mxu0 %v6352_v51  ;;  %v1011_v56 = vadd.f32 %v1003_v3, %v991_v52  ;;  %v894_v30 = vadd.f32 %v886_v55, %v874_v46  ;;  %v906_v31 = vmul.f32 %v6344_v10, %v6209_v62  ;;  %v867_v21 = vmul.f32 %v6202_v58, %v6254_v34  ;;  %v6379_v34 = vld [vmem:[%s5972_s17 + $0x38] sm:$0xff] }
 0x2e9   : > { %v953_v32 = vadd.f32 %v945_v15, %v933_v20  ;;  %v973_v33 = vsel %vm515_vm4, %v962_v11, 0.0  ;;  %v984_v6 = vmul.f32 %v6236_v23, %v6224_v2  ;;  %v926_v57 = vmul.f32 %v6349_v17, %v6212_v5 }
 0x2ea   : > { %v6373_v24 = vadd.f32 %v1023_v47, %v1011_v56  ;;  %v914_v36 = vadd.f32 %v906_v31, %v894_v30  ;;  %v875_v48 = vadd.f32 %v867_v21, %v847_v29  ;;  %v887_v37 = vmul.f32 0.0, %v6205_v59 }
 0x2eb   : > { %v992_v53 = vadd.f32 %v984_v6, %v953_v32  ;;  %v1004_v58 = vmul.f32 %v6246_v28, %v6232_v1  ;;  %v963_v35 = vrot.slane %v6379_v34, 1  ;;  %v946_v40 = vmul.f32 %v6379_v34, %v6220_v16 }
 0x2ec   : > { %4855 = vmatprep.mubr.f32.mxu0 %v6373_v24  ;;  %v934_v2 = vadd.f32 %v926_v57, %v914_v36  ;;  %v895_v41 = vadd.f32 %v887_v37, %v875_v48  ;;  %v907_v50 = vmul.f32 %v6349_v17, %v6209_v62  ;;  %v1024_v59 = vmul.f32 %v6243_v27, %v973_v33 }
 0x2ed   : > { %v1012_v12 = vadd.f32 %v1004_v58, %v992_v53  ;;  %v985_v61 = vmul.f32 %v6236_v23, %v6232_v1  ;;  %v927_v45 = vmul.f32 %v6379_v34, %v6212_v5  ;;  %v974_v8 = vsel %vm515_vm4, %v963_v35, 0.0 }
 0x2ee   : > { %v954_v60 = vadd.f32 %v946_v40, %v934_v2  ;;  %v915_v7 = vadd.f32 %v907_v50, %v895_v41  ;;  %v1005_v9 = vmul.f32 %v6246_v28, %v973_v33  ;;  %v947_v62 = vmul.f32 0.0, %v6220_v16 }
 0x2ef   : > { %v1032_v42 = vadd.f32 %v1024_v59, %v1012_v12  ;;  %v1025_v52 = vmul.f32 %v6243_v27, %v974_v8  ;;  %v986_v1 = vmul.f32 %v6236_v23, %v973_v33  ;;  %v1006_v5 = vmul.f32 %v6246_v28, %v974_v8  ;;  %v5371_v8 = vld [vmem:[#allocation7 + $0x28] sm:$0xff]  }
 0x2f0   : > { %v993_v3 = vadd.f32 %v985_v61, %v954_v60  ;;  %v935_v4 = vadd.f32 %v927_v45, %v915_v7  ;;  %v1026_v15 = vmul.f32 0.0, %v6243_v27  ;;  %v5369_v45 = vld [vmem:[#allocation7 + $0x38] sm:$0xff]  }
 0x2f1   : > { %4856 = vmatmul.mubr.f32.gmra.mxu0 %v1032_v42  ;;  %4905 = vmatprep.subr.bf16.mxu0 %v5369_v45 }
 0x2f2   : > { %v1013_v11 = vadd.f32 %v1005_v9, %v993_v3  ;;  %v955_v46 = vadd.f32 %v947_v62, %v935_v4  ;;  %4906 = vmatpush3.bf16.msra.mxu0 %v5369_v45 }
 0x2f4   : > { %v1033_v55 = vadd.f32 %v1025_v52, %v1013_v11  ;;  %v994_v47 = vadd.f32 %v986_v1, %v955_v46 }
 0x2f6   : > { %4858 = vmatprep.mubr.f32.mxu0 %v1033_v55  ;;  %v1014_v20 = vadd.f32 %v1006_v5, %v994_v47  ;;  %v5372_v47 = vld [vmem:[#allocation7 + $0x20] sm:$0xff]  }
 0x2f8   : > { %v1034_v29 = vadd.f32 %v1026_v15, %v1014_v20 }
 0x2fa   : > { %4859 = vmatmul.mubr.f32.gmra.mxu0 %v1034_v29 }
 0x3a2   : > { %v4851_v56 = vpop.f32.mrf.mxu0 }
 0x3a3   : > { %1147 = vperm.xlu1 %5352, %v4851_v56   ;;  %v5373_v56 = vld [vmem:[#allocation7 + $0x18] sm:$0xff]  }
 0x3a4   : > { %v1101_v16 = vpop.f32.mrf.mxu0 }
 0x3a5   : > { %1142 = vperm.xlu0 %5351, %v1101_v16  }
 0x3a8   : > { %v4854_v30 = vpop.f32.mrf.mxu0 }
 0x3a9   : > { %1157 = vperm.xlu1 %5352, %v4854_v30  }
 0x3aa   : > { %v1111_v31 = vpop.f32.mrf.mxu0 }
 0x3ad   : > { %1152 = vperm.xlu1 %5352, %v1111_v31   ;;  %v5374_v31 = vld [vmem:[#allocation7 + $0x10] sm:$0xff]  }
 0x3b1   : > { %v4857_v21 = vpop.f32.mrf.mxu0 }
 0x3b2   : > { %1167 = vperm.xlu1 %5352, %v4857_v21  }
 0x3b3   : > { %v1121_v23 = vpop.f32.mrf.mxu0 }
 0x3b6   : > { %1162 = vperm.xlu1 %5352, %v1121_v23  }
 0x3ba   : > { %v4860_v32 = vpop.f32.mrf.mxu0 }
 0x3bc   : > { %v1131_v28 = vpop.f32.mrf.mxu0 }
 0x3bd   : > { %1172 = vperm.xlu1 %5352, %v1131_v28  }
 0x3c1   : > { %1177 = vperm.xlu1 %5352, %v4860_v32  }
 0x41e   : > { %v1148_v33 = vpop.permute.xlu1 %1147 }
 0x41f   : > { %v6401_v27 = vsub.f32 %v6306_v14, %v1148_v33 }
 0x420   : > { %v1143_v6 = vpop.permute.xlu0 %1142 }
 0x421   : > { %v6404_v57 = vsub.f32 %v6300_v49, %v1143_v6  ;;  %v1189_v48 = vmul.f32 %v6401_v27, %v6401_v27  ;;  %v5375_v6 = vld [vmem:[#allocation7 + $0x8] sm:$0xff]  }
 0x423   : > { %v1188_v36 = vmul.f32 %v6404_v57, %v6404_v57 }
 0x424   : > { %v1158_v37 = vpop.permute.xlu1 %1157 }
 0x425   : > { %4893 = vmatprep.mubr.f32.mxu1 %v1188_v36  ;;  %v6411_v53 = vsub.f32 %v6352_v51, %v1158_v37  ;;  %v5376_v37 = vld [vmem:[#allocation7] sm:$0xff]  }
 0x426   : > { %4894 = vmatmul.mubr.f32.vlgmr.msra.gmra.mxu1 %v1189_v48 }
 0x427   : > { %v1191_v35 = vmul.f32 %v6411_v53, %v6411_v53 }
 0x428   : > { %v1153_v58 = vpop.permute.xlu1 %1152 }
 0x429   : > { %v6414_v14 = vsub.f32 %v6330_v54, %v1153_v58 }
 0x42b   : > { %v1190_v49 = vmul.f32 %v6414_v14, %v6414_v14 }
 0x42d   : > { %v1168_v2 = vpop.permute.xlu1 %1167  ;;  %4896 = vmatprep.mubr.f32.mxu1 %v1190_v49 }
 0x42e   : > { %4897 = vmatmul.mubr.f32.gmra.mxu1 %v1191_v35  ;;  %v6420_v40 = vsub.f32 %v1032_v42, %v1168_v2  ;;  %v5370_v42 = vld [vmem:[#allocation7 + $0x30] sm:$0xff]  }
 0x42f   : > { %4907 = vmatprep.subr.bf16.mxu0 %v5370_v42 }
 0x430   : > { %v1193_v54 = vmul.f32 %v6420_v40, %v6420_v40  ;;  %4908 = vmatpush3.bf16.msra.mxu0 %v5370_v42 }
 0x431   : > { %v1163_v41 = vpop.permute.xlu1 %1162  ;;  %4909 = vmatprep.subr.bf16.mxu0 %v5371_v8 }
 0x432   : > { %v6423_v50 = vsub.f32 %v6373_v24, %v1163_v41  ;;  %v4366_v41 = vld [vmem:[%s7439_s7] ss:$0 sm:$0xff] }
 0x434   : > { %v1192_v51 = vmul.f32 %v6423_v50, %v6423_v50  ;;  %4910 = vmatpush3.bf16.msra.mxu0 %v5371_v8 }
 0x435   : > { %4911 = vmatprep.subr.bf16.mxu0 %v5372_v47 }
 0x436   : > { %4899 = vmatprep.mubr.f32.mxu1 %v1192_v51 }
 0x437   : > { %4900 = vmatmul.mubr.f32.gmra.mxu1 %v1193_v54 }
 0x438   : > { %v1173_v12 = vpop.permute.xlu1 %1172  ;;  %4912 = vmatpush3.bf16.msra.mxu0 %v5372_v47 }
 0x439   : > { %v6429_v59 = vsub.f32 %v1033_v55, %v1173_v12  ;;  %4913 = vmatprep.subr.bf16.mxu0 %v5373_v56 }
 0x43b   : > { %v1194_v60 = vmul.f32 %v6429_v59, %v6429_v59 }
 0x43c   : > { %v1178_v61 = vpop.permute.xlu1 %1177  ;;  %4914 = vmatpush3.bf16.msra.mxu0 %v5373_v56 }
 0x43d   : > { %v6433_v7 = vsub.f32 %v1034_v29, %v1178_v61  ;;  %4902 = vmatprep.mubr.f32.mxu1 %v1194_v60  ;;  %4915 = vmatprep.subr.bf16.mxu0 %v5374_v31  ;;  %v4367_v60 = vld [vmem:[%s7440_s8] ss:$0 sm:$0xff] }
 0x43f   : > { %v1195_v24 = vmul.f32 %v6433_v7, %v6433_v7 }
 0x440   : > { %4916 = vmatpush3.bf16.msra.mxu0 %v5374_v31 }
 0x441   : > { %4903 = vmatmul.mubr.f32.gmra.mxu1 %v1195_v24  ;;  %4917 = vmatprep.subr.bf16.mxu0 %v5375_v6 }
 0x444   : > { %4918 = vmatpush3.bf16.msra.mxu0 %v5375_v6  ;;  %v5382_v6 = vld [vmem:[#allocation8 + $0x10] sm:$0xff]  }
 0x445   : > { %4919 = vmatprep.subr.bf16.mxu0 %v5376_v37 }
 0x448   : > { %4920 = vmatpush3.bf16.msra.mxu0 %v5376_v37  ;;  %v4368_v37 = vld [vmem:[%s7442_s10] ss:$0 sm:$0xff] }
 0x449   : > { %4953 = vmatprep.subr.mxu0 %v5753_v0 }
 0x4e6   : > { %v4895_v3 = vpop.f32.mrf.mxu1 }
 0x4e7   : > { %v1268_v9 = vadd.f32 1e-06, %v4895_v3 }
 0x4e8   : > { %v1262_v4 = vpop.f32.mrf.mxu1 }
 0x4e9   : > { %5453 = vrsqrt.f32 %v1268_v9  ;;  %v1263_v62 = vadd.f32 1e-06, %v1262_v4 }
 0x4eb   : > { %5455 = vrsqrt.f32 %v1263_v62 }
 0x4ee   : > { %v4898_v11 = vpop.f32.mrf.mxu1 }
 0x4ef   : > { %v1278_v52 = vadd.f32 1e-06, %v4898_v11 }
 0x4f0   : > { %v1272_v46 = vpop.f32.mrf.mxu1 }
 0x4f1   : > { %5457 = vrsqrt.f32 %v1278_v52  ;;  %v1273_v1 = vadd.f32 1e-06, %v1272_v46 }
 0x4f3   : > { %5459 = vrsqrt.f32 %v1273_v1 }
 0x4f6   : > { %v5454_v55 = vpop.eup %5453 }
 0x4f7   : > { %1316 = vperm.xlu1 %5352, %v5454_v55   ;;  %v4901_v5 = vpop.f32.mrf.mxu1 }
 0x4f8   : > { %v5456_v20 = vpop.eup %5455  ;;  %v1288_v15 = vadd.f32 1e-06, %v4901_v5 }
 0x4f9   : > { %v1282_v29 = vpop.f32.mrf.mxu1 }
 0x4fa   : > { %5461 = vrsqrt.f32 %v1288_v15  ;;  %v1283_v16 = vadd.f32 1e-06, %v1282_v29 }
 0x4fb   : > { %1311 = vperm.xlu1 %5352, %v5456_v20  }
 0x4fc   : > { %5463 = vrsqrt.f32 %v1283_v16 }
 0x4fe   : > { %v5458_v30 = vpop.eup %5457 }
 0x4ff   : > { %1326 = vperm.xlu1 %5352, %v5458_v30  }
 0x500   : > { %v5460_v23 = vpop.eup %5459 }
 0x501   : > { %v4904_v21 = vpop.f32.mrf.mxu1 }
 0x502   : > { %v1298_v32 = vadd.f32 1e-06, %v4904_v21 }
 0x503   : > { %v1292_v28 = vpop.f32.mrf.mxu1  ;;  %1321 = vperm.xlu1 %5352, %v5460_v23  }
 0x504   : > { %5465 = vrsqrt.f32 %v1298_v32  ;;  %v1293_v33 = vadd.f32 1e-06, %v1292_v28  ;;  %v5378_v28 = vld [vmem:[#allocation8 + $0x30] sm:$0xff]  }
 0x506   : > { %5467 = vrsqrt.f32 %v1293_v33  ;;  %v5379_v33 = vld [vmem:[#allocation8 + $0x28] sm:$0xff]  }
 0x507   : > { %v5462_v36 = vpop.eup %5461 }
 0x508   : > { %1336 = vperm.xlu0 %5351, %v5462_v36   ;;  %v5383_v36 = vld [vmem:[#allocation8 + $0x8] sm:$0xff]  }
 0x509   : > { %v5464_v48 = vpop.eup %5463 }
 0x50a   : > { %1331 = vperm.xlu1 %5352, %v5464_v48   ;;  %v5384_v48 = vld [vmem:[#allocation8] sm:$0xff]  }
 0x511   : > { %v5466_v58 = vpop.eup %5465 }
 0x512   : > { %1346 = vperm.xlu0 %5351, %v5466_v58  }
 0x513   : > { %v5468_v49 = vpop.eup %5467 }
 0x514   : > { %1341 = vperm.xlu1 %5352, %v5468_v49  }
 0x572   : > { %v1317_v35 = vpop.permute.xlu1 %1316 }
 0x573   : > { %v1350_v2 = vmul.f32 %v1317_v35, %v6401_v27 }
 0x575   : > { %v1365_v54 = vmul.f32 %v4366_v41, %v1350_v2 }
 0x576   : > { %v1312_v51 = vpop.permute.xlu1 %1311 }
 0x577   : > { %v1349_v12 = vmul.f32 %v1312_v51, %v6404_v57  ;;  %v1380_v24 = vadd.f32 %v4367_v60, %v1365_v54 }
 0x579   : > { %v1364_v61 = vmul.f32 %v4366_v41, %v1349_v12 }
 0x57a   : > { %v1327_v42 = vpop.permute.xlu1 %1326 }
 0x57b   : > { %v1379_v45 = vadd.f32 %v4367_v60, %v1364_v61  ;;  %v1352_v8 = vmul.f32 %v1327_v42, %v6411_v53 }
 0x57d   : > { %v1387_v3 = vpack.c.bf16 %v1380_v24, %v1379_v45  ;;  %v1367_v9 = vmul.f32 %v4366_v41, %v1352_v8 }
 0x57e   : > { %v1322_v27 = vpop.permute.xlu1 %1321 }
 0x57f   : > { %4921 = vmatprep.mubr.bf16.mxu0 %v1387_v3  ;;  %v1351_v4 = vmul.f32 %v1322_v27, %v6414_v14  ;;  %v1382_v11 = vadd.f32 %v4367_v60, %v1367_v9 }
 0x581   : > { %v1366_v62 = vmul.f32 %v4366_v41, %v1351_v4 }
 0x583   : > { %v1381_v52 = vadd.f32 %v4367_v60, %v1366_v62  ;;  %v1337_v57 = vpop.permute.xlu0 %1336 }
 0x584   : > { %v1354_v46 = vmul.f32 %v1337_v57, %v6420_v40 }
 0x585   : > { %v1388_v1 = vpack.c.bf16 %v1382_v11, %v1381_v52  ;;  %v1332_v55 = vpop.permute.xlu1 %1331 }
 0x586   : > { %v1369_v47 = vmul.f32 %v4366_v41, %v1354_v46  ;;  %v1353_v5 = vmul.f32 %v1332_v55, %v6423_v50  ;;  %v5377_v50 = vld [vmem:[#allocation8 + $0x38] sm:$0xff]  }
 0x587   : > { %4922 = vmatmul.mubr.bf16.vlgmr.msra.gmra.mxu0 %v1388_v1  ;;  %4929 = vmatprep.subr.bf16.mxu1 %v5377_v50 }
 0x588   : > { %v1368_v20 = vmul.f32 %v4366_v41, %v1353_v5  ;;  %v1384_v53 = vadd.f32 %v4367_v60, %v1369_v47  ;;  %4930 = vmatpush3.bf16.msra.mxu1 %v5377_v50 }
 0x589   : > { %4931 = vmatprep.subr.bf16.mxu1 %v5378_v28 }
 0x58a   : > { %v1383_v15 = vadd.f32 %v4367_v60, %v1368_v20 }
 0x58c   : > { %v1389_v29 = vpack.c.bf16 %v1384_v53, %v1383_v15  ;;  %4932 = vmatpush3.bf16.msra.mxu1 %v5378_v28 }
 0x58d   : > { %v1347_v56 = vpop.permute.xlu0 %1346  ;;  %4933 = vmatprep.subr.bf16.mxu1 %v5379_v33 }
 0x58e   : > { %v1356_v16 = vmul.f32 %v1347_v56, %v6433_v7  ;;  %4925 = vmatprep.mubr.bf16.mxu0 %v1389_v29  ;;  %v5380_v7 = vld [vmem:[#allocation8 + $0x20] sm:$0xff]  }
 0x58f   : > { %v1342_v14 = vpop.permute.xlu1 %1341 }
 0x590   : > { %v1371_v30 = vmul.f32 %v4366_v41, %v1356_v16  ;;  %v1355_v31 = vmul.f32 %v1342_v14, %v6429_v59  ;;  %4934 = vmatpush3.bf16.msra.mxu1 %v5379_v33  ;;  %v5381_v59 = vld [vmem:[#allocation8 + $0x18] sm:$0xff]  }
 0x591   : > { %4935 = vmatprep.subr.bf16.mxu1 %v5380_v7 }
 0x592   : > { %v1370_v21 = vmul.f32 %v4366_v41, %v1355_v31  ;;  %v1386_v40 = vadd.f32 %v4367_v60, %v1371_v30 }
 0x594   : > { %v1385_v23 = vadd.f32 %v4367_v60, %v1370_v21  ;;  %4936 = vmatpush3.bf16.msra.mxu1 %v5380_v7 }
 0x595   : > { %4937 = vmatprep.subr.bf16.mxu1 %v5381_v59 }
 0x596   : > { %v1390_v32 = vpack.c.bf16 %v1386_v40, %v1385_v23 }
 0x598   : > { %4926 = vmatmul.mubr.bf16.gmra.mxu0 %v1390_v32  ;;  %4938 = vmatpush3.bf16.msra.mxu1 %v5381_v59 }
 0x599   : > { %4969 = vmatprep.mubr.msk.f32.mxu0 %vm5754_vm0, %v5753_v0  ;;  %4939 = vmatprep.subr.bf16.mxu1 %v5382_v6 }
 0x59c   : > { %4940 = vmatpush3.bf16.msra.mxu1 %v5382_v6 }
 0x59d   : > { %4941 = vmatprep.subr.bf16.mxu1 %v5383_v36 }
 0x5a0   : > { %4942 = vmatpush3.bf16.msra.mxu1 %v5383_v36 }
 0x5a1   : > { %4943 = vmatprep.subr.bf16.mxu1 %v5384_v48 }
 0x5a4   : > { %4944 = vmatpush3.bf16.msra.mxu1 %v5384_v48 }
 0x5a5   : > { %4972 = vmatprep.subr.mxu1 %v5756_v63 }
 0x647   : > { %v4923_v58 = vpop.f32.mrf.mxu0 }
 0x648   : > { %v6458_v49 = vadd.f32 %v4923_v58, %v4368_v37 }
 0x649   : > { %v1496_v35 = vpop.f32.mrf.mxu0 }
 0x64a   : > { %v1537_v2 = vmul.f32 %v6458_v49, %v6458_v49  ;;  %v6462_v41 = vadd.f32 %v4368_v37, %v1496_v35 }
 0x64b   : > { %v4924_v51 = vpop.f32.mrf.mxu0 }
 0x64c   : > { %v1545_v54 = vmul.f32 %v1537_v2, %v6458_v49  ;;  %v1535_v12 = vmul.f32 %v6462_v41, %v6462_v41  ;;  %v1508_v60 = vadd.f32 %v4924_v51, %v4368_v37 }
 0x64d   : > { %v1499_v61 = vpop.f32.mrf.mxu0 }
 0x64e   : > { %v1553_v24 = vmul.f32 0.044715, %v1545_v54  ;;  %v1543_v45 = vmul.f32 %v1535_v12, %v6462_v41  ;;  %v1538_v42 = vmul.f32 %v1508_v60, %v1508_v60  ;;  %v1500_v8 = vadd.f32 %v4368_v37, %v1499_v61 }
 0x650   : > { %v1561_v3 = vadd.f32 %v1553_v24, %v6458_v49  ;;  %v1551_v27 = vmul.f32 0.044715, %v1543_v45  ;;  %v1546_v9 = vmul.f32 %v1538_v42, %v1508_v60  ;;  %v1536_v4 = vmul.f32 %v1500_v8, %v1500_v8 }
 0x652   : > { %v1569_v62 = vmul.f32 0.7978846, %v1561_v3  ;;  %v1559_v11 = vadd.f32 %v1551_v27, %v6462_v41  ;;  %v1554_v52 = vmul.f32 0.044715, %v1546_v9  ;;  %v1544_v57 = vmul.f32 %v1536_v4, %v1500_v8 }
 0x653   : > { %v1530_v4 = vmul.f32 0.5, %v1508_v60 }
 0x654   : > { %v1567_v46 = vmul.f32 0.7978846, %v1559_v11  ;;  %v1562_v1 = vadd.f32 %v1554_v52, %v1508_v60  ;;  %v1552_v55 = vmul.f32 0.044715, %v1544_v57  ;;  %5469 = vtanh.f32 %v1569_v62 }
 0x655   : > { %v1527_v62 = vmul.f32 0.5, %v6462_v41  ;;  %v1528_v52 = vmul.f32 0.5, %v1500_v8 }
 0x656   : > { %v1570_v47 = vmul.f32 0.7978846, %v1562_v1  ;;  %5471 = vtanh.f32 %v1567_v46  ;;  %v1560_v5 = vadd.f32 %v1552_v55, %v1500_v8  ;;  %v1529_v46 = vmul.f32 0.5, %v6458_v49 }
 0x658   : > { %5473 = vtanh.f32 %v1570_v47  ;;  %v4927_v20 = vpop.f32.mrf.mxu0  ;;  %v1568_v53 = vmul.f32 0.7978846, %v1560_v5 }
 0x659   : > { %v6470_v15 = vadd.f32 %v4927_v20, %v4368_v37 }
 0x65a   : > { %v1512_v29 = vpop.f32.mrf.mxu0  ;;  %5475 = vtanh.f32 %v1568_v53 }
 0x65b   : > { %v1541_v56 = vmul.f32 %v6470_v15, %v6470_v15  ;;  %v6474_v16 = vadd.f32 %v4368_v37, %v1512_v29 }
 0x65c   : > { %v4928_v14 = vpop.f32.mrf.mxu0 }
 0x65d   : > { %v1549_v30 = vmul.f32 %v1541_v56, %v6470_v15  ;;  %v1539_v31 = vmul.f32 %v6474_v16, %v6474_v16  ;;  %v1524_v21 = vadd.f32 %v4928_v14, %v4368_v37 }
 0x65e   : > { %v1515_v40 = vpop.f32.mrf.mxu0 }
 0x65f   : > { %v1557_v23 = vmul.f32 0.044715, %v1549_v30  ;;  %v1547_v32 = vmul.f32 %v1539_v31, %v6474_v16  ;;  %v1542_v50 = vmul.f32 %v1524_v21, %v1524_v21  ;;  %v1516_v28 = vadd.f32 %v4368_v37, %v1515_v40 }
 0x660   : > { %v1534_v14 = vmul.f32 0.5, %v1524_v21  ;;  %v1531_v31 = vmul.f32 0.5, %v6474_v16 }
 0x661   : > { %v1565_v33 = vadd.f32 %v1557_v23, %v6470_v15  ;;  %v1555_v7 = vmul.f32 0.044715, %v1547_v32  ;;  %v1550_v59 = vmul.f32 %v1542_v50, %v1524_v21  ;;  %v1540_v6 = vmul.f32 %v1516_v28, %v1516_v28  ;;  %v5470_v36 = vpop.eup %5469 }
 0x662   : > { %v1585_v9 = vadd.f32 1.0, %v5470_v36  ;;  %v1532_v40 = vmul.f32 0.5, %v1516_v28  ;;  %v1533_v32 = vmul.f32 0.5, %v6470_v15 }
 0x663   : > { %v1563_v48 = vadd.f32 %v1555_v7, %v6474_v16  ;;  %v1558_v58 = vmul.f32 0.044715, %v1550_v59  ;;  %v1548_v35 = vmul.f32 %v1540_v6, %v1516_v28  ;;  %v5472_v2 = vpop.eup %5471  ;;  %v1573_v51 = vmul.f32 0.7978846, %v1565_v33 }
 0x664   : > { %v1583_v3 = vadd.f32 1.0, %v5472_v2  ;;  %v1593_v5 = vmul.f32 %v1585_v9, %v1529_v46 }
 0x665   : > { %v5474_v54 = vpop.eup %5473  ;;  %v1571_v12 = vmul.f32 0.7978846, %v1563_v48  ;;  %v1566_v61 = vadd.f32 %v1558_v58, %v1524_v21  ;;  %v1556_v24 = vmul.f32 0.044715, %v1548_v35  ;;  %v4377_v58 = vld [vmem:[%s7444_s12] ss:$0 sm:$0xff] }
 0x666   : > { %v1586_v45 = vadd.f32 1.0, %v5474_v54  ;;  %v1591_v55 = vmul.f32 %v1583_v3, %v1527_v62 }
 0x667   : > { %5477 = vtanh.f32 %v1571_v12  ;;  %v1574_v42 = vmul.f32 0.7978846, %v1566_v61  ;;  %v1564_v37 = vadd.f32 %v1556_v24, %v1516_v28  ;;  %v5476_v27 = vpop.eup %5475 }
 0x668   : > { %5479 = vtanh.f32 %v1573_v51  ;;  %v1584_v57 = vadd.f32 1.0, %v5476_v27  ;;  %v1594_v1 = vmul.f32 %v1586_v45, %v1530_v4  ;;  %v5561_v4 = vld [vmem:[%s5972_s17 + $0x20] sm:$0xff] }
 0x669   : > { %5481 = vtanh.f32 %v1574_v42  ;;  %v1572_v11 = vmul.f32 0.7978846, %v1564_v37  ;;  %v5560_v37 = vld [vmem:[%s5972_s17 + $0x18] sm:$0xff] }
 0x66a   : > { %v1592_v47 = vmul.f32 %v1584_v57, %v1528_v52  ;;  %v1600_v53 = vpack.c.bf16 %v1594_v1, %v1593_v5  ;;  %v5562_v57 = vld [vmem:[%s5972_s17 + $0x10] sm:$0xff]  ;;  %v5563_v1 = vld [vmem:[%s5972_s17] sm:$0xff] }
 0x66b   : > { %5483 = vtanh.f32 %v1572_v11 }
 0x66c   : > { %v1599_v20 = vpack.c.bf16 %v1592_v47, %v1591_v55  ;;  %v5564_v47 = vld [vmem:[%s5972_s17 + $0x8] sm:$0xff] }
 0x66e   : > { %4945 = vmatprep.mubr.bf16.mxu1 %v1599_v20 }
 0x66f   : > { %4946 = vmatmul.mubr.bf16.vlgmr.msra.gmra.mxu1 %v1600_v53 }
 0x670   : > { %4973 = vmatpush3.msra.mxu1 %v5756_v63 }
 0x671   : > { %4974 = vmatprep.subr.mxu1 %v5756_v63 }
 0x672   : > { %4975 = vmatpush3.msra.mxu1 %v5756_v63 }
 0x673   : > { %4976 = vmatprep.subr.mxu1 %v5756_v63 }
 0x674   : > { %v5478_v41 = vpop.eup %5477  ;;  %4977 = vmatpush3.msra.mxu1 %v5756_v63 }
 0x675   : > { %v5480_v60 = vpop.eup %5479  ;;  %4978 = vmatprep.subr.mxu1 %v5756_v63  ;;  %v1587_v8 = vadd.f32 1.0, %v5478_v41 }
 0x676   : > { %v5482_v49 = vpop.eup %5481  ;;  %4979 = vmatpush3.msra.mxu1 %v5756_v63  ;;  %v1589_v30 = vadd.f32 1.0, %v5480_v60 }
 0x677   : > { %v1590_v29 = vadd.f32 1.0, %v5482_v49  ;;  %4980 = vmatprep.subr.mxu1 %v5756_v63  ;;  %v1595_v33 = vmul.f32 %v1587_v8, %v1531_v31  ;;  %v5387_v31 = vld [vmem:[#allocation5 + $0xf0] sm:$0xff]  }
 0x678   : > { %v5484_v56 = vpop.eup %5483  ;;  %4981 = vmatpush3.msra.mxu1 %v5756_v63  ;;  %v1597_v59 = vmul.f32 %v1589_v30, %v1533_v32  ;;  %v5386_v30 = vld [vmem:[#allocation5 + $0xb8] sm:$0xff]   ;;  %v5388_v32 = vld [vmem:[#allocation5 + $0xb0] sm:$0xff]  }
 0x679   : > { %v1588_v23 = vadd.f32 1.0, %v5484_v56  ;;  %v1598_v50 = vmul.f32 %v1590_v29, %v1534_v14  ;;  %4982 = vmatprep.subr.mxu1 %v5756_v63  ;;  %v5385_v56 = vld [vmem:[#allocation5 + $0xf8] sm:$0xff]  }
 0x67a   : > { %4983 = vmatpush3.msra.mxu1 %v5756_v63 }
 0x67b   : > { %v1596_v7 = vmul.f32 %v1588_v23, %v1532_v40  ;;  %4984 = vmatprep.subr.mxu1 %v5756_v63  ;;  %v1602_v16 = vpack.c.bf16 %v1598_v50, %v1597_v59  ;;  %v5389_v50 = vld [vmem:[#allocation5 + $0xe8] sm:$0xff]  }
 0x67c   : > { %4985 = vmatpush3.msra.mxu1 %v5756_v63  ;;  %v5390_v59 = vld [vmem:[#allocation5 + $0xa8] sm:$0xff]  }
 0x67d   : > { %v1601_v21 = vpack.c.bf16 %v1596_v7, %v1595_v33  ;;  %4986 = vmatprep.subr.mxu1 %v5756_v63 }
 0x67e   : > { %4987 = vmatpush3.msra.mxu1 %v5756_v63 }
 0x67f   : > { %4949 = vmatprep.mubr.bf16.mxu1 %v1601_v21  ;;  %4988 = vmatprep.subr.mxu1 %v5756_v63  ;;  %v5391_v21 = vld [vmem:[#allocation5 + $0xe0] sm:$0xff]  }
 0x680   : > { %4950 = vmatmul.mubr.bf16.gmra.mxu1 %v1602_v16  ;;  %v5392_v16 = vld [vmem:[#allocation5 + $0xa0] sm:$0xff]  }
 0x681   : > { %4989 = vmatpush3.msra.mxu1 %v5756_v63 }
 0x682   : > { %4990 = vmatprep.subr.mxu1 %v5756_v63 }
 0x683   : > { %4991 = vmatpush3.msra.mxu1 %v5756_v63 }
 0x684   : > { %4992 = vmatprep.subr.mxu1 %v5756_v63 }
 0x685   : > { %4993 = vmatpush3.msra.mxu1 %v5756_v63 }
 0x686   : > { %4994 = vmatprep.subr.mxu1 %v5756_v63 }
 0x687   : > { %4995 = vmatpush3.msra.mxu1 %v5756_v63 }
 0x688   : > { %4996 = vmatprep.subr.mxu1 %v5756_v63 }
 0x689   : > { %4997 = vmatpush3.msra.mxu1 %v5756_v63 }
 0x68a   : > { %4998 = vmatprep.subr.mxu1 %v5756_v63 }
 0x68b   : > { %4999 = vmatpush3.msra.mxu1 %v5756_v63 }
 0x68c   : > { %5000 = vmatprep.subr.mxu1 %v5756_v63 }
 0x68d   : > { %5001 = vmatpush3.msra.mxu1 %v5756_v63 }
 0x68e   : > { %5002 = vmatprep.subr.mxu1 %v5756_v63 }
 0x68f   : > { %5003 = vmatpush3.msra.mxu1 %v5756_v63 }
 0x72f   : > { %v4947_v15 = vpop.f32.mrf.mxu1 }
 0x730   : > { %v1717_v12 = vadd.f32 %v4947_v15, %v4377_v58  ;;  %v5393_v15 = vld [vmem:[#allocation5 + $0xd8] sm:$0xff]  }
 0x731   : > { %v1708_v28 = vpop.f32.mrf.mxu1 }
 0x732   : > { %v1709_v24 = vadd.f32 %v4377_v58, %v1708_v28  ;;  %v6533_v46 = vadd.f32 %v5562_v57, %v1717_v12  ;;  %v5394_v28 = vld [vmem:[#allocation5 + $0x98] sm:$0xff]  }
 0x733   : > { %v4948_v6 = vpop.f32.mrf.mxu1 }
 0x734   : > { %v1720_v35 = vadd.f32 %v4948_v6, %v4377_v58  ;;  %v6536_v55 = vadd.f32 %v5563_v1, %v1709_v24  ;;  %v5395_v6 = vld [vmem:[#allocation5 + $0xd0] sm:$0xff]   ;;  %v4387_v24 = vld [vmem:[%s7434_s2 + $0x1] sm:$0x1] }
 0x735   : > { %v1711_v36 = vpop.f32.mrf.mxu1 }
 0x736   : > { %v1712_v45 = vadd.f32 %v4377_v58, %v1711_v36  ;;  %v6521_v3 = vadd.f32 %v5560_v37, %v1720_v35  ;;  %v5396_v36 = vld [vmem:[#allocation5 + $0x90] sm:$0xff]   ;;  %v5399_v35 = vld [vmem:[#allocation5 + $0xc0] sm:$0xff]  }
 0x738   : > { %v6539_v5 = vadd.f32 %v5564_v47, %v1712_v45 }
 0x740   : > { %v4951_v48 = vpop.f32.mrf.mxu1 }
 0x741   : > { %v1733_v51 = vadd.f32 %v4951_v48, %v4377_v58  ;;  %v5397_v48 = vld [vmem:[#allocation5 + $0xc8] sm:$0xff]  }
 0x742   : > { %v1724_v2 = vpop.f32.mrf.mxu1 }
 0x743   : > { %v1725_v54 = vadd.f32 %v4377_v58, %v1724_v2  ;;  %v6524_v9 = vadd.f32 %v6349_v17, %v1733_v51  ;;  %v5400_v2 = vld [vmem:[#allocation5 + $0x80] sm:$0xff]  }
 0x744   : > { %v4952_v61 = vpop.f32.mrf.mxu1 }
 0x745   : > { %v1736_v42 = vadd.f32 %v4952_v61, %v4377_v58  ;;  %v6527_v62 = vadd.f32 %v5561_v4, %v1725_v54  ;;  %v1819_v41 = vmax.f32 %v6533_v46, %v6524_v9 }
 0x746   : > { %v1727_v27 = vpop.f32.mrf.mxu1 }
 0x747   : > { %v6530_v11 = vadd.f32 %v6379_v34, %v1736_v42  ;;  %v1728_v52 = vadd.f32 %v4377_v58, %v1727_v27  ;;  %v1817_v34 = vmax.f32 %v6536_v55, %v6527_v62  ;;  %v5398_v58 = vld [vmem:[#allocation5 + $0x88] sm:$0xff]  }
 0x749   : > { %v6542_v20 = vadd.f32 %v6344_v10, %v1728_v52  ;;  %4954 = vmatpush3.msra.mxu0 %v6530_v11  ;;  %v1820_v17 = vmax.f32 %v6521_v3, %v6530_v11 }
 0x74a   : > { %4955 = vmatprep.subr.mxu0 %v5753_v0 }
 0x74b   : > { %4956 = vmatpush3.msra.mxu0 %v6524_v9  ;;  %v1818_v53 = vmax.f32 %v6539_v5, %v6542_v20  ;;  %v1822_v60 = vmax.f32 %v1819_v41, %v1820_v17 }
 0x74c   : > { %4957 = vmatprep.subr.mxu0 %v5753_v0 }
 0x74d   : > { %4958 = vmatpush3.msra.mxu0 %v6542_v20  ;;  %v1821_v10 = vmax.f32 %v1817_v34, %v1818_v53 }
 0x74e   : > { %4959 = vmatprep.subr.mxu0 %v5753_v0 }
 0x74f   : > { %4960 = vmatpush3.msra.mxu0 %v6527_v62  ;;  %v1823_v49 = vmax.f32 %v1821_v10, %v1822_v60  ;;  %v4404_v60 = vld [vmem:[%s7436_s4 + $0x1] sm:$0x1] }
 0x750   : > { %4961 = vmatprep.subr.mxu0 %v5753_v0 }
 0x751   : > { %4962 = vmatpush3.msra.mxu0 %v6521_v3  ;;  %v1824_v8 = vrot.slane %v1823_v49, 4 }
 0x752   : > { %4963 = vmatprep.subr.mxu0 %v5753_v0 }
 0x753   : > { %4964 = vmatpush3.msra.mxu0 %v6533_v46  ;;  %v1825_v29 = vmax.f32 %v1823_v49, %v1824_v8 }
 0x754   : > { %4965 = vmatprep.subr.mxu0 %v5753_v0 }
 0x755   : > { %4966 = vmatpush3.msra.mxu0 %v6539_v5  ;;  %v1826_v14 = vrot.slane %v1825_v29, 2 }
 0x756   : > { %4967 = vmatprep.subr.mxu0 %v5753_v0 }
 0x757   : > { %4968 = vmatpush3.msra.mxu0 %v6536_v55  ;;  %v1827_v40 = vmax.f32 %v1825_v29, %v1826_v14 }
 0x758   : > { %4970 = vmatmul.mubr.msk.f32.vlgmr.msra.gmra.mxu0 %vm516_vm1, %v5755_v18  ;;  %4601 = vmatprep.subr.bf16.mxu0 %v5385_v56 }
 0x759   : > { %v1828_v23 = vrot.slane %v1827_v40, 1  ;;  %4602 = vmatpush3.bf16.msra.mxu0 %v5386_v30 }
 0x75a   : > { %4603 = vmatprep.subr.bf16.mxu0 %v5387_v31 }
 0x75b   : > { %v1829_v33 = vmax.f32 %v1827_v40, %v1828_v23  ;;  %v4405_v23 = vld [vmem:[%s7437_s5 + $0x1] sm:$0x1] }
 0x75d   : > { %v1831_v7 = vpack.c.bf16 %v1829_v33, %v1829_v33  ;;  %4604 = vmatpush3.bf16.msra.mxu0 %v5388_v32  ;;  %v2050_v33 = vrot.slane %v6533_v46, 7 }
 0x75e   : > { %4605 = vmatprep.subr.bf16.mxu0 %v5389_v50 }
 0x75f   : > { %1995 = vmatprep.mubr.bf16.mxu0 %v1831_v7  ;;  %v4406_v7 = vld [vmem:[%s7435_s3 + $0x10] sm:$0xff] }
 0x761   : > { %4606 = vmatpush3.bf16.msra.mxu0 %v5390_v59  ;;  %v2048_v59 = vrot.slane %v6536_v55, 7 }
 0x762   : > { %4607 = vmatprep.subr.bf16.mxu0 %v5391_v21  ;;  %v2186_v21 = vrot.slane %v6533_v46, 1 }
 0x765   : > { %4608 = vmatpush3.bf16.msra.mxu0 %v5392_v16 }
 0x766   : > { %4609 = vmatprep.subr.bf16.mxu0 %v5393_v15  ;;  %v2184_v15 = vrot.slane %v6536_v55, 1 }
 0x769   : > { %4610 = vmatpush3.bf16.msra.mxu0 %v5394_v28  ;;  %v2051_v28 = vrot.slane %v6521_v3, 7 }
 0x76a   : > { %4611 = vmatprep.subr.bf16.mxu0 %v5395_v6  ;;  %v2187_v6 = vrot.slane %v6521_v3, 1 }
 0x76d   : > { %4612 = vmatpush3.bf16.msra.mxu0 %v5396_v36  ;;  %v4409_v36 = vld [vmem:[%s7438_s6 + $0x1] ss:$0 sm:$0xff] }
 0x76e   : > { %4613 = vmatprep.subr.bf16.mxu0 %v5397_v48  ;;  %v2049_v48 = vrot.slane %v6539_v5, 7 }
 0x771   : > { %4614 = vmatpush3.bf16.msra.mxu0 %v5398_v58  ;;  %v2185_v58 = vrot.slane %v6539_v5, 1 }
 0x772   : > { %4615 = vmatprep.subr.bf16.mxu0 %v5399_v35  ;;  %v4407_v35 = vld [vmem:[%s7435_s3 + $0x18] sm:$0x1] }
 0x775   : > { %4616 = vmatpush3.bf16.msra.mxu0 %v5400_v2 }
 0x776   : > { %5016 = vmatprep.subr.mxu0 %v5756_v63 }
 0x818   : > { %v1813_v51 = vpop.f32.mrf.mxu0 }
 0x819   : > { %v1830_v54 = vpack.c.bf16 %v1813_v51, %v1813_v51  ;;  %v2058_v51 = vsel %vm514_vm3, %v2050_v33, 0.0 }
 0x81a   : > { %v4971_v12 = vpop.f32.mrf.mxu0 }
 0x81b   : > { %1996 = vmatmul.mubr.bf16.vlgmr.msra.gmra.mxu0 %v1830_v54  ;;  %v2056_v54 = vsel %vm514_vm3, %v2048_v59, 0.0  ;;  %v6635_v12 = vsel %vm515_vm4, %v2186_v21, 0.0 }
 0x81c   : > { %5017 = vmatpush3.msra.mxu0 %v5756_v63 }
 0x81d   : > { %5018 = vmatprep.subr.mxu0 %v5756_v63 }
 0x81e   : > { %5019 = vmatpush3.msra.mxu0 %v5756_v63 }
 0x81f   : > { %5020 = vmatprep.subr.mxu0 %v5756_v63 }
 0x820   : > { %5021 = vmatpush3.msra.mxu0 %v5756_v63 }
 0x821   : > { %5022 = vmatprep.subr.mxu0 %v5756_v63 }
 0x822   : > { %5023 = vmatpush3.msra.mxu0 %v5756_v63 }
 0x823   : > { %5024 = vmatprep.subr.mxu0 %v5756_v63 }
 0x824   : > { %5025 = vmatpush3.msra.mxu0 %v5756_v63 }
 0x825   : > { %5026 = vmatprep.subr.mxu0 %v5756_v63 }
 0x826   : > { %5027 = vmatpush3.msra.mxu0 %v5756_v63 }
 0x827   : > { %5028 = vmatprep.subr.mxu0 %v5756_v63 }
 0x828   : > { %5029 = vmatpush3.msra.mxu0 %v5756_v63 }
 0x829   : > { %5030 = vmatprep.subr.mxu0 %v5756_v63 }
 0x82a   : > { %5031 = vmatpush3.msra.mxu0 %v5756_v63 }
 0x82b   : > { %5032 = vmatprep.subr.mxu0 %v5756_v63 }
 0x82c   : > { %5033 = vmatpush3.msra.mxu0 %v5756_v63 }
 0x82d   : > { %5034 = vmatprep.subr.mxu0 %v5756_v63 }
 0x82e   : > { %5035 = vmatpush3.msra.mxu0 %v5756_v63 }
 0x82f   : > { %5036 = vmatprep.subr.mxu0 %v5756_v63 }
 0x830   : > { %5037 = vmatpush3.msra.mxu0 %v5756_v63 }
 0x831   : > { %5038 = vmatprep.subr.mxu0 %v5756_v63 }
 0x832   : > { %5039 = vmatpush3.msra.mxu0 %v5756_v63 }
 0x833   : > { %5040 = vmatprep.subr.mxu0 %v5756_v63 }
 0x834   : > { %5041 = vmatpush3.msra.mxu0 %v5756_v63 }
 0x835   : > { %5042 = vmatprep.subr.mxu0 %v5756_v63 }
 0x836   : > { %5043 = vmatpush3.msra.mxu0 %v5756_v63 }
 0x837   : > { %5044 = vmatprep.subr.mxu0 %v5756_v63 }
 0x838   : > { %5045 = vmatpush3.msra.mxu0 %v5756_v63 }
 0x839   : > { %5046 = vmatprep.subr.mxu0 %v5756_v63 }
 0x83a   : > { %5047 = vmatpush3.msra.mxu0 %v5756_v63 }
 0x8db   : > { %v4617_v61 = vpop.f32.mrf.mxu0 }
 0x8dd   : > { %v4618_v45 = vpop.f32.mrf.mxu0 }
 0x8de   : > { %v4619_v42 = vadd.f32 %v4618_v45, %v4617_v61  ;;  %v2052_v61 = vrot.slane %v6527_v62, 7 }
 0x8df   : > { %v4620_v37 = vpop.f32.mrf.mxu0 }
 0x8e0   : > { %v1998_v27 = vadd.f32 %v4619_v42, %v4387_v24  ;;  %v2054_v24 = vrot.slane %v6524_v9, 7  ;;  %v2192_v42 = vsel %vm515_vm4, %v2184_v15, 0.0  ;;  %v6643_v37 = vsel %vm514_vm3, %v2051_v28, 0.0 }
 0x8e1   : > { %v4621_v4 = vpop.f32.mrf.mxu0  ;;  %v2189_v15 = vrot.slane %v6542_v20, 1 }
 0x8e2   : > { %v2004_v52 = vmul.f32 %v1998_v27, %v1998_v27  ;;  %v2003_v53 = vmul.f32 0.5, %v1998_v27 }
 0x8e4   : > { %v2005_v57 = vmul.f32 %v2004_v52, %v1998_v27  ;;  %v2057_v52 = vsel %vm514_vm3, %v2049_v48, 0.0 }
 0x8e6   : > { %v2006_v1 = vmul.f32 0.044715, %v2005_v57  ;;  %v6653_v57 = vsel %vm515_vm4, %v2185_v58, 0.0 }
 0x8e8   : > { %v2007_v47 = vadd.f32 %v2006_v1, %v1998_v27  ;;  %v6647_v27 = vsel %vm515_vm4, %v2187_v6, 0.0  ;;  %v2188_v1 = vrot.slane %v6527_v62, 1 }
 0x8ea   : > { %v2008_v17 = vmul.f32 0.7978846, %v2007_v47 }
 0x8ec   : > { %5485 = vtanh.f32 %v2008_v17 }
 0x8f9   : > { %v5486_v34 = vpop.eup %5485 }
 0x8fa   : > { %v2010_v41 = vadd.f32 1.0, %v5486_v34 }
 0x8fc   : > { %v2011_v10 = vmul.f32 %v2010_v41, %v2003_v53  ;;  %v2190_v53 = vrot.slane %v6524_v9, 1 }
 0x8fe   : > { %v2012_v49 = vand.u32 2147483647, %v2011_v10 }
 0x900   : > { %v2015_v8 = vmul.f32 %v4404_v60, %v2012_v49  ;;  %v2053_v60 = vrot.slane %v6542_v20, 7  ;;  %v6676_v49 = vsel %vm514_vm3, %v2054_v24, 0.0 }
 0x902   : > { %v2016_v29 = vsel %vm786_vm2, %v2015_v8, 0.0 }
 0x903   : > { %2017 = vadd.xlane.f32.xlu1 %v2016_v29 }
 0x98c   : > { %v2018_v56 = vpop.xlane.xlu1 %2017 }
 0x98d   : > { %v2019_v14 = vmul.f32 0.0078125, %v2018_v56 }
 0x98f   : > { %v2020_v30 = vadd.f32 1e-06, %v2019_v14 }
 0x991   : > { %5487 = vrcp.f32 %v2020_v30 }
 0x99e   : > { %v5488_v31 = vpop.eup %5487 }
 0x99f   : > { %v2022_v40 = vmul.f32 %v5488_v31, %v2015_v8 }
 0x9a1   : > { %v2025_v32 = vmul.f32 %v2022_v40, %v2011_v10  ;;  %v6671_v10 = vsel %vm514_vm3, %v2052_v61, 0.0  ;;  %v6687_v40 = vsel %vm515_vm4, %v2188_v1, 0.0 }
 0x9a3   : > { %v2026_v50 = vmul.f32 %v4405_v23, %v2025_v32  ;;  %v2055_v23 = vrot.slane %v6530_v11, 7 }
 0x9a5   : > { %v2034_v16 = vrot.slane %v2026_v50, %v6122_v19 }
 0x9a7   : > { %v2036_v2 = vmul.f32 %v4406_v7, %v2034_v16  ;;  %v2037_v4 = vmul.f32 %v4407_v35, %v2034_v16  ;;  %v6700_v16 = vsel %vm514_vm3, %v2053_v60, 0.0 }
 0x9a9   : > { %v2046_v45 = vadd.f32 %v4409_v36, %v2036_v2  ;;  %v2047_v30 = vadd.f32 %v4409_v36, %v2037_v4 }
 0x9ab   : > { %v6657_v47 = vrot.slane %v2046_v45, %v6122_v19  ;;  %v6660_v17 = vrot.slane %v2046_v45, %v6128_v22  ;;  %v6663_v34 = vrot.slane %v2046_v45, %v6132_v25  ;;  %v6667_v41 = vrot.slane %v2046_v45, %v6135_v26 }
 0x9ac   : > { %v6683_v31 = vrot.slane %v2046_v45, %v6157_v38  ;;  %v6693_v59 = vrot.slane %v2046_v45, %v6160_v39  ;;  %v6696_v21 = vrot.slane %v2046_v45, %v6166_v43  ;;  %v6707_v58 = vrot.slane %v2047_v30, %v6122_v19 }
 0x9ad   : > { %v2068_v8 = vmul.f32 0.0, %v6657_v47  ;;  %v2069_v29 = vmul.f32 %v6657_v47, %v2056_v54  ;;  %v2088_v56 = vmul.f32 %v6660_v17, %v2056_v54  ;;  %v2089_v14 = vmul.f32 %v6660_v17, %v2057_v52 }
 0x9ae   : > { %v2108_v33 = vmul.f32 %v6663_v34, %v2057_v52  ;;  %v2109_v7 = vmul.f32 %v6663_v34, %v2058_v51  ;;  %v2128_v36 = vmul.f32 0.0, %v6667_v41  ;;  %v2129_v48 = vmul.f32 %v6667_v41, %v6536_v55 }
 0x9af   : > { %v2096_v32 = vadd.f32 %v2088_v56, %v2068_v8  ;;  %v2097_v50 = vadd.f32 %v2089_v14, %v2069_v29  ;;  %v2148_v35 = vmul.f32 %v6683_v31, %v6536_v55  ;;  %v2070_v2 = vmul.f32 %v6657_v47, %v2057_v52 }
 0x9b0   : > { %v2090_v54 = vmul.f32 %v6660_v17, %v2058_v51  ;;  %v2149_v4 = vmul.f32 %v6683_v31, %v6539_v5  ;;  %v6716_v1 = vrot.slane %v2046_v45, %v6169_v44  ;;  %v2168_v60 = vmul.f32 %v6693_v59, %v6539_v5 }
 0x9b1   : > { %v2116_v28 = vadd.f32 %v2108_v33, %v2096_v32  ;;  %v2117_v6 = vadd.f32 %v2109_v7, %v2097_v50  ;;  %v2169_v8 = vmul.f32 %v6693_v59, %v6533_v46  ;;  %v2110_v52 = vmul.f32 %v6663_v34, %v6643_v37 }
 0x9b2   : > { %v2098_v29 = vadd.f32 %v2090_v54, %v2070_v2  ;;  %v2204_v30 = vmul.f32 0.0, %v6696_v21  ;;  %v2205_v32 = vmul.f32 %v6696_v21, %v2192_v42  ;;  %v2130_v45 = vmul.f32 %v6667_v41, %v6539_v5 }
 0x9b3   : > { %v2136_v61 = vadd.f32 %v2128_v36, %v2116_v28  ;;  %v2137_v24 = vadd.f32 %v2129_v48, %v2117_v6  ;;  %v2071_v33 = vmul.f32 %v6657_v47, %v2058_v51  ;;  %v2091_v7 = vmul.f32 %v6660_v17, %v6643_v37 }
 0x9b4   : > { %v2118_v50 = vadd.f32 %v2110_v52, %v2098_v29  ;;  %v2224_v36 = vmul.f32 %v6716_v1, %v2192_v42  ;;  %v2244_v48 = vmul.f32 %v6707_v58, %v6653_v57  ;;  %v2150_v2 = vmul.f32 %v6683_v31, %v6533_v46 }
 0x9b5   : > { %v2156_v56 = vadd.f32 %v2148_v35, %v2136_v61  ;;  %v2157_v14 = vadd.f32 %v2149_v4, %v2137_v24  ;;  %v2099_v54 = vadd.f32 %v2091_v7, %v2071_v33  ;;  %v2111_v61 = vmul.f32 %v6663_v34, %v6671_v10 }
 0x9b6   : > { %v2138_v35 = vadd.f32 %v2130_v45, %v2118_v50  ;;  %v2225_v4 = vmul.f32 %v6716_v1, %v6653_v57  ;;  %v2131_v29 = vmul.f32 %v6667_v41, %v6533_v46  ;;  %v2072_v52 = vmul.f32 %v6657_v47, %v6643_v37 }
 0x9b7   : > { %v2176_v28 = vadd.f32 %v2168_v60, %v2156_v56  ;;  %v2177_v6 = vadd.f32 %v2169_v8, %v2157_v14  ;;  %v2170_v60 = vmul.f32 %v6693_v59, %v6521_v3  ;;  %v2119_v8 = vadd.f32 %v2111_v61, %v2099_v54 }
 0x9b8   : > { %v2158_v42 = vadd.f32 %v2150_v2, %v2138_v35  ;;  %v2206_v45 = vmul.f32 %v6696_v21, %v6653_v57  ;;  %v2151_v7 = vmul.f32 %v6683_v31, %v6521_v3  ;;  %v2226_v2 = vmul.f32 %v6716_v1, %v6635_v12 }
 0x9b9   : > { %v2212_v24 = vadd.f32 %v2204_v30, %v2176_v28  ;;  %v2213_v51 = vadd.f32 %v2205_v32, %v2177_v6  ;;  %v2245_v30 = vmul.f32 %v6707_v58, %v6635_v12  ;;  %v2092_v32 = vmul.f32 %v6660_v17, %v6671_v10 }
 0x9ba   : > { %v2178_v50 = vadd.f32 %v2170_v60, %v2158_v42  ;;  %v2139_v33 = vadd.f32 %v2131_v29, %v2119_v8  ;;  %v2171_v57 = vmul.f32 %v6693_v59, %v6527_v62  ;;  %v2246_v60 = vmul.f32 %v6707_v58, %v6647_v27 }
 0x9bb   : > { %v2232_v56 = vadd.f32 %v2224_v36, %v2212_v24  ;;  %v2233_v14 = vadd.f32 %v2225_v4, %v2213_v51  ;;  %v2100_v37 = vadd.f32 %v2092_v32, %v2072_v52  ;;  %v2112_v36 = vmul.f32 %v6663_v34, %v6700_v16 }
 0x9bc   : > { %v2214_v35 = vadd.f32 %v2206_v45, %v2178_v50  ;;  %v2159_v54 = vadd.f32 %v2151_v7, %v2139_v33  ;;  %v2073_v24 = vmul.f32 %v6657_v47, %v6671_v10  ;;  %v2093_v51 = vmul.f32 %v6660_v17, %v6700_v16 }
 0x9bd   : > { %v6754_v28 = vadd.f32 %v2244_v48, %v2232_v56  ;;  %v6756_v6 = vadd.f32 %v2245_v30, %v2233_v14  ;;  %v2120_v61 = vadd.f32 %v2112_v36, %v2100_v37  ;;  %v2132_v48 = vmul.f32 %v6667_v41, %v6521_v3 }
 0x9be   : > { %v2234_v4 = vadd.f32 %v2226_v2, %v2214_v35  ;;  %v2179_v42 = vadd.f32 %v2171_v57, %v2159_v54  ;;  %v2207_v8 = vmul.f32 %v6696_v21, %v6635_v12  ;;  %v2152_v52 = vmul.f32 %v6683_v31, %v6527_v62 }
 0x9bf   : > { %5004 = vmatprep.mubr.f32.mxu1 %v6754_v28  ;;  %v2140_v29 = vadd.f32 %v2132_v48, %v2120_v61  ;;  %v2101_v56 = vadd.f32 %v2093_v51, %v2073_v24  ;;  %v2113_v10 = vmul.f32 %v6663_v34, %v6676_v49  ;;  %v2227_v32 = vmul.f32 %v6716_v1, %v6647_v27 }
 0x9c0   : > { %5005 = vmatmul.mubr.f32.vlgmr.msra.gmra.mxu1 %v6756_v6  ;;  %v6780_v14 = vadd.f32 %v2246_v60, %v2234_v4  ;;  %v2215_v30 = vadd.f32 %v2207_v8, %v2179_v42  ;;  %v2172_v50 = vmul.f32 %v6693_v59, %v6542_v20  ;;  %v2133_v12 = vmul.f32 %v6667_v41, %v6527_v62 }
 0x9c1   : > { %v2160_v45 = vadd.f32 %v2152_v52, %v2140_v29  ;;  %v2121_v33 = vadd.f32 %v2113_v10, %v2101_v56  ;;  %v2074_v7 = vmul.f32 %v6657_v47, %v6700_v16  ;;  %v2247_v36 = vmul.f32 %v6707_v58, %v6687_v40 }
 0x9c2   : > { %5007 = vmatprep.mubr.f32.mxu1 %v6780_v14  ;;  %v2235_v37 = vadd.f32 %v2227_v32, %v2215_v30  ;;  %v2063_v35 = vsel %vm514_vm3, %v2055_v23, 0.0  ;;  %v2094_v2 = vmul.f32 %v6660_v17, %v6676_v49  ;;  %v2208_v57 = vmul.f32 %v6696_v21, %v6647_v27 }
 0x9c3   : > { %v2180_v54 = vadd.f32 %v2172_v50, %v2160_v45  ;;  %v2141_v61 = vadd.f32 %v2133_v12, %v2121_v33  ;;  %v2153_v16 = vmul.f32 %v6683_v31, %v6542_v20  ;;  %v2228_v24 = vmul.f32 %v6716_v1, %v6687_v40 }
 0x9c4   : > { %v6803_v48 = vadd.f32 %v2247_v36, %v2235_v37  ;;  %v2102_v51 = vadd.f32 %v2094_v2, %v2074_v7  ;;  %v2114_v4 = vmul.f32 %v6663_v34, %v2063_v35  ;;  %v2173_v42 = vmul.f32 %v6693_v59, %v6524_v9 }
 0x9c5   : > { %v2216_v23 = vadd.f32 %v2208_v57, %v2180_v54  ;;  %v2161_v60 = vadd.f32 %v2153_v16, %v2141_v61  ;;  %v2075_v27 = vmul.f32 %v6657_v47, %v6676_v49  ;;  %v2197_v8 = vsel %vm515_vm4, %v2189_v15, 0.0 }
 0x9c6   : > { %5008 = vmatmul.mubr.f32.gmra.mxu1 %v6803_v48  ;;  %v2122_v29 = vadd.f32 %v2114_v4, %v2102_v51  ;;  %v2134_v52 = vmul.f32 %v6667_v41, %v6542_v20  ;;  %v2095_v56 = vmul.f32 %v6660_v17, %v2063_v35  ;;  %v2248_v30 = vmul.f32 %v6707_v58, %v2197_v8 }
 0x9c7   : > { %v2236_v10 = vadd.f32 %v2228_v24, %v2216_v23  ;;  %v2181_v32 = vadd.f32 %v2173_v42, %v2161_v60  ;;  %v2209_v47 = vmul.f32 %v6696_v21, %v6687_v40  ;;  %v2154_v50 = vmul.f32 %v6683_v31, %v6524_v9 }
 0x9c8   : > { %v2142_v49 = vadd.f32 %v2134_v52, %v2122_v29  ;;  %v2103_v45 = vadd.f32 %v2095_v56, %v2075_v27  ;;  %v2115_v15 = vmul.f32 0.0, %v6663_v34  ;;  %v2198_v17 = vsel %vm515_vm4, %v2190_v53, 0.0 }
 0x9c9   : > { %v6826_v33 = vadd.f32 %v2248_v30, %v2236_v10  ;;  %v2217_v12 = vadd.f32 %v2209_v47, %v2181_v32  ;;  %v2229_v7 = vmul.f32 %v6716_v1, %v2197_v8  ;;  %v2174_v40 = vmul.f32 %v6693_v59, %v6530_v11 }
 0x9ca   : > { %v2162_v37 = vadd.f32 %v2154_v50, %v2142_v49  ;;  %v2123_v36 = vadd.f32 %v2115_v15, %v2103_v45  ;;  %v2135_v35 = vmul.f32 %v6667_v41, %v6524_v9  ;;  %v2249_v2 = vmul.f32 %v6707_v58, %v2198_v17 }
 0x9cb   : > { %5010 = vmatprep.mubr.f32.mxu1 %v6826_v33  ;;  %v2237_v34 = vadd.f32 %v2229_v7, %v2217_v12  ;;  %v2191_v54 = vrot.slane %v6530_v11, 1  ;;  %v2210_v53 = vmul.f32 %v6696_v21, %v2197_v8  ;;  %v2155_v16 = vmul.f32 %v6683_v31, %v6530_v11 }
 0x9cc   : > { %v2182_v57 = vadd.f32 %v2174_v40, %v2162_v37  ;;  %v2143_v61 = vadd.f32 %v2135_v35, %v2123_v36  ;;  %v2230_v4 = vmul.f32 %v6716_v1, %v2198_v17  ;;  %v2175_v41 = vmul.f32 0.0, %v6693_v59 }
 0x9cd   : > { %v2257_v24 = vadd.f32 %v2249_v2, %v2237_v34  ;;  %v2199_v60 = vsel %vm515_vm4, %v2191_v54, 0.0  ;;  %v2211_v8 = vmul.f32 %v6696_v21, %v2198_v17  ;;  %v2251_v30 = vmul.f32 0.0, %v6707_v58 }
 0x9ce   : > { %v2218_v51 = vadd.f32 %v2210_v53, %v2182_v57  ;;  %v2163_v23 = vadd.f32 %v2155_v16, %v2143_v61  ;;  %v2250_v27 = vmul.f32 %v6707_v58, %v2199_v60  ;;  %v2231_v31 = vmul.f32 %v6716_v1, %v2199_v60  ;;  %v5402_v60 = vld [vmem:[#allocation7 + $0x70] sm:$0xff]  }
 0x9cf   : > { %5011 = vmatmul.mubr.f32.gmra.mxu1 %v2257_v24 }
 0x9d0   : > { %v2238_v42 = vadd.f32 %v2230_v4, %v2218_v51  ;;  %v2183_v29 = vadd.f32 %v2175_v41, %v2163_v23  ;;  %v5401_v41 = vld [vmem:[#allocation7 + $0x78] sm:$0xff]  }
 0x9d1   : > { %5060 = vmatprep.subr.bf16.mxu1 %v5401_v41 }
 0x9d2   : > { %v2258_v52 = vadd.f32 %v2250_v27, %v2238_v42  ;;  %v2219_v56 = vadd.f32 %v2211_v8, %v2183_v29  ;;  %5061 = vmatpush3.bf16.msra.mxu1 %v5401_v41  ;;  %v5403_v42 = vld [vmem:[#allocation7 + $0x68] sm:$0xff]  }
 0x9d3   : > { %5062 = vmatprep.subr.bf16.mxu1 %v5402_v60 }
 0x9d4   : > { %5013 = vmatprep.mubr.f32.mxu1 %v2258_v52  ;;  %v2239_v10 = vadd.f32 %v2231_v31, %v2219_v56 }
 0x9d6   : > { %v2259_v32 = vadd.f32 %v2251_v30, %v2239_v10  ;;  %5063 = vmatpush3.bf16.msra.mxu1 %v5402_v60 }
 0x9d7   : > { %5064 = vmatprep.subr.bf16.mxu1 %v5403_v42 }
 0x9d8   : > { %5014 = vmatmul.mubr.f32.gmra.mxu1 %v2259_v32 }
 0x9da   : > { %5065 = vmatpush3.bf16.msra.mxu1 %v5403_v42  ;;  %v4413_v42 = vld [vmem:[%s7440_s8 + $0x1] ss:$0 sm:$0xff] }
 0xa80   : > { %v5006_v59 = vpop.f32.mrf.mxu1 }
 0xa81   : > { %2372 = vperm.xlu0 %5351, %v5006_v59  }
 0xa82   : > { %v2326_v47 = vpop.f32.mrf.mxu1 }
 0xa85   : > { %2367 = vperm.xlu0 %5351, %v2326_v47   ;;  %v5404_v47 = vld [vmem:[#allocation7 + $0x60] sm:$0xff]  }
 0xa86   : > { %v5009_v49 = vpop.f32.mrf.mxu1  ;;  %5066 = vmatprep.subr.bf16.mxu1 %v5404_v47 }
 0xa87   : > { %5067 = vmatpush3.bf16.msra.mxu1 %v5404_v47 }
 0xa88   : > { %v2336_v50 = vpop.f32.mrf.mxu1 }
 0xa89   : > { %2382 = vperm.xlu0 %5351, %v5009_v49  }
 0xa8d   : > { %2377 = vperm.xlu0 %5351, %v2336_v50  }
 0xa8f   : > { %v5012_v45 = vpop.f32.mrf.mxu1 }
 0xa91   : > { %2392 = vperm.xlu0 %5351, %v5012_v45   ;;  %v2346_v21 = vpop.f32.mrf.mxu1 }
 0xa95   : > { %2387 = vperm.xlu0 %5351, %v2346_v21   ;;  %v5405_v21 = vld [vmem:[#allocation7 + $0x58] sm:$0xff]  }
 0xa96   : > { %5068 = vmatprep.subr.bf16.mxu1 %v5405_v21 }
 0xa97   : > { %5069 = vmatpush3.bf16.msra.mxu1 %v5405_v21 }
 0xa98   : > { %v5015_v15 = vpop.f32.mrf.mxu1 }
 0xa9a   : > { %v2356_v1 = vpop.f32.mrf.mxu1 }
 0xa9b   : > { %2397 = vperm.xlu0 %5351, %v2356_v1  }
 0xa9f   : > { %2402 = vperm.xlu0 %5351, %v5015_v15  }
 0xafc   : > { %v2373_v17 = vpop.permute.xlu0 %2372 }
 0xafd   : > { %v6852_v58 = vsub.f32 %v6756_v6, %v2373_v17  ;;  %v5406_v17 = vld [vmem:[#allocation7 + $0x50] sm:$0xff]  }
 0xafe   : > { %5070 = vmatprep.subr.bf16.mxu1 %v5406_v17 }
 0xaff   : > { %v2414_v40 = vmul.f32 %v6852_v58, %v6852_v58  ;;  %5071 = vmatpush3.bf16.msra.mxu1 %v5406_v17 }
 0xb00   : > { %v2368_v12 = vpop.permute.xlu0 %2367 }
 0xb01   : > { %v6855_v7 = vsub.f32 %v6754_v28, %v2368_v12 }
 0xb03   : > { %v2413_v37 = vmul.f32 %v6855_v7, %v6855_v7 }
 0xb04   : > { %v2383_v36 = vpop.permute.xlu0 %2382 }
 0xb05   : > { %5048 = vmatprep.mubr.f32.mxu0 %v2413_v37  ;;  %v6862_v35 = vsub.f32 %v6803_v48, %v2383_v36 }
 0xb06   : > { %5049 = vmatmul.mubr.f32.vlgmr.msra.gmra.mxu0 %v2414_v40 }
 0xb07   : > { %v2416_v2 = vmul.f32 %v6862_v35, %v6862_v35 }
 0xb08   : > { %v2378_v34 = vpop.permute.xlu0 %2377 }
 0xb09   : > { %v6865_v6 = vsub.f32 %v6780_v14, %v2378_v34 }
 0xb0b   : > { %v2415_v28 = vmul.f32 %v6865_v6, %v6865_v6 }
 0xb0c   : > { %v2393_v54 = vpop.permute.xlu0 %2392 }
 0xb0d   : > { %5051 = vmatprep.mubr.f32.mxu0 %v2415_v28  ;;  %v6871_v57 = vsub.f32 %v2257_v24, %v2393_v54  ;;  %v5407_v28 = vld [vmem:[#allocation7 + $0x48] sm:$0xff]   ;;  %v5408_v54 = vld [vmem:[#allocation7 + $0x40] sm:$0xff]  }
 0xb0e   : > { %5052 = vmatmul.mubr.f32.gmra.mxu0 %v2416_v2  ;;  %5072 = vmatprep.subr.bf16.mxu1 %v5407_v28 }
 0xb0f   : > { %v2418_v14 = vmul.f32 %v6871_v57, %v6871_v57  ;;  %5073 = vmatpush3.bf16.msra.mxu1 %v5407_v28 }
 0xb10   : > { %v2388_v53 = vpop.permute.xlu0 %2387  ;;  %5074 = vmatprep.subr.bf16.mxu1 %v5408_v54 }
 0xb11   : > { %v6874_v61 = vsub.f32 %v6826_v33, %v2388_v53 }
 0xb13   : > { %v2417_v48 = vmul.f32 %v6874_v61, %v6874_v61  ;;  %5075 = vmatpush3.bf16.msra.mxu1 %v5408_v54 }
 0xb14   : > { %5108 = vmatprep.subr.mxu1 %v5753_v0 }
 0xb15   : > { %5054 = vmatprep.mubr.f32.mxu0 %v2417_v48 }
 0xb16   : > { %5055 = vmatmul.mubr.f32.gmra.mxu0 %v2418_v14  ;;  %v2398_v16 = vpop.permute.xlu0 %2397 }
 0xb17   : > { %v6880_v51 = vsub.f32 %v2258_v52, %v2398_v16  ;;  %v4411_v16 = vld [vmem:[%s7439_s7 + $0x1] ss:$0 sm:$0xff] }
 0xb19   : > { %v2419_v4 = vmul.f32 %v6880_v51, %v6880_v51 }
 0xb1a   : > { %v2403_v24 = vpop.permute.xlu0 %2402 }
 0xb1b   : > { %v6884_v23 = vsub.f32 %v2259_v32, %v2403_v24  ;;  %5057 = vmatprep.mubr.f32.mxu0 %v2419_v4 }
 0xb1d   : > { %v2420_v33 = vmul.f32 %v6884_v23, %v6884_v23 }
 0xb1f   : > { %5058 = vmatmul.mubr.f32.gmra.mxu0 %v2420_v33 }
 0xbc6   : > { %v5050_v27 = vpop.f32.mrf.mxu0 }
 0xbc7   : > { %v2493_v29 = vadd.f32 1e-06, %v5050_v27 }
 0xbc8   : > { %v2487_v8 = vpop.f32.mrf.mxu0 }
 0xbc9   : > { %5489 = vrsqrt.f32 %v2493_v29  ;;  %v2488_v52 = vadd.f32 1e-06, %v2487_v8 }
 0xbcb   : > { %5491 = vrsqrt.f32 %v2488_v52 }
 0xbce   : > { %v5053_v56 = vpop.f32.mrf.mxu0 }
 0xbcf   : > { %v2503_v31 = vadd.f32 1e-06, %v5053_v56 }
 0xbd0   : > { %v2497_v10 = vpop.f32.mrf.mxu0 }
 0xbd1   : > { %5493 = vrsqrt.f32 %v2503_v31  ;;  %v2498_v30 = vadd.f32 1e-06, %v2497_v10 }
 0xbd3   : > { %5495 = vrsqrt.f32 %v2498_v30 }
 0xbd6   : > { %v5490_v32 = vpop.eup %5489  ;;  %v5056_v59 = vpop.f32.mrf.mxu0 }
 0xbd7   : > { %2541 = vperm.xlu1 %5352, %v5490_v32   ;;  %v2513_v50 = vadd.f32 1e-06, %v5056_v59 }
 0xbd8   : > { %v5492_v49 = vpop.eup %5491  ;;  %v2507_v45 = vpop.f32.mrf.mxu0 }
 0xbd9   : > { %2536 = vperm.xlu0 %5351, %v5492_v49   ;;  %5497 = vrsqrt.f32 %v2513_v50  ;;  %v2508_v15 = vadd.f32 1e-06, %v2507_v45 }
 0xbdb   : > { %5499 = vrsqrt.f32 %v2508_v15 }
 0xbde   : > { %v5494_v1 = vpop.eup %5493 }
 0xbdf   : > { %2551 = vperm.xlu0 %5351, %v5494_v1   ;;  %v5059_v12 = vpop.f32.mrf.mxu0 }
 0xbe0   : > { %v5496_v37 = vpop.eup %5495  ;;  %v2523_v40 = vadd.f32 1e-06, %v5059_v12 }
 0xbe1   : > { %v2517_v36 = vpop.f32.mrf.mxu0 }
 0xbe2   : > { %5501 = vrsqrt.f32 %v2523_v40  ;;  %v2518_v34 = vadd.f32 1e-06, %v2517_v36 }
 0xbe3   : > { %2546 = vperm.xlu0 %5351, %v5496_v37  }
 0xbe4   : > { %5503 = vrsqrt.f32 %v2518_v34 }
 0xbe6   : > { %v5498_v2 = vpop.eup %5497 }
 0xbe7   : > { %2561 = vperm.xlu0 %5351, %v5498_v2  }
 0xbe8   : > { %v5500_v53 = vpop.eup %5499 }
 0xbeb   : > { %2556 = vperm.xlu0 %5351, %v5500_v53   ;;  %v5410_v53 = vld [vmem:[#allocation8 + $0x70] sm:$0xff]  }
 0xbef   : > { %v5502_v48 = vpop.eup %5501 }
 0xbf0   : > { %2571 = vperm.xlu0 %5351, %v5502_v48   ;;  %v5412_v48 = vld [vmem:[#allocation8 + $0x60] sm:$0xff]  }
 0xbf1   : > { %v5504_v14 = vpop.eup %5503 }
 0xbf2   : > { %2566 = vperm.xlu1 %5352, %v5504_v14   ;;  %v5414_v14 = vld [vmem:[#allocation8 + $0x50] sm:$0xff]  }
 0xc52   : > { %v2542_v4 = vpop.permute.xlu1 %2541 }
 0xc53   : > { %v2575_v24 = vmul.f32 %v2542_v4, %v6852_v58  ;;  %v5416_v4 = vld [vmem:[#allocation8 + $0x40] sm:$0xff]  }
 0xc54   : > { %v2537_v33 = vpop.permute.xlu0 %2536 }
 0xc55   : > { %v2591_v41 = vmul.f32 %v4411_v16, %v2575_v24  ;;  %v2574_v60 = vmul.f32 %v2537_v33, %v6855_v7  ;;  %v4415_v24 = vld [vmem:[%s7442_s10 + $0x1] ss:$0 sm:$0xff] }
 0xc57   : > { %v2590_v27 = vmul.f32 %v4411_v16, %v2574_v60  ;;  %v2607_v29 = vadd.f32 %v4413_v42, %v2591_v41 }
 0xc59   : > { %v2606_v8 = vadd.f32 %v4413_v42, %v2590_v27 }
 0xc5a   : > { %v2552_v52 = vpop.permute.xlu0 %2551 }
 0xc5b   : > { %v2577_v56 = vmul.f32 %v2552_v52, %v6862_v35  ;;  %v2614_v31 = vpack.c.bf16 %v2607_v29, %v2606_v8 }
 0xc5d   : > { %5076 = vmatprep.mubr.bf16.mxu1 %v2614_v31  ;;  %v2593_v30 = vmul.f32 %v4411_v16, %v2577_v56 }
 0xc5e   : > { %v2547_v10 = vpop.permute.xlu0 %2546 }
 0xc5f   : > { %v2576_v58 = vmul.f32 %v2547_v10, %v6865_v6  ;;  %v2609_v59 = vadd.f32 %v4413_v42, %v2593_v30 }
 0xc61   : > { %v2592_v32 = vmul.f32 %v4411_v16, %v2576_v58 }
 0xc62   : > { %v2562_v7 = vpop.permute.xlu0 %2561 }
 0xc63   : > { %v2608_v47 = vadd.f32 %v4413_v42, %v2592_v32  ;;  %v2579_v49 = vmul.f32 %v2562_v7, %v6871_v57 }
 0xc65   : > { %v2615_v50 = vpack.c.bf16 %v2609_v59, %v2608_v47  ;;  %v2595_v21 = vmul.f32 %v4411_v16, %v2579_v49 }
 0xc66   : > { %v2557_v45 = vpop.permute.xlu0 %2556 }
 0xc67   : > { %5077 = vmatmul.mubr.bf16.vlgmr.msra.gmra.mxu1 %v2615_v50  ;;  %v2578_v15 = vmul.f32 %v2557_v45, %v6874_v61  ;;  %v2611_v35 = vadd.f32 %v4413_v42, %v2595_v21  ;;  %v5409_v61 = vld [vmem:[#allocation8 + $0x78] sm:$0xff]  }
 0xc68   : > { %5084 = vmatprep.subr.bf16.mxu0 %v5409_v61 }
 0xc69   : > { %v2594_v1 = vmul.f32 %v4411_v16, %v2578_v15  ;;  %5085 = vmatpush3.bf16.msra.mxu0 %v5409_v61 }
 0xc6a   : > { %5086 = vmatprep.subr.bf16.mxu0 %v5410_v53 }
 0xc6b   : > { %v2610_v17 = vadd.f32 %v4413_v42, %v2594_v1  ;;  %v2572_v12 = vpop.permute.xlu0 %2571 }
 0xc6c   : > { %v2581_v37 = vmul.f32 %v2572_v12, %v6884_v23  ;;  %v5411_v23 = vld [vmem:[#allocation8 + $0x68] sm:$0xff]  }
 0xc6d   : > { %v2616_v40 = vpack.c.bf16 %v2611_v35, %v2610_v17  ;;  %v2567_v6 = vpop.permute.xlu1 %2566  ;;  %5087 = vmatpush3.bf16.msra.mxu0 %v5410_v53 }
 0xc6e   : > { %v2597_v36 = vmul.f32 %v4411_v16, %v2581_v37  ;;  %v2580_v34 = vmul.f32 %v2567_v6, %v6880_v51  ;;  %5088 = vmatprep.subr.bf16.mxu0 %v5411_v23  ;;  %v5413_v51 = vld [vmem:[#allocation8 + $0x58] sm:$0xff]  }
 0xc6f   : > { %5080 = vmatprep.mubr.bf16.mxu1 %v2616_v40 }
 0xc70   : > { %v2613_v28 = vadd.f32 %v4413_v42, %v2597_v36  ;;  %v2596_v57 = vmul.f32 %v4411_v16, %v2580_v34  ;;  %v5415_v16 = vld [vmem:[#allocation8 + $0x48] sm:$0xff]  }
 0xc71   : > { %5089 = vmatpush3.bf16.msra.mxu0 %v5411_v23 }
 0xc72   : > { %v2612_v2 = vadd.f32 %v4413_v42, %v2596_v57  ;;  %5090 = vmatprep.subr.bf16.mxu0 %v5412_v48 }
 0xc74   : > { %v2617_v54 = vpack.c.bf16 %v2613_v28, %v2612_v2 }
 0xc75   : > { %5091 = vmatpush3.bf16.msra.mxu0 %v5412_v48 }
 0xc76   : > { %5081 = vmatmul.mubr.bf16.gmra.mxu1 %v2617_v54  ;;  %5092 = vmatprep.subr.bf16.mxu0 %v5413_v51 }
 0xc77   : > { %5124 = vmatprep.mubr.msk.f32.mxu1 %vm5754_vm0, %v5753_v0 }
 0xc79   : > { %5093 = vmatpush3.bf16.msra.mxu0 %v5413_v51 }
 0xc7a   : > { %5094 = vmatprep.subr.bf16.mxu0 %v5414_v14 }
 0xc7d   : > { %5095 = vmatpush3.bf16.msra.mxu0 %v5414_v14 }
 0xc7e   : > { %5096 = vmatprep.subr.bf16.mxu0 %v5415_v16 }
 0xc81   : > { %5097 = vmatpush3.bf16.msra.mxu0 %v5415_v16 }
 0xc82   : > { %5098 = vmatprep.subr.bf16.mxu0 %v5416_v4 }
 0xc85   : > { %5099 = vmatpush3.bf16.msra.mxu0 %v5416_v4 }
 0xc86   : > { %5127 = vmatprep.subr.mxu0 %v5756_v63 }
 0xd27   : > { %v5078_v33 = vpop.f32.mrf.mxu1 }
 0xd28   : > { %v6909_v41 = vadd.f32 %v5078_v33, %v4415_v24 }
 0xd29   : > { %v2725_v60 = vpop.f32.mrf.mxu1 }
 0xd2a   : > { %v2766_v42 = vmul.f32 %v6909_v41, %v6909_v41  ;;  %v6913_v27 = vadd.f32 %v4415_v24, %v2725_v60 }
 0xd2b   : > { %v5079_v29 = vpop.f32.mrf.mxu1 }
 0xd2c   : > { %v2774_v8 = vmul.f32 %v2766_v42, %v6909_v41  ;;  %v2764_v52 = vmul.f32 %v6913_v27, %v6913_v27  ;;  %v2737_v56 = vadd.f32 %v5079_v29, %v4415_v24 }
 0xd2d   : > { %v2728_v31 = vpop.f32.mrf.mxu1 }
 0xd2e   : > { %v2782_v10 = vmul.f32 0.044715, %v2774_v8  ;;  %v2772_v30 = vmul.f32 %v2764_v52, %v6913_v27  ;;  %v2767_v58 = vmul.f32 %v2737_v56, %v2737_v56  ;;  %v2729_v32 = vadd.f32 %v4415_v24, %v2728_v31 }
 0xd30   : > { %v2790_v59 = vadd.f32 %v2782_v10, %v6909_v41  ;;  %v2780_v47 = vmul.f32 0.044715, %v2772_v30  ;;  %v2775_v7 = vmul.f32 %v2767_v58, %v2737_v56  ;;  %v2765_v49 = vmul.f32 %v2729_v32, %v2729_v32 }
 0xd32   : > { %v2798_v50 = vmul.f32 0.7978846, %v2790_v59  ;;  %v2788_v45 = vadd.f32 %v2780_v47, %v6913_v27  ;;  %v2783_v21 = vmul.f32 0.044715, %v2775_v7  ;;  %v2773_v15 = vmul.f32 %v2765_v49, %v2729_v32 }
 0xd34   : > { %v2796_v1 = vmul.f32 0.7978846, %v2788_v45  ;;  %v2791_v35 = vadd.f32 %v2783_v21, %v2737_v56  ;;  %v2781_v17 = vmul.f32 0.044715, %v2773_v15  ;;  %5505 = vtanh.f32 %v2798_v50 }
 0xd36   : > { %v2799_v12 = vmul.f32 0.7978846, %v2791_v35  ;;  %5507 = vtanh.f32 %v2796_v1  ;;  %v2789_v37 = vadd.f32 %v2781_v17, %v2729_v32  ;;  %v5082_v40 = vpop.f32.mrf.mxu1  ;;  %v2759_v1 = vmul.f32 0.5, %v2737_v56 }
 0xd37   : > { %v6921_v36 = vadd.f32 %v5082_v40, %v4415_v24  ;;  %v2756_v35 = vmul.f32 0.5, %v6913_v27  ;;  %v2758_v40 = vmul.f32 0.5, %v6909_v41 }
 0xd38   : > { %5509 = vtanh.f32 %v2799_v12  ;;  %v2797_v6 = vmul.f32 0.7978846, %v2789_v37  ;;  %v2741_v34 = vpop.f32.mrf.mxu1  ;;  %v2757_v12 = vmul.f32 0.5, %v2729_v32 }
 0xd39   : > { %v2770_v28 = vmul.f32 %v6921_v36, %v6921_v36  ;;  %v6925_v57 = vadd.f32 %v4415_v24, %v2741_v34 }
 0xd3a   : > { %5511 = vtanh.f32 %v2797_v6  ;;  %v5083_v2 = vpop.f32.mrf.mxu1 }
 0xd3b   : > { %v2778_v54 = vmul.f32 %v2770_v28, %v6921_v36  ;;  %v2768_v61 = vmul.f32 %v6925_v57, %v6925_v57  ;;  %v2753_v53 = vadd.f32 %v5083_v2, %v4415_v24 }
 0xd3c   : > { %v2744_v23 = vpop.f32.mrf.mxu1 }
 0xd3d   : > { %v2786_v48 = vmul.f32 0.044715, %v2778_v54  ;;  %v2776_v51 = vmul.f32 %v2768_v61, %v6925_v57  ;;  %v2771_v14 = vmul.f32 %v2753_v53, %v2753_v53  ;;  %v2745_v16 = vadd.f32 %v4415_v24, %v2744_v23 }
 0xd3f   : > { %v2794_v4 = vadd.f32 %v2786_v48, %v6921_v36  ;;  %v2784_v33 = vmul.f32 0.044715, %v2776_v51  ;;  %v2779_v60 = vmul.f32 %v2771_v14, %v2753_v53  ;;  %v2769_v42 = vmul.f32 %v2745_v16, %v2745_v16 }
 0xd40   : > { %v2763_v51 = vmul.f32 0.5, %v2753_v53 }
 0xd41   : > { %v5506_v29 = vpop.eup %5505  ;;  %v2792_v8 = vadd.f32 %v2784_v33, %v6925_v57  ;;  %v2787_v52 = vmul.f32 0.044715, %v2779_v60  ;;  %v2777_v31 = vmul.f32 %v2769_v42, %v2745_v16  ;;  %v2802_v30 = vmul.f32 0.7978846, %v2794_v4 }
 0xd42   : > { %v2814_v15 = vadd.f32 1.0, %v5506_v29  ;;  %v2760_v4 = vmul.f32 0.5, %v6925_v57  ;;  %v2761_v33 = vmul.f32 0.5, %v2745_v16  ;;  %v2762_v42 = vmul.f32 0.5, %v6921_v36 }
 0xd43   : > { %v5508_v10 = vpop.eup %5507  ;;  %v2800_v59 = vmul.f32 0.7978846, %v2792_v8  ;;  %v2795_v47 = vadd.f32 %v2787_v52, %v2753_v53  ;;  %v2785_v7 = vmul.f32 0.044715, %v2777_v31 }
 0xd44   : > { %v2812_v45 = vadd.f32 1.0, %v5508_v10  ;;  %v2822_v2 = vmul.f32 %v2814_v15, %v2758_v40 }
 0xd45   : > { %v5510_v58 = vpop.eup %5509  ;;  %5513 = vtanh.f32 %v2800_v59  ;;  %v2803_v50 = vmul.f32 0.7978846, %v2795_v47  ;;  %v2793_v24 = vadd.f32 %v2785_v7, %v2745_v16  ;;  %v4425_v59 = vld [vmem:[%s7444_s12 + $0x1] ss:$0 sm:$0xff] }
 0xd46   : > { %v2815_v49 = vadd.f32 1.0, %v5510_v58  ;;  %5515 = vtanh.f32 %v2802_v30  ;;  %v2820_v34 = vmul.f32 %v2812_v45, %v2756_v35 }
 0xd47   : > { %v5512_v21 = vpop.eup %5511  ;;  %5517 = vtanh.f32 %v2803_v50  ;;  %v2801_v17 = vmul.f32 0.7978846, %v2793_v24 }
 0xd48   : > { %v2813_v37 = vadd.f32 1.0, %v5512_v21  ;;  %v2823_v6 = vmul.f32 %v2815_v49, %v2759_v1 }
 0xd49   : > { %5519 = vtanh.f32 %v2801_v17 }
 0xd4a   : > { %v2821_v28 = vmul.f32 %v2813_v37, %v2757_v12  ;;  %v2829_v61 = vpack.c.bf16 %v2823_v6, %v2822_v2 }
 0xd4c   : > { %v2828_v54 = vpack.c.bf16 %v2821_v28, %v2820_v34 }
 0xd4e   : > { %5100 = vmatprep.mubr.bf16.mxu0 %v2828_v54 }
 0xd4f   : > { %5101 = vmatmul.mubr.bf16.vlgmr.msra.gmra.mxu0 %v2829_v61 }
 0xd50   : > { %5128 = vmatpush3.msra.mxu0 %v5756_v63 }
 0xd51   : > { %5129 = vmatprep.subr.mxu0 %v5756_v63 }
 0xd52   : > { %5130 = vmatpush3.msra.mxu0 %v5756_v63  ;;  %v5514_v27 = vpop.eup %5513 }
 0xd53   : > { %5131 = vmatprep.subr.mxu0 %v5756_v63  ;;  %v5516_v56 = vpop.eup %5515  ;;  %v2816_v32 = vadd.f32 1.0, %v5514_v27  ;;  %v5417_v27 = vld [vmem:[#allocation5 + $0x178] sm:$0xff]  }
 0xd54   : > { %5132 = vmatpush3.msra.mxu0 %v5756_v63  ;;  %v5518_v41 = vpop.eup %5517  ;;  %v2818_v14 = vadd.f32 1.0, %v5516_v56 }
 0xd55   : > { %5133 = vmatprep.subr.mxu0 %v5756_v63  ;;  %v2819_v23 = vadd.f32 1.0, %v5518_v41  ;;  %v2824_v8 = vmul.f32 %v2816_v32, %v2760_v4  ;;  %v5418_v41 = vld [vmem:[#allocation5 + $0x138] sm:$0xff]   ;;  %v5419_v32 = vld [vmem:[#allocation5 + $0x170] sm:$0xff]  }
 0xd56   : > { %5134 = vmatpush3.msra.mxu0 %v5756_v63  ;;  %v5520_v48 = vpop.eup %5519  ;;  %v2826_v31 = vmul.f32 %v2818_v14, %v2762_v42  ;;  %v5421_v14 = vld [vmem:[#allocation5 + $0x168] sm:$0xff]   ;;  %v5423_v42 = vld [vmem:[#allocation5 + $0x160] sm:$0xff]  }
 0xd57   : > { %5135 = vmatprep.subr.mxu0 %v5756_v63  ;;  %v2817_v60 = vadd.f32 1.0, %v5520_v48  ;;  %v2827_v29 = vmul.f32 %v2819_v23, %v2763_v51  ;;  %v5420_v51 = vld [vmem:[#allocation5 + $0x130] sm:$0xff]  }
 0xd58   : > { %5136 = vmatpush3.msra.mxu0 %v5756_v63 }
 0xd59   : > { %5137 = vmatprep.subr.mxu0 %v5756_v63  ;;  %v2825_v52 = vmul.f32 %v2817_v60, %v2761_v33  ;;  %v2831_v57 = vpack.c.bf16 %v2827_v29, %v2826_v31  ;;  %v5422_v60 = vld [vmem:[#allocation5 + $0x128] sm:$0xff]   ;;  %v5425_v29 = vld [vmem:[#allocation5 + $0x158] sm:$0xff]  }
 0xd5a   : > { %5138 = vmatpush3.msra.mxu0 %v5756_v63  ;;  %v5429_v31 = vld [vmem:[#allocation5 + $0x148] sm:$0xff]  }
 0xd5b   : > { %5139 = vmatprep.subr.mxu0 %v5756_v63  ;;  %v2830_v53 = vpack.c.bf16 %v2825_v52, %v2824_v8  ;;  %v5426_v8 = vld [vmem:[#allocation5 + $0x118] sm:$0xff]   ;;  %v5428_v52 = vld [vmem:[#allocation5 + $0x110] sm:$0xff]  }
 0xd5c   : > { %5140 = vmatpush3.msra.mxu0 %v5756_v63 }
 0xd5d   : > { %5141 = vmatprep.subr.mxu0 %v5756_v63  ;;  %5104 = vmatprep.mubr.bf16.mxu0 %v2830_v53  ;;  %v5430_v53 = vld [vmem:[#allocation5 + $0x108] sm:$0xff]  }
 0xd5e   : > { %5142 = vmatpush3.msra.mxu0 %v5756_v63 }
 0xd5f   : > { %5105 = vmatmul.mubr.bf16.gmra.mxu0 %v2831_v57  ;;  %5143 = vmatprep.subr.mxu0 %v5756_v63  ;;  %v5431_v57 = vld [vmem:[#allocation5 + $0x140] sm:$0xff]  }
 0xd60   : > { %5144 = vmatpush3.msra.mxu0 %v5756_v63 }
 0xd61   : > { %5145 = vmatprep.subr.mxu0 %v5756_v63 }
 0xd62   : > { %5146 = vmatpush3.msra.mxu0 %v5756_v63 }
 0xd63   : > { %5147 = vmatprep.subr.mxu0 %v5756_v63 }
 0xd64   : > { %5148 = vmatpush3.msra.mxu0 %v5756_v63 }
 0xd65   : > { %5149 = vmatprep.subr.mxu0 %v5756_v63 }
 0xd66   : > { %5150 = vmatpush3.msra.mxu0 %v5756_v63 }
 0xd67   : > { %5151 = vmatprep.subr.mxu0 %v5756_v63 }
 0xd68   : > { %5152 = vmatpush3.msra.mxu0 %v5756_v63 }
 0xd69   : > { %5153 = vmatprep.subr.mxu0 %v5756_v63 }
 0xd6a   : > { %5154 = vmatpush3.msra.mxu0 %v5756_v63 }
 0xd6b   : > { %5155 = vmatprep.subr.mxu0 %v5756_v63 }
 0xd6c   : > { %5156 = vmatpush3.msra.mxu0 %v5756_v63 }
 0xd6d   : > { %5157 = vmatprep.subr.mxu0 %v5756_v63 }
 0xd6e   : > { %5158 = vmatpush3.msra.mxu0 %v5756_v63 }
 0xe0f   : > { %v5102_v36 = vpop.f32.mrf.mxu0 }
 0xe10   : > { %v2948_v24 = vadd.f32 %v5102_v36, %v4425_v59  ;;  %v5432_v36 = vld [vmem:[#allocation5 + $0x100] sm:$0xff]  }
 0xe11   : > { %v2939_v16 = vpop.f32.mrf.mxu0 }
 0xe12   : > { %v2940_v21 = vadd.f32 %v4425_v59, %v2939_v16  ;;  %v6984_v34 = vadd.f32 %v2948_v24, %v6533_v46 }
 0xe13   : > { %v5103_v10 = vpop.f32.mrf.mxu0 }
 0xe14   : > { %v2951_v47 = vadd.f32 %v5103_v10, %v4425_v59  ;;  %v6987_v28 = vadd.f32 %v2940_v21, %v6536_v55 }
 0xe15   : > { %v2942_v30 = vpop.f32.mrf.mxu0 }
 0xe16   : > { %v2943_v15 = vadd.f32 %v4425_v59, %v2942_v30  ;;  %v6972_v35 = vadd.f32 %v2951_v47, %v6521_v3 }
 0xe18   : > { %v6990_v3 = vadd.f32 %v2943_v15, %v6539_v5 }
 0xe1f   : > { %v5106_v58 = vpop.f32.mrf.mxu0 }
 0xe20   : > { %v2964_v49 = vadd.f32 %v5106_v58, %v4425_v59 }
 0xe21   : > { %v2955_v7 = vpop.f32.mrf.mxu0 }
 0xe22   : > { %v2956_v50 = vadd.f32 %v4425_v59, %v2955_v7  ;;  %v6975_v12 = vadd.f32 %v2964_v49, %v6524_v9 }
 0xe23   : > { %v5107_v45 = vpop.f32.mrf.mxu0 }
 0xe24   : > { %v2967_v1 = vadd.f32 %v5107_v45, %v4425_v59  ;;  %v6978_v37 = vadd.f32 %v2956_v50, %v6527_v62  ;;  %v3050_v46 = vmax.f32 %v6984_v34, %v6975_v12 }
 0xe25   : > { %v2958_v17 = vpop.f32.mrf.mxu0 }
 0xe26   : > { %v6981_v40 = vadd.f32 %v2967_v1, %v6530_v11  ;;  %v2959_v6 = vadd.f32 %v4425_v59, %v2958_v17  ;;  %v3048_v62 = vmax.f32 %v6987_v28, %v6978_v37  ;;  %v4435_v59 = vld [vmem:[%s7434_s2 + $0x2] sm:$0x1] }
 0xe28   : > { %v6993_v2 = vadd.f32 %v2959_v6, %v6542_v20  ;;  %5109 = vmatpush3.msra.mxu1 %v6981_v40  ;;  %v3051_v9 = vmax.f32 %v6972_v35, %v6981_v40 }
 0xe29   : > { %5110 = vmatprep.subr.mxu1 %v5753_v0 }
 0xe2a   : > { %5111 = vmatpush3.msra.mxu1 %v6975_v12  ;;  %v3049_v11 = vmax.f32 %v6990_v3, %v6993_v2  ;;  %v3053_v5 = vmax.f32 %v3050_v46, %v3051_v9 }
 0xe2b   : > { %5112 = vmatprep.subr.mxu1 %v5753_v0 }
 0xe2c   : > { %5113 = vmatpush3.msra.mxu1 %v6993_v2  ;;  %v3052_v55 = vmax.f32 %v3048_v62, %v3049_v11  ;;  %v4452_v11 = vld [vmem:[%s7436_s4 + $0x2] sm:$0x1] }
 0xe2d   : > { %5114 = vmatprep.subr.mxu1 %v5753_v0 }
 0xe2e   : > { %5115 = vmatpush3.msra.mxu1 %v6978_v37  ;;  %v3054_v20 = vmax.f32 %v3052_v55, %v3053_v5 }
 0xe2f   : > { %5116 = vmatprep.subr.mxu1 %v5753_v0 }
 0xe30   : > { %5117 = vmatpush3.msra.mxu1 %v6972_v35  ;;  %v3055_v54 = vrot.slane %v3054_v20, 4 }
 0xe31   : > { %5118 = vmatprep.subr.mxu1 %v5753_v0 }
 0xe32   : > { %5119 = vmatpush3.msra.mxu1 %v6984_v34  ;;  %v3056_v61 = vmax.f32 %v3054_v20, %v3055_v54 }
 0xe33   : > { %5120 = vmatprep.subr.mxu1 %v5753_v0 }
 0xe34   : > { %5121 = vmatpush3.msra.mxu1 %v6990_v3  ;;  %v3057_v56 = vrot.slane %v3056_v61, 2 }
 0xe35   : > { %5122 = vmatprep.subr.mxu1 %v5753_v0  ;;  %v5424_v0 = vld [vmem:[#allocation5 + $0x120] sm:$0xff]  }
 0xe36   : > { %5123 = vmatpush3.msra.mxu1 %v6987_v28  ;;  %v3058_v23 = vmax.f32 %v3056_v61, %v3057_v56 }
 0xe37   : > { %5125 = vmatmul.mubr.msk.f32.vlgmr.msra.gmra.mxu1 %vm516_vm1, %v5755_v18  ;;  %4704 = vmatprep.subr.bf16.mxu1 %v5417_v27  ;;  %v5427_v18 = vld [vmem:[#allocation5 + $0x150] sm:$0xff]  }
 0xe38   : > { %v3059_v48 = vrot.slane %v3058_v23, 1  ;;  %4705 = vmatpush3.bf16.msra.mxu1 %v5418_v41  ;;  %v4453_v41 = vld [vmem:[%s7437_s5 + $0x2] sm:$0x1] }
 0xe39   : > { %4706 = vmatprep.subr.bf16.mxu1 %v5419_v32 }
 0xe3a   : > { %v3060_v4 = vmax.f32 %v3058_v23, %v3059_v48  ;;  %v3281_v48 = vrot.slane %v6984_v34, 7 }
 0xe3c   : > { %v3062_v33 = vpack.c.bf16 %v3060_v4, %v3060_v4  ;;  %4707 = vmatpush3.bf16.msra.mxu1 %v5420_v51  ;;  %v4454_v51 = vld [vmem:[%s7435_s3 + $0x20] sm:$0xff]  ;;  %v3417_v4 = vrot.slane %v6984_v34, 1 }
 0xe3d   : > { %4708 = vmatprep.subr.bf16.mxu1 %v5421_v14  ;;  %v3279_v14 = vrot.slane %v6987_v28, 7 }
 0xe3e   : > { %3226 = vmatprep.mubr.bf16.mxu1 %v3062_v33 }
 0xe40   : > { %4709 = vmatpush3.bf16.msra.mxu1 %v5422_v60  ;;  %v3415_v60 = vrot.slane %v6987_v28, 1 }
 0xe41   : > { %4710 = vmatprep.subr.bf16.mxu1 %v5423_v42  ;;  %v3282_v42 = vrot.slane %v6972_v35, 7 }
 0xe44   : > { %4711 = vmatpush3.bf16.msra.mxu1 %v5424_v0  ;;  %v3418_v0 = vrot.slane %v6972_v35, 1 }
 0xe45   : > { %4712 = vmatprep.subr.bf16.mxu1 %v5425_v29  ;;  %v4457_v29 = vld [vmem:[%s7438_s6 + $0x2] ss:$0 sm:$0xff] }
 0xe48   : > { %4713 = vmatpush3.bf16.msra.mxu1 %v5426_v8  ;;  %v3280_v8 = vrot.slane %v6990_v3, 7 }
 0xe49   : > { %4714 = vmatprep.subr.bf16.mxu1 %v5427_v18  ;;  %v3416_v18 = vrot.slane %v6990_v3, 1 }
 0xe4c   : > { %4715 = vmatpush3.bf16.msra.mxu1 %v5428_v52  ;;  %v4455_v52 = vld [vmem:[%s7435_s3 + $0x28] sm:$0x1] }
 0xe4d   : > { %4716 = vmatprep.subr.bf16.mxu1 %v5429_v31 }
 0xe50   : > { %4717 = vmatpush3.bf16.msra.mxu1 %v5430_v53  ;;  %v3289_v53 = vsel %vm514_vm3, %v3281_v48, 0.0 }
 0xe51   : > { %4718 = vmatprep.subr.bf16.mxu1 %v5431_v57  ;;  %v3287_v57 = vsel %vm514_vm3, %v3279_v14, 0.0 }
 0xe54   : > { %4719 = vmatpush3.bf16.msra.mxu1 %v5432_v36  ;;  %v7086_v36 = vsel %vm515_vm4, %v3417_v4, 0.0 }
 0xe55   : > { %5171 = vmatprep.subr.mxu1 %v5756_v63 }
 0xef7   : > { %v3044_v16 = vpop.f32.mrf.mxu1 }
 0xef8   : > { %v3061_v10 = vpack.c.bf16 %v3044_v16, %v3044_v16  ;;  %v3283_v16 = vrot.slane %v6978_v37, 7 }
 0xef9   : > { %v5126_v30 = vpop.f32.mrf.mxu1 }
 0xefa   : > { %3227 = vmatmul.mubr.bf16.vlgmr.msra.gmra.mxu1 %v3061_v10  ;;  %v3285_v10 = vrot.slane %v6975_v12, 7 }
 0xefb   : > { %5172 = vmatpush3.msra.mxu1 %v5756_v63 }
 0xefc   : > { %5173 = vmatprep.subr.mxu1 %v5756_v63 }
 0xefd   : > { %5174 = vmatpush3.msra.mxu1 %v5756_v63 }
 0xefe   : > { %5175 = vmatprep.subr.mxu1 %v5756_v63 }
 0xeff   : > { %5176 = vmatpush3.msra.mxu1 %v5756_v63 }
 0xf00   : > { %5177 = vmatprep.subr.mxu1 %v5756_v63 }
 0xf01   : > { %5178 = vmatpush3.msra.mxu1 %v5756_v63 }
 0xf02   : > { %5179 = vmatprep.subr.mxu1 %v5756_v63 }
 0xf03   : > { %5180 = vmatpush3.msra.mxu1 %v5756_v63 }
 0xf04   : > { %5181 = vmatprep.subr.mxu1 %v5756_v63 }
 0xf05   : > { %5182 = vmatpush3.msra.mxu1 %v5756_v63 }
 0xf06   : > { %5183 = vmatprep.subr.mxu1 %v5756_v63 }
 0xf07   : > { %5184 = vmatpush3.msra.mxu1 %v5756_v63 }
 0xf08   : > { %5185 = vmatprep.subr.mxu1 %v5756_v63 }
 0xf09   : > { %5186 = vmatpush3.msra.mxu1 %v5756_v63 }
 0xf0a   : > { %5187 = vmatprep.subr.mxu1 %v5756_v63 }
 0xf0b   : > { %5188 = vmatpush3.msra.mxu1 %v5756_v63 }
 0xf0c   : > { %5189 = vmatprep.subr.mxu1 %v5756_v63 }
 0xf0d   : > { %5190 = vmatpush3.msra.mxu1 %v5756_v63 }
 0xf0e   : > { %5191 = vmatprep.subr.mxu1 %v5756_v63 }
 0xf0f   : > { %5192 = vmatpush3.msra.mxu1 %v5756_v63 }
 0xf10   : > { %5193 = vmatprep.subr.mxu1 %v5756_v63 }
 0xf11   : > { %5194 = vmatpush3.msra.mxu1 %v5756_v63 }
 0xf12   : > { %5195 = vmatprep.subr.mxu1 %v5756_v63 }
 0xf13   : > { %5196 = vmatpush3.msra.mxu1 %v5756_v63 }
 0xf14   : > { %5197 = vmatprep.subr.mxu1 %v5756_v63 }
 0xf15   : > { %5198 = vmatpush3.msra.mxu1 %v5756_v63 }
 0xf16   : > { %5199 = vmatprep.subr.mxu1 %v5756_v63 }
 0xf17   : > { %5200 = vmatpush3.msra.mxu1 %v5756_v63 }
 0xf18   : > { %5201 = vmatprep.subr.mxu1 %v5756_v63 }
 0xf19   : > { %5202 = vmatpush3.msra.mxu1 %v5756_v63 }
 0xfba   : > { %v4720_v58 = vpop.f32.mrf.mxu1 }
 0xfbc   : > { %v4721_v47 = vpop.f32.mrf.mxu1 }
 0xfbd   : > { %v4722_v7 = vadd.f32 %v4721_v47, %v4720_v58  ;;  %v3423_v58 = vsel %vm515_vm4, %v3415_v60, 0.0  ;;  %v7098_v47 = vsel %vm515_vm4, %v3418_v0, 0.0 }
 0xfbe   : > { %v4723_v49 = vpop.f32.mrf.mxu1 }
 0xfbf   : > { %v3229_v50 = vadd.f32 %v4722_v7, %v4435_v59  ;;  %v7094_v59 = vsel %vm514_vm3, %v3282_v42, 0.0  ;;  %v3288_v49 = vsel %vm514_vm3, %v3280_v8, 0.0 }
 0xfc0   : > { %v4724_v24 = vpop.f32.mrf.mxu1 }
 0xfc1   : > { %v3235_v45 = vmul.f32 %v3229_v50, %v3229_v50  ;;  %v3234_v9 = vmul.f32 0.5, %v3229_v50  ;;  %v3419_v24 = vrot.slane %v6978_v37, 1 }
 0xfc3   : > { %v3236_v21 = vmul.f32 %v3235_v45, %v3229_v50 }
 0xfc5   : > { %v3237_v15 = vmul.f32 0.044715, %v3236_v21 }
 0xfc7   : > { %v3238_v1 = vadd.f32 %v3237_v15, %v3229_v50  ;;  %v7104_v50 = vsel %vm515_vm4, %v3416_v18, 0.0 }
 0xfc9   : > { %v3239_v17 = vmul.f32 0.7978846, %v3238_v1  ;;  %v3421_v1 = vrot.slane %v6975_v12, 1 }
 0xfcb   : > { %5521 = vtanh.f32 %v3239_v17 }
 0xfd8   : > { %v5522_v6 = vpop.eup %5521 }
 0xfd9   : > { %v3241_v62 = vadd.f32 1.0, %v5522_v6  ;;  %v7122_v6 = vsel %vm514_vm3, %v3283_v16, 0.0 }
 0xfdb   : > { %v3242_v63 = vmul.f32 %v3241_v62, %v3234_v9  ;;  %v3284_v9 = vrot.slane %v6993_v2, 7  ;;  %v7127_v62 = vsel %vm514_vm3, %v3285_v10, 0.0 }
 0xfdd   : > { %v3243_v46 = vand.u32 2147483647, %v3242_v63 }
 0xfdf   : > { %v3246_v55 = vmul.f32 %v4452_v11, %v3243_v46 }
 0xfe1   : > { %v3247_v5 = vsel %vm786_vm2, %v3246_v55, 0.0 }
 0xfe2   : > { %3248 = vadd.xlane.f32.xlu1 %v3247_v5  ;;  %v3286_v5 = vrot.slane %v6981_v40, 7 }
0x106b   : > { %v3249_v20 = vpop.xlane.xlu1 %3248 }
0x106c   : > { %v3250_v54 = vmul.f32 0.0078125, %v3249_v20 }
0x106e   : > { %v3251_v61 = vadd.f32 1e-06, %v3250_v54 }
0x1070   : > { %5523 = vrcp.f32 %v3251_v61 }
0x107d   : > { %v5524_v27 = vpop.eup %5523 }
0x107e   : > { %v3253_v56 = vmul.f32 %v5524_v27, %v3246_v55  ;;  %v7138_v55 = vsel %vm515_vm4, %v3419_v24, 0.0 }
0x1080   : > { %v3256_v32 = vmul.f32 %v3253_v56, %v3242_v63 }
0x1082   : > { %v3257_v23 = vmul.f32 %v4453_v41, %v3256_v32  ;;  %v3420_v32 = vrot.slane %v6993_v2, 1 }
0x1084   : > { %v3265_v33 = vrot.slane %v3257_v23, %v6122_v19 }
0x1086   : > { %v3267_v31 = vmul.f32 %v4454_v51, %v3265_v33  ;;  %v3268_v7 = vmul.f32 %v4455_v52, %v3265_v33 }
0x1088   : > { %v3277_v30 = vadd.f32 %v4457_v29, %v3267_v31 }
0x108a   : > { %v7108_v45 = vrot.slane %v3277_v30, %v6122_v19  ;;  %v7111_v21 = vrot.slane %v3277_v30, %v6128_v22  ;;  %v7114_v15 = vrot.slane %v3277_v30, %v6132_v25  ;;  %v7118_v17 = vrot.slane %v3277_v30, %v6135_v26 }
0x108b   : > { %v3278_v26 = vadd.f32 %v4457_v29, %v3268_v7  ;;  %v7134_v46 = vrot.slane %v3277_v30, %v6157_v38  ;;  %v7144_v56 = vrot.slane %v3277_v30, %v6160_v39  ;;  %v7147_v41 = vrot.slane %v3277_v30, %v6166_v43 }
0x108c   : > { %v3299_v22 = vmul.f32 0.0, %v7108_v45  ;;  %v3300_v25 = vmul.f32 %v7108_v45, %v3287_v57  ;;  %v3319_v63 = vmul.f32 %v7111_v21, %v3287_v57  ;;  %v3320_v11 = vmul.f32 %v7111_v21, %v3288_v49 }
0x108d   : > { %v3339_v61 = vmul.f32 %v7114_v15, %v3288_v49  ;;  %v3340_v27 = vmul.f32 %v7114_v15, %v3289_v53  ;;  %v7151_v38 = vsel %vm514_vm3, %v3284_v9, 0.0  ;;  %v3359_v51 = vmul.f32 0.0, %v7118_v17 }
0x108e   : > { %v3327_v20 = vadd.f32 %v3319_v63, %v3299_v22  ;;  %v3328_v54 = vadd.f32 %v3320_v11, %v3300_v25  ;;  %v3360_v14 = vmul.f32 %v7118_v17, %v6987_v28  ;;  %v7158_v4 = vrot.slane %v3278_v26, %v6122_v19 }
0x108f   : > { %v3379_v39 = vmul.f32 %v7134_v46, %v6987_v28  ;;  %v3301_v43 = vmul.f32 %v7108_v45, %v3288_v49  ;;  %v3321_v33 = vmul.f32 %v7111_v21, %v3289_v53  ;;  %v3380_v0 = vmul.f32 %v7134_v46, %v6990_v3 }
0x1090   : > { %v3347_v23 = vadd.f32 %v3339_v61, %v3327_v20  ;;  %v3348_v48 = vadd.f32 %v3340_v27, %v3328_v54  ;;  %v7167_v29 = vrot.slane %v3277_v30, %v6169_v44  ;;  %v3399_v8 = vmul.f32 %v7144_v56, %v6990_v3 }
0x1091   : > { %v3400_v19 = vmul.f32 %v7144_v56, %v6984_v34  ;;  %v3329_v18 = vadd.f32 %v3321_v33, %v3301_v43  ;;  %v3341_v52 = vmul.f32 %v7114_v15, %v7094_v59  ;;  %v3435_v16 = vmul.f32 0.0, %v7147_v41 }
0x1092   : > { %v3367_v60 = vadd.f32 %v3359_v51, %v3347_v23  ;;  %v3368_v42 = vadd.f32 %v3360_v14, %v3348_v48  ;;  %v3436_v10 = vmul.f32 %v7147_v41, %v3423_v58  ;;  %v3361_v44 = vmul.f32 %v7118_v17, %v6990_v3 }
0x1093   : > { %v3349_v7 = vadd.f32 %v3341_v52, %v3329_v18  ;;  %v3302_v30 = vmul.f32 %v7108_v45, %v3289_v53  ;;  %v3322_v49 = vmul.f32 %v7111_v21, %v7094_v59  ;;  %v3455_v22 = vmul.f32 %v7167_v29, %v3423_v58 }
0x1094   : > { %v3387_v31 = vadd.f32 %v3379_v39, %v3367_v60  ;;  %v3388_v57 = vadd.f32 %v3380_v0, %v3368_v42  ;;  %v3475_v25 = vmul.f32 %v7158_v4, %v7104_v50  ;;  %v3381_v11 = vmul.f32 %v7134_v46, %v6984_v34 }
0x1095   : > { %v3369_v63 = vadd.f32 %v3361_v44, %v3349_v7  ;;  %v3330_v26 = vadd.f32 %v3322_v49, %v3302_v30  ;;  %v3342_v20 = vmul.f32 %v7114_v15, %v7122_v6  ;;  %v3456_v61 = vmul.f32 %v7167_v29, %v7104_v50 }
0x1096   : > { %v3407_v24 = vadd.f32 %v3399_v8, %v3387_v31  ;;  %v3408_v9 = vadd.f32 %v3400_v19, %v3388_v57  ;;  %v3401_v27 = vmul.f32 %v7144_v56, %v6972_v35  ;;  %v3362_v48 = vmul.f32 %v7118_v17, %v6984_v34 }
0x1097   : > { %v3389_v58 = vadd.f32 %v3381_v11, %v3369_v63  ;;  %v3350_v23 = vadd.f32 %v3342_v20, %v3330_v26  ;;  %v3303_v51 = vmul.f32 %v7108_v45, %v7094_v59  ;;  %v3476_v43 = vmul.f32 %v7158_v4, %v7086_v36 }
0x1098   : > { %v3443_v54 = vadd.f32 %v3435_v16, %v3407_v24  ;;  %v3444_v53 = vadd.f32 %v3436_v10, %v3408_v9  ;;  %v3323_v33 = vmul.f32 %v7111_v21, %v7122_v6  ;;  %v3437_v42 = vmul.f32 %v7147_v41, %v7104_v50 }
0x1099   : > { %v3409_v60 = vadd.f32 %v3401_v27, %v3389_v58  ;;  %v3370_v0 = vadd.f32 %v3362_v48, %v3350_v23  ;;  %v3382_v8 = vmul.f32 %v7134_v46, %v6972_v35  ;;  %v3343_v52 = vmul.f32 %v7114_v15, %v7151_v38 }
0x109a   : > { %v3463_v14 = vadd.f32 %v3455_v22, %v3443_v54  ;;  %v3464_v39 = vadd.f32 %v3456_v61, %v3444_v53  ;;  %v3331_v59 = vadd.f32 %v3323_v33, %v3303_v51  ;;  %v3457_v57 = vmul.f32 %v7167_v29, %v7086_v36 }
0x109b   : > { %v3445_v31 = vadd.f32 %v3437_v42, %v3409_v60  ;;  %v3390_v16 = vadd.f32 %v3382_v8, %v3370_v0  ;;  %v3402_v50 = vmul.f32 %v7144_v56, %v6978_v37  ;;  %v3363_v7 = vmul.f32 %v7118_v17, %v6972_v35 }
0x109c   : > { %v7205_v19 = vadd.f32 %v3475_v25, %v3463_v14  ;;  %v7207_v18 = vadd.f32 %v3476_v43, %v3464_v39  ;;  %v3351_v10 = vadd.f32 %v3343_v52, %v3331_v59  ;;  %v3304_v44 = vmul.f32 %v7108_v45, %v7122_v6 }
0x109d   : > { %v3324_v30 = vmul.f32 %v7111_v21, %v7151_v38  ;;  %v3465_v49 = vadd.f32 %v3457_v57, %v3445_v31  ;;  %v3477_v24 = vmul.f32 %v7158_v4, %v7098_v47  ;;  %v3410_v9 = vadd.f32 %v3402_v50, %v3390_v16 }
0x109e   : > { %5159 = vmatprep.mubr.f32.mxu0 %v7205_v19  ;;  %v3438_v22 = vmul.f32 %v7147_v41, %v7086_v36  ;;  %v3371_v25 = vadd.f32 %v3363_v7, %v3351_v10  ;;  %v3383_v63 = vmul.f32 %v7134_v46, %v6978_v37  ;;  %v3344_v6 = vmul.f32 %v7114_v15, %v7127_v62 }
0x109f   : > { %5160 = vmatmul.mubr.f32.vlgmr.msra.gmra.mxu0 %v7207_v18  ;;  %v3332_v11 = vadd.f32 %v3324_v30, %v3304_v44  ;;  %v7231_v26 = vadd.f32 %v3477_v24, %v3465_v49  ;;  %v3458_v54 = vmul.f32 %v7167_v29, %v7098_v47  ;;  %v3403_v53 = vmul.f32 %v7144_v56, %v6993_v2 }
0x10a0   : > { %v3446_v20 = vadd.f32 %v3438_v22, %v3410_v9  ;;  %v3391_v61 = vadd.f32 %v3383_v63, %v3371_v25  ;;  %v3364_v36 = vmul.f32 %v7118_v17, %v6978_v37  ;;  %v3305_v58 = vmul.f32 %v7108_v45, %v7151_v38 }
0x10a1   : > { %v3352_v27 = vadd.f32 %v3344_v6, %v3332_v11  ;;  %5162 = vmatprep.mubr.f32.mxu0 %v7231_v26  ;;  %v3478_v48 = vmul.f32 %v7158_v4, %v7138_v55  ;;  %v3294_v51 = vsel %vm514_vm3, %v3286_v5, 0.0  ;;  %v3325_v14 = vmul.f32 %v7111_v21, %v7127_v62 }
0x10a2   : > { %v3466_v23 = vadd.f32 %v3458_v54, %v3446_v20  ;;  %v3411_v39 = vadd.f32 %v3403_v53, %v3391_v61  ;;  %v3439_v43 = vmul.f32 %v7147_v41, %v7098_v47  ;;  %v3384_v38 = vmul.f32 %v7134_v46, %v6993_v2 }
0x10a3   : > { %v3372_v33 = vadd.f32 %v3364_v36, %v3352_v27  ;;  %v3459_v42 = vmul.f32 %v7167_v29, %v7138_v55  ;;  %v3333_v0 = vadd.f32 %v3325_v14, %v3305_v58  ;;  %v3345_v8 = vmul.f32 %v7114_v15, %v3294_v51 }
0x10a4   : > { %v7254_v60 = vadd.f32 %v3478_v48, %v3466_v23  ;;  %v3447_v5 = vadd.f32 %v3439_v43, %v3411_v39  ;;  %v3404_v52 = vmul.f32 %v7144_v56, %v6975_v12  ;;  %v3306_v47 = vmul.f32 %v7108_v45, %v7127_v62 }
0x10a5   : > { %v3392_v59 = vadd.f32 %v3384_v38, %v3372_v33  ;;  %v3428_v31 = vsel %vm515_vm4, %v3420_v32, 0.0  ;;  %v3353_v57 = vadd.f32 %v3345_v8, %v3333_v0  ;;  %v3365_v16 = vmul.f32 %v7118_v17, %v6993_v2 }
0x10a6   : > { %5163 = vmatmul.mubr.f32.gmra.mxu0 %v7254_v60  ;;  %v3326_v50 = vmul.f32 %v7111_v21, %v3294_v51  ;;  %v3467_v10 = vadd.f32 %v3459_v42, %v3447_v5  ;;  %v3479_v7 = vmul.f32 %v7158_v4, %v3428_v31  ;;  %v3440_v45 = vmul.f32 %v7147_v41, %v7138_v55 }
0x10a7   : > { %v3412_v44 = vadd.f32 %v3404_v52, %v3392_v59  ;;  %v3373_v62 = vadd.f32 %v3365_v16, %v3353_v57  ;;  %v3385_v30 = vmul.f32 %v7134_v46, %v6975_v12  ;;  %v3346_v32 = vmul.f32 0.0, %v7114_v15 }
0x10a8   : > { %v3334_v49 = vadd.f32 %v3326_v50, %v3306_v47  ;;  %v7277_v24 = vadd.f32 %v3479_v7, %v3467_v10  ;;  %v3429_v21 = vsel %vm515_vm4, %v3421_v1, 0.0  ;;  %v3460_v22 = vmul.f32 %v7167_v29, %v3428_v31 }
0x10a9   : > { %v3448_v9 = vadd.f32 %v3440_v45, %v3412_v44  ;;  %v3393_v25 = vadd.f32 %v3385_v30, %v3373_v62  ;;  %v3405_v55 = vmul.f32 %v7144_v56, %v6981_v40  ;;  %v3366_v11 = vmul.f32 %v7118_v17, %v6975_v12 }
0x10aa   : > { %v3354_v63 = vadd.f32 %v3346_v32, %v3334_v49  ;;  %5165 = vmatprep.mubr.f32.mxu0 %v7277_v24  ;;  %v3480_v6 = vmul.f32 %v7158_v4, %v3429_v21  ;;  %v3422_v20 = vrot.slane %v6981_v40, 1  ;;  %v3441_v1 = vmul.f32 %v7147_v41, %v3428_v31 }
0x10ab   : > { %v3468_v15 = vadd.f32 %v3460_v22, %v3448_v9  ;;  %v3413_v54 = vadd.f32 %v3405_v55, %v3393_v25  ;;  %v3386_v61 = vmul.f32 %v7134_v46, %v6981_v40  ;;  %v3461_v58 = vmul.f32 %v7167_v29, %v3429_v21 }
0x10ac   : > { %v3374_v53 = vadd.f32 %v3366_v11, %v3354_v63  ;;  %v3406_v17 = vmul.f32 0.0, %v7144_v56  ;;  %v3430_v48 = vsel %vm515_vm4, %v3422_v20, 0.0  ;;  %v3442_v43 = vmul.f32 %v7147_v41, %v3429_v21  ;;  %v5433_v11 = vld [vmem:[#allocation7 + $0xb8] sm:$0xff]  }
0x10ad   : > { %v3488_v27 = vadd.f32 %v3480_v6, %v3468_v15  ;;  %v3449_v36 = vadd.f32 %v3441_v1, %v3413_v54  ;;  %v3481_v14 = vmul.f32 %v7158_v4, %v3430_v48  ;;  %v3462_v46 = vmul.f32 %v7167_v29, %v3430_v48  ;;  %v5434_v15 = vld [vmem:[#allocation7 + $0xb0] sm:$0xff]   ;;  %5215 = vmatprep.subr.bf16.mxu0 %v5433_v11  ;;  %v5435_v6 = vld [vmem:[#allocation7 + $0xa8] sm:$0xff]   ;;  %v5436_v48 = vld [vmem:[#allocation7 + $0xa0] sm:$0xff]  }
0x10ae   : > { %v3394_v23 = vadd.f32 %v3386_v61, %v3374_v53  ;;  %v3482_v0 = vmul.f32 0.0, %v7158_v4  ;;  %5216 = vmatpush3.bf16.msra.mxu0 %v5433_v11 }
0x10af   : > { %5166 = vmatmul.mubr.f32.gmra.mxu0 %v3488_v27  ;;  %v3469_v51 = vadd.f32 %v3461_v58, %v3449_v36  ;;  %5217 = vmatprep.subr.bf16.mxu0 %v5434_v15 }
0x10b0   : > { %v3414_v39 = vadd.f32 %v3406_v17, %v3394_v23 }
0x10b1   : > { %v3489_v33 = vadd.f32 %v3481_v14, %v3469_v51 }
0x10b2   : > { %v3450_v38 = vadd.f32 %v3442_v43, %v3414_v39  ;;  %5218 = vmatpush3.bf16.msra.mxu0 %v5434_v15  ;;  %v5437_v43 = vld [vmem:[#allocation7 + $0x98] sm:$0xff]  }
0x10b3   : > { %5168 = vmatprep.mubr.f32.mxu0 %v3489_v33  ;;  %5219 = vmatprep.subr.bf16.mxu0 %v5435_v6 }
0x10b4   : > { %v3470_v42 = vadd.f32 %v3462_v46, %v3450_v38  ;;  %v5438_v46 = vld [vmem:[#allocation7 + $0x90] sm:$0xff]  }
0x10b6   : > { %v3490_v8 = vadd.f32 %v3482_v0, %v3470_v42  ;;  %5220 = vmatpush3.bf16.msra.mxu0 %v5435_v6 }
0x10b7   : > { %5221 = vmatprep.subr.bf16.mxu0 %v5436_v48 }
0x10b8   : > { %5169 = vmatmul.mubr.f32.gmra.mxu0 %v3490_v8 }
0x10ba   : > { %5222 = vmatpush3.bf16.msra.mxu0 %v5436_v48 }
0x10bb   : > { %5223 = vmatprep.subr.bf16.mxu0 %v5437_v43 }
0x10be   : > { %5224 = vmatpush3.bf16.msra.mxu0 %v5437_v43  ;;  %v5441_v43 = vld [vmem:[#allocation8 + $0xb8] sm:$0xff]  }
0x10bf   : > { %5225 = vmatprep.subr.bf16.mxu0 %v5438_v46  ;;  %5239 = vmatprep.subr.bf16.mxu1 %v5441_v43 }
0x10c2   : > { %5226 = vmatpush3.bf16.msra.mxu0 %v5438_v46  ;;  %v5447_v46 = vld [vmem:[#allocation8 + $0x88] sm:$0xff]  }
0x115f   : > { %v5161_v56 = vpop.f32.mrf.mxu0 }
0x1160   : > { %3603 = vperm.xlu0 %5351, %v5161_v56  }
0x1161   : > { %v3557_v13 = vpop.f32.mrf.mxu0 }
0x1164   : > { %3598 = vperm.xlu0 %5351, %v3557_v13  }
0x1166   : > { %v5164_v5 = vpop.f32.mrf.mxu0 }
0x1168   : > { %3613 = vperm.xlu0 %5351, %v5164_v5   ;;  %v3567_v59 = vpop.f32.mrf.mxu0  ;;  %v5439_v5 = vld [vmem:[#allocation7 + $0x88] sm:$0xff]  }
0x1169   : > { %5227 = vmatprep.subr.bf16.mxu0 %v5439_v5 }
0x116a   : > { %5228 = vmatpush3.bf16.msra.mxu0 %v5439_v5 }
0x116c   : > { %3608 = vperm.xlu0 %5351, %v3567_v59  }
0x116f   : > { %v5167_v52 = vpop.f32.mrf.mxu0 }
0x1170   : > { %3623 = vperm.xlu0 %5351, %v5167_v52   ;;  %v5440_v52 = vld [vmem:[#allocation7 + $0x80] sm:$0xff]  }
0x1171   : > { %v3577_v41 = vpop.f32.mrf.mxu0  ;;  %5229 = vmatprep.subr.bf16.mxu0 %v5440_v52 }
0x1172   : > { %5230 = vmatpush3.bf16.msra.mxu0 %v5440_v52 }
0x1174   : > { %3618 = vperm.xlu0 %5351, %v3577_v41  }
0x1178   : > { %v5170_v47 = vpop.f32.mrf.mxu0 }
0x117a   : > { %v3587_v29 = vpop.f32.mrf.mxu0 }
0x117b   : > { %3628 = vperm.xlu0 %5351, %v3587_v29  }
0x117f   : > { %3633 = vperm.xlu0 %5351, %v5170_v47  }
0x11db   : > { %v3604_v31 = vpop.permute.xlu0 %3603 }
0x11dc   : > { %v7303_v4 = vsub.f32 %v7207_v18, %v3604_v31  ;;  %v4459_v31 = vld [vmem:[%s7439_s7 + $0x2] ss:$0 sm:$0xff] }
0x11de   : > { %v3645_v10 = vmul.f32 %v7303_v4, %v7303_v4 }
0x11df   : > { %v3599_v57 = vpop.permute.xlu0 %3598 }
0x11e0   : > { %v7306_v16 = vsub.f32 %v7205_v19, %v3599_v57 }
0x11e2   : > { %v3644_v50 = vmul.f32 %v7306_v16, %v7306_v16 }
0x11e3   : > { %v3614_v7 = vpop.permute.xlu0 %3613 }
0x11e4   : > { %5203 = vmatprep.mubr.f32.mxu1 %v3644_v50  ;;  %v7313_v44 = vsub.f32 %v7254_v60, %v3614_v7 }
0x11e5   : > { %5204 = vmatmul.mubr.f32.vlgmr.msra.gmra.mxu1 %v3645_v10 }
0x11e6   : > { %v3647_v62 = vmul.f32 %v7313_v44, %v7313_v44  ;;  %5240 = vmatpush3.bf16.msra.mxu1 %v5441_v43 }
0x11e7   : > { %v3609_v45 = vpop.permute.xlu0 %3608 }
0x11e8   : > { %v7316_v18 = vsub.f32 %v7231_v26, %v3609_v45 }
0x11ea   : > { %v3646_v19 = vmul.f32 %v7316_v18, %v7316_v18 }
0x11eb   : > { %v3624_v30 = vpop.permute.xlu0 %3623 }
0x11ec   : > { %5206 = vmatprep.mubr.f32.mxu1 %v3646_v19  ;;  %v7322_v49 = vsub.f32 %v3488_v27, %v3624_v30  ;;  %v4461_v19 = vld [vmem:[%s7440_s8 + $0x2] ss:$0 sm:$0xff] }
0x11ed   : > { %5207 = vmatmul.mubr.f32.gmra.mxu1 %v3647_v62 }
0x11ee   : > { %v3649_v26 = vmul.f32 %v7322_v49, %v7322_v49 }
0x11ef   : > { %v3619_v32 = vpop.permute.xlu0 %3618 }
0x11f0   : > { %v7325_v21 = vsub.f32 %v7277_v24, %v3619_v32 }
0x11f2   : > { %v3648_v60 = vmul.f32 %v7325_v21, %v7325_v21 }
0x11f4   : > { %5209 = vmatprep.mubr.f32.mxu1 %v3648_v60 }
0x11f5   : > { %5210 = vmatmul.mubr.f32.gmra.mxu1 %v3649_v26 }
0x11f6   : > { %v3629_v9 = vpop.permute.xlu0 %3628 }
0x11f7   : > { %v7331_v22 = vsub.f32 %v3489_v33, %v3629_v9 }
0x11f9   : > { %v3650_v25 = vmul.f32 %v7331_v22, %v7331_v22 }
0x11fa   : > { %v3634_v55 = vpop.permute.xlu0 %3633 }
0x11fb   : > { %v7335_v63 = vsub.f32 %v3490_v8, %v3634_v55  ;;  %5212 = vmatprep.mubr.f32.mxu1 %v3650_v25 }
0x11fd   : > { %v3651_v24 = vmul.f32 %v7335_v63, %v7335_v63 }
0x11ff   : > { %5213 = vmatmul.mubr.f32.gmra.mxu1 %v3651_v24 }
0x12a5   : > { %v5205_v20 = vpop.f32.mrf.mxu1 }
0x12a6   : > { %v3724_v54 = vadd.f32 1e-06, %v5205_v20 }
0x12a7   : > { %v3718_v1 = vpop.f32.mrf.mxu1 }
0x12a8   : > { %5525 = vrsqrt.f32 %v3724_v54  ;;  %v3719_v53 = vadd.f32 1e-06, %v3718_v1 }
0x12aa   : > { %5527 = vrsqrt.f32 %v3719_v53 }
0x12ad   : > { %v5208_v61 = vpop.f32.mrf.mxu1 }
0x12ae   : > { %v3734_v27 = vadd.f32 1e-06, %v5208_v61 }
0x12af   : > { %v3728_v36 = vpop.f32.mrf.mxu1 }
0x12b0   : > { %5529 = vrsqrt.f32 %v3734_v27  ;;  %v3729_v58 = vadd.f32 1e-06, %v3728_v36 }
0x12b2   : > { %5531 = vrsqrt.f32 %v3729_v58 }
0x12b5   : > { %v5526_v23 = vpop.eup %5525  ;;  %v5211_v17 = vpop.f32.mrf.mxu1 }
0x12b6   : > { %3772 = vperm.xlu1 %5352, %v5526_v23   ;;  %v3744_v14 = vadd.f32 1e-06, %v5211_v17 }
0x12b7   : > { %v5528_v51 = vpop.eup %5527  ;;  %v3738_v39 = vpop.f32.mrf.mxu1 }
0x12b8   : > { %3767 = vperm.xlu0 %5351, %v5528_v51   ;;  %5533 = vrsqrt.f32 %v3744_v14  ;;  %v3739_v33 = vadd.f32 1e-06, %v3738_v39 }
0x12ba   : > { %5535 = vrsqrt.f32 %v3739_v33  ;;  %v5442_v33 = vld [vmem:[#allocation8 + $0xb0] sm:$0xff]  }
0x12bb   : > { %5241 = vmatprep.subr.bf16.mxu1 %v5442_v33 }
0x12bc   : > { %5242 = vmatpush3.bf16.msra.mxu1 %v5442_v33 }
0x12bd   : > { %v5530_v38 = vpop.eup %5529 }
0x12be   : > { %3782 = vperm.xlu0 %5351, %v5530_v38   ;;  %v5445_v38 = vld [vmem:[#allocation8 + $0x98] sm:$0xff]  }
0x12bf   : > { %v5214_v42 = vpop.f32.mrf.mxu1  ;;  %v5532_v0 = vpop.eup %5531 }
0x12c0   : > { %v3754_v8 = vadd.f32 1e-06, %v5214_v42  ;;  %v5448_v42 = vld [vmem:[#allocation8 + $0x80] sm:$0xff]  }
0x12c1   : > { %v3748_v56 = vpop.f32.mrf.mxu1 }
0x12c2   : > { %3777 = vperm.xlu0 %5351, %v5532_v0   ;;  %5537 = vrsqrt.f32 %v3754_v8  ;;  %v3749_v13 = vadd.f32 1e-06, %v3748_v56  ;;  %v4463_v0 = vld [vmem:[%s7442_s10 + $0x2] ss:$0 sm:$0xff] }
0x12c4   : > { %5539 = vrsqrt.f32 %v3749_v13 }
0x12c5   : > { %v5534_v59 = vpop.eup %5533 }
0x12c6   : > { %3792 = vperm.xlu0 %5351, %v5534_v59  }
0x12c7   : > { %v5536_v41 = vpop.eup %5535 }
0x12ca   : > { %3787 = vperm.xlu0 %5351, %v5536_v41  }
0x12cf   : > { %v5538_v47 = vpop.eup %5537 }
0x12d0   : > { %3802 = vperm.xlu0 %5351, %v5538_v47  }
0x12d1   : > { %v5540_v29 = vpop.eup %5539 }
0x12d2   : > { %3797 = vperm.xlu1 %5352, %v5540_v29  }
0x1331   : > { %v3773_v57 = vpop.permute.xlu1 %3772 }
0x1332   : > { %v3806_v50 = vmul.f32 %v3773_v57, %v7303_v4 }
0x1333   : > { %v3768_v10 = vpop.permute.xlu0 %3767 }
0x1334   : > { %v3822_v7 = vmul.f32 %v4459_v31, %v3806_v50  ;;  %v3805_v45 = vmul.f32 %v3768_v10, %v7306_v16 }
0x1336   : > { %v3821_v62 = vmul.f32 %v4459_v31, %v3805_v45  ;;  %v3838_v30 = vadd.f32 %v4461_v19, %v3822_v7 }
0x1338   : > { %v3837_v32 = vadd.f32 %v4461_v19, %v3821_v62 }
0x1339   : > { %v3783_v60 = vpop.permute.xlu0 %3782 }
0x133a   : > { %v3808_v26 = vmul.f32 %v3783_v60, %v7313_v44  ;;  %v3845_v9 = vpack.c.bf16 %v3838_v30, %v3837_v32 }
0x133c   : > { %5231 = vmatprep.mubr.bf16.mxu0 %v3845_v9  ;;  %v3824_v55 = vmul.f32 %v4459_v31, %v3808_v26 }
0x133d   : > { %v3778_v25 = vpop.permute.xlu0 %3777 }
0x133e   : > { %v3807_v4 = vmul.f32 %v3778_v25, %v7316_v18  ;;  %v3840_v11 = vadd.f32 %v4461_v19, %v3824_v55 }
0x1340   : > { %v3823_v24 = vmul.f32 %v4459_v31, %v3807_v4 }
0x1341   : > { %v3793_v16 = vpop.permute.xlu0 %3792 }
0x1342   : > { %v3839_v15 = vadd.f32 %v4461_v19, %v3823_v24  ;;  %v3810_v6 = vmul.f32 %v3793_v16, %v7322_v49 }
0x1344   : > { %v3846_v20 = vpack.c.bf16 %v3840_v11, %v3839_v15  ;;  %v3826_v1 = vmul.f32 %v4459_v31, %v3810_v6 }
0x1345   : > { %v3788_v54 = vpop.permute.xlu0 %3787 }
0x1346   : > { %5232 = vmatmul.mubr.bf16.vlgmr.msra.gmra.mxu0 %v3846_v20  ;;  %v3809_v53 = vmul.f32 %v3788_v54, %v7325_v21  ;;  %v3842_v44 = vadd.f32 %v4461_v19, %v3826_v1  ;;  %v5443_v21 = vld [vmem:[#allocation8 + $0xa8] sm:$0xff]  }
0x1347   : > { %5243 = vmatprep.subr.bf16.mxu1 %v5443_v21 }
0x1348   : > { %v3825_v61 = vmul.f32 %v4459_v31, %v3809_v53  ;;  %5244 = vmatpush3.bf16.msra.mxu1 %v5443_v21 }
0x134a   : > { %v3841_v27 = vadd.f32 %v4461_v19, %v3825_v61 }
0x134b   : > { %v3803_v36 = vpop.permute.xlu0 %3802 }
0x134c   : > { %v3812_v58 = vmul.f32 %v3803_v36, %v7335_v63  ;;  %v3847_v23 = vpack.c.bf16 %v3842_v44, %v3841_v27  ;;  %v5444_v63 = vld [vmem:[#allocation8 + $0xa0] sm:$0xff]  }
0x134d   : > { %v3798_v18 = vpop.permute.xlu1 %3797  ;;  %5245 = vmatprep.subr.bf16.mxu1 %v5444_v63 }
0x134e   : > { %v3828_v17 = vmul.f32 %v4459_v31, %v3812_v58  ;;  %v3811_v48 = vmul.f32 %v3798_v18, %v7331_v22  ;;  %5235 = vmatprep.mubr.bf16.mxu0 %v3847_v23  ;;  %5246 = vmatpush3.bf16.msra.mxu1 %v5444_v63  ;;  %v5446_v22 = vld [vmem:[#allocation8 + $0x90] sm:$0xff]  }
0x134f   : > { %5247 = vmatprep.subr.bf16.mxu1 %v5445_v38 }
0x1350   : > { %v3844_v51 = vadd.f32 %v4461_v19, %v3828_v17  ;;  %v3827_v49 = vmul.f32 %v4459_v31, %v3811_v48 }
0x1352   : > { %v3843_v14 = vadd.f32 %v4461_v19, %v3827_v49  ;;  %5248 = vmatpush3.bf16.msra.mxu1 %v5445_v38 }
0x1353   : > { %5249 = vmatprep.subr.bf16.mxu1 %v5446_v22 }
0x1354   : > { %v3848_v39 = vpack.c.bf16 %v3844_v51, %v3843_v14 }
0x1356   : > { %5236 = vmatmul.mubr.bf16.gmra.mxu0 %v3848_v39  ;;  %5250 = vmatpush3.bf16.msra.mxu1 %v5446_v22 }
0x1357   : > { %5251 = vmatprep.subr.bf16.mxu1 %v5447_v46 }
0x135a   : > { %5252 = vmatpush3.bf16.msra.mxu1 %v5447_v46 }
0x135b   : > { %5253 = vmatprep.subr.bf16.mxu1 %v5448_v42 }
0x135e   : > { %5254 = vmatpush3.bf16.msra.mxu1 %v5448_v42 }
0x1406   : > { %v5233_v8 = vpop.f32.mrf.mxu0 }
0x1407   : > { %v7356_v56 = vadd.f32 %v5233_v8, %v4463_v0 }
0x1408   : > { %v3956_v13 = vpop.f32.mrf.mxu0 }
0x1409   : > { %v3997_v5 = vmul.f32 %v7356_v56, %v7356_v56  ;;  %v7360_v59 = vadd.f32 %v4463_v0, %v3956_v13 }
0x140a   : > { %v5234_v52 = vpop.f32.mrf.mxu0 }
0x140b   : > { %v4005_v41 = vmul.f32 %v3997_v5, %v7356_v56  ;;  %v3995_v47 = vmul.f32 %v7360_v59, %v7360_v59  ;;  %v3968_v29 = vadd.f32 %v5234_v52, %v4463_v0 }
0x140c   : > { %v3959_v31 = vpop.f32.mrf.mxu0 }
0x140d   : > { %v4013_v57 = vmul.f32 0.044715, %v4005_v41  ;;  %v4003_v50 = vmul.f32 %v3995_v47, %v7360_v59  ;;  %v3998_v10 = vmul.f32 %v3968_v29, %v3968_v29  ;;  %v3960_v7 = vadd.f32 %v4463_v0, %v3959_v31 }
0x140e   : > { %v3990_v31 = vmul.f32 0.5, %v3968_v29 }
0x140f   : > { %v4021_v45 = vadd.f32 %v4013_v57, %v7356_v56  ;;  %v4011_v19 = vmul.f32 0.044715, %v4003_v50  ;;  %v4006_v62 = vmul.f32 %v3998_v10, %v3968_v29  ;;  %v3996_v30 = vmul.f32 %v3960_v7, %v3960_v7 }
0x1410   : > { %v3987_v57 = vmul.f32 0.5, %v7360_v59  ;;  %v3988_v10 = vmul.f32 0.5, %v3960_v7 }
0x1411   : > { %v4029_v32 = vmul.f32 0.7978846, %v4021_v45  ;;  %v4019_v60 = vadd.f32 %v4011_v19, %v7360_v59  ;;  %v4014_v26 = vmul.f32 0.044715, %v4006_v62  ;;  %v4004_v9 = vmul.f32 %v3996_v30, %v3960_v7 }
0x1412   : > { %v3989_v19 = vmul.f32 0.5, %v7356_v56 }
0x1413   : > { %v4027_v25 = vmul.f32 0.7978846, %v4019_v60  ;;  %v4022_v55 = vadd.f32 %v4014_v26, %v3968_v29  ;;  %v4012_v4 = vmul.f32 0.044715, %v4004_v9  ;;  %5541 = vtanh.f32 %v4029_v32 }
0x1415   : > { %v4030_v24 = vmul.f32 0.7978846, %v4022_v55  ;;  %5543 = vtanh.f32 %v4027_v25  ;;  %v4020_v11 = vadd.f32 %v4012_v4, %v3960_v7 }
0x1416   : > { %v5237_v15 = vpop.f32.mrf.mxu0 }
0x1417   : > { %5545 = vtanh.f32 %v4030_v24  ;;  %v4028_v16 = vmul.f32 0.7978846, %v4020_v11  ;;  %v3981_v6 = vadd.f32 %v5237_v15, %v4463_v0 }
0x1418   : > { %v3972_v20 = vpop.f32.mrf.mxu0 }
0x1419   : > { %5547 = vtanh.f32 %v4028_v16  ;;  %v4001_v54 = vmul.f32 %v3981_v6, %v3981_v6  ;;  %v3973_v1 = vadd.f32 %v4463_v0, %v3972_v20  ;;  %v3993_v20 = vmul.f32 0.5, %v3981_v6 }
0x141a   : > { %v5238_v53 = vpop.f32.mrf.mxu0 }
0x141b   : > { %v4009_v61 = vmul.f32 %v4001_v54, %v3981_v6  ;;  %v3999_v44 = vmul.f32 %v3973_v1, %v3973_v1  ;;  %v3984_v27 = vadd.f32 %v5238_v53, %v4463_v0  ;;  %v3991_v15 = vmul.f32 0.5, %v3973_v1 }
0x141c   : > { %v3975_v36 = vpop.f32.mrf.mxu0 }
0x141d   : > { %v4017_v58 = vmul.f32 0.044715, %v4009_v61  ;;  %v4007_v23 = vmul.f32 %v3999_v44, %v3973_v1  ;;  %v4002_v18 = vmul.f32 %v3984_v27, %v3984_v27  ;;  %v3976_v17 = vadd.f32 %v4463_v0, %v3975_v36 }
0x141e   : > { %v3994_v11 = vmul.f32 0.5, %v3984_v27 }
0x141f   : > { %v4025_v48 = vadd.f32 %v4017_v58, %v3981_v6  ;;  %v4015_v51 = vmul.f32 0.044715, %v4007_v23  ;;  %v4010_v49 = vmul.f32 %v4002_v18, %v3984_v27  ;;  %v4000_v14 = vmul.f32 %v3976_v17, %v3976_v17  ;;  %v4473_v23 = vld [vmem:[%s7444_s12 + $0x2] ss:$0 sm:$0xff] }
0x1420   : > { %v5542_v39 = vpop.eup %5541  ;;  %v3992_v16 = vmul.f32 0.5, %v3976_v17 }
0x1421   : > { %v4023_v43 = vadd.f32 %v4015_v51, %v3973_v1  ;;  %v4018_v33 = vmul.f32 0.044715, %v4010_v49  ;;  %v4008_v21 = vmul.f32 %v4000_v14, %v3976_v17  ;;  %v4033_v38 = vmul.f32 0.7978846, %v4025_v48 }
0x1422   : > { %v5544_v63 = vpop.eup %5543  ;;  %v4045_v47 = vadd.f32 1.0, %v5542_v39 }
0x1423   : > { %v4031_v46 = vmul.f32 0.7978846, %v4023_v43  ;;  %v4026_v42 = vadd.f32 %v4018_v33, %v3984_v27  ;;  %v4016_v8 = vmul.f32 0.044715, %v4008_v21  ;;  %v4043_v41 = vadd.f32 1.0, %v5544_v63 }
0x1424   : > { %v5546_v22 = vpop.eup %5545  ;;  %v4053_v60 = vmul.f32 %v4045_v47, %v3989_v19 }
0x1425   : > { %v4046_v13 = vadd.f32 1.0, %v5546_v22  ;;  %5549 = vtanh.f32 %v4031_v46  ;;  %v4034_v5 = vmul.f32 0.7978846, %v4026_v42  ;;  %v4024_v52 = vadd.f32 %v4016_v8, %v3976_v17 }
0x1426   : > { %v5548_v0 = vpop.eup %5547  ;;  %5551 = vtanh.f32 %v4033_v38  ;;  %v4051_v30 = vmul.f32 %v4043_v41, %v3987_v57 }
0x1427   : > { %5553 = vtanh.f32 %v4034_v5  ;;  %v4032_v50 = vmul.f32 0.7978846, %v4024_v52  ;;  %v4044_v45 = vadd.f32 1.0, %v5548_v0  ;;  %v4054_v62 = vmul.f32 %v4046_v13, %v3990_v31 }
0x1429   : > { %5555 = vtanh.f32 %v4032_v50  ;;  %v4052_v32 = vmul.f32 %v4044_v45, %v3988_v10  ;;  %v4060_v9 = vpack.c.bf16 %v4054_v62, %v4053_v60 }
0x142b   : > { %v4059_v26 = vpack.c.bf16 %v4052_v32, %v4051_v30 }
0x142d   : > { %5255 = vmatprep.mubr.bf16.mxu1 %v4059_v26 }
0x142e   : > { %5256 = vmatmul.mubr.bf16.vlgmr.msra.gmra.mxu1 %v4060_v9 }
0x1432   : > { %v5550_v25 = vpop.eup %5549 }
0x1433   : > { %v5552_v29 = vpop.eup %5551  ;;  %v4047_v4 = vadd.f32 1.0, %v5550_v25 }
0x1434   : > { %v5554_v55 = vpop.eup %5553  ;;  %v4049_v7 = vadd.f32 1.0, %v5552_v29 }
0x1435   : > { %v4050_v59 = vadd.f32 1.0, %v5554_v55  ;;  %v4055_v53 = vmul.f32 %v4047_v4, %v3991_v15 }
0x1436   : > { %v5556_v24 = vpop.eup %5555  ;;  %v4057_v44 = vmul.f32 %v4049_v7, %v3993_v20 }
0x1437   : > { %v4048_v56 = vadd.f32 1.0, %v5556_v24  ;;  %v4058_v54 = vmul.f32 %v4050_v59, %v3994_v11 }
0x1439   : > { %v4056_v61 = vmul.f32 %v4048_v56, %v3992_v16  ;;  %v4062_v58 = vpack.c.bf16 %v4058_v54, %v4057_v44 }
0x143b   : > { %v4061_v36 = vpack.c.bf16 %v4056_v61, %v4055_v53 }
0x143d   : > { %5259 = vmatprep.mubr.bf16.mxu1 %v4061_v36 }
0x143e   : > { %5260 = vmatmul.mubr.bf16.gmra.mxu1 %v4062_v58 }
0x14ee   : > { %v5257_v18 = vpop.f32.mrf.mxu1 }
0x14ef   : > { %v4179_v27 = vadd.f32 %v5257_v18, %v4473_v23 }
0x14f0   : > { %v4170_v48 = vpop.f32.mrf.mxu1 }
0x14f1   : > { %v4203_v1 = vadd.f32 %v4179_v27, %v6984_v34  ;;  %v4171_v17 = vadd.f32 %v4473_v23, %v4170_v48 }
0x14f2   : > { %v5258_v6 = vpop.f32.mrf.mxu1 }
0x14f3   : > { %4211 = vst [vmem:[%s502_s15 + $0x10] sm:$0xff] %v4203_v1  ;;  %v4201_v51 = vadd.f32 %v4171_v17, %v6987_v28  ;;  %v4182_v49 = vadd.f32 %v5258_v6, %v4473_v23 }
0x14f4   : > { %v4173_v14 = vpop.f32.mrf.mxu1 }
0x14f5   : > { %4209 = vst [vmem:[%s502_s15] sm:$0xff] %v4201_v51  ;;  %v4204_v39 = vadd.f32 %v4182_v49, %v6972_v35  ;;  %v4174_v43 = vadd.f32 %v4473_v23, %v4173_v14 }
0x14f7   : > { %4212 = vst [vmem:[%s502_s15 + $0x18] sm:$0xff] %v4204_v39  ;;  %v4202_v33 = vadd.f32 %v4174_v43, %v6990_v3 }
0x14f9   : > { %4210 = vst [vmem:[%s502_s15 + $0x8] sm:$0xff] %v4202_v33 }
0x14fe   : > { %v5261_v21 = vpop.f32.mrf.mxu1 }
0x14ff   : > { %v4195_v34 = vadd.f32 %v5261_v21, %v4473_v23 }
0x1500   : > { %v4186_v63 = vpop.f32.mrf.mxu1 }
0x1501   : > { %v4207_v38 = vadd.f32 %v4195_v34, %v6975_v12  ;;  %v4187_v22 = vadd.f32 %v4473_v23, %v4186_v63 }
0x1502   : > { %v5262_v28 = vpop.f32.mrf.mxu1 }
0x1503   : > { %4215 = vst [vmem:[%s502_s15 + $0x30] sm:$0xff] %v4207_v38  ;;  %v4205_v46 = vadd.f32 %v4187_v22, %v6978_v37  ;;  %v4198_v42 = vadd.f32 %v5262_v28, %v4473_v23 }
0x1504   : > { %v4189_v35 = vpop.f32.mrf.mxu1 }
0x1505   : > { %4213 = vst [vmem:[%s502_s15 + $0x20] sm:$0xff] %v4205_v46  ;;  %v4208_v3 = vadd.f32 %v4198_v42, %v6981_v40  ;;  %v4190_v12 = vadd.f32 %v4473_v23, %v4189_v35 }
0x1507   : > { %4216 = vst [vmem:[%s502_s15 + $0x38] sm:$0xff] %v4208_v3  ;;  %v4206_v37 = vadd.f32 %v4190_v12, %v6993_v2 }
0x1509   : > { %4214 = vst [vmem:[%s502_s15 + $0x28] sm:$0xff] %v4206_v37 }
0x150a   : > { %5684 = shalt.err (!%p5681_p9)
}
0x150b   : > { %s5685_s19 = scalar_lea.hbm %s7388_s1, 1024  ;;  %s5689_s17 = scalar_lea.hbm %s7445_s13, 2048 }
0x150c   : > { %p5686_p1 = scmp.ne.s32.totalorder %s7388_s1, %s5685_s19  ;;  %p5690_p11 = scmp.lt.s32.totalorder %s7388_s1, %s7445_s13 }
0x150d   : > { %p5691_p13 = scmp.lt.s32.totalorder %s5689_s17, %s5685_s19 }
0x150e   : > { %p5687_p8 = pnand %p5686_p1, %p7476_p6 }
0x150f   : > { %p5692_p2 = por %p5691_p13, %p5690_p11 }
0x1510   : > { %p5688_p10 = pneg %p5687_p8 }
0x1512   : > { %p5693_p4 = pnand %p5692_p2, %p5688_p10 }
0x1514   : > { %5696 = shalt.err (!%p5693_p4)
}
0x1515   : > { %s5759_s30 = smov 128   ;;  %s5760_s23 = smov 8  }
0x1516   : > { %5277 = dma.vmem_to_hbm [thread:$0]  (%p7476_p6), %s7382_s27, 1024, %s7388_s1, %s4218_s29, %s5759_s30, %s5759_s30, %s5760_s23  }
0x1517 PF: > { %s7477_s9 = sld [smem:[#allocation15_spill]]  ;;  %p7480_p0 = scmp.ge.s32.totalorder %s5743_s28, 2 }
0x1518   : > { %s7478_s14 = sld [smem:[#allocation17_spill]] }
0x151d   : > { %s4246_s16 = sand.u32 1, %s7477_s9  }
0x151e   : > { %p7479_p12 = scmp.ne.s32.totalorder %s7478_s14, 0  ;;  %s4247_s20 = scalar_lea.sflag [#allocation4], %s4246_s16 }
0x1520   : > { %p5294_p5 = pnand %p7480_p0, %p7479_p12 }
0x1522   : > { %p5295_p3 = pneg %p5294_p5 }
0x1524   : > { %5726 = dma.done.wait (%p5295_p3), %s4247_s20, 1024  }
0x1525   : > { %5728 = vsyncadd (%p5295_p3), %s4247_s20, 4294966272  ;;  %s7481_s19 = sld [smem:[#allocation16_spill]]  ;;  %s7483_s21 = smov %s5911_s25 }
0x1526   : > { %s7482_s27 = sld [smem:[#allocation18_spill]]  ;;  %p28_p7 = scmp.ge.s32.totalorder %s5911_s25, 4  }
0x1527   : > { %s7484_s25 = smov %s5735_s26  ;;  %s7486_s28 = smov %s7483_s21 }
0x1528   :  { %30 = sbr.rel (!%p28_p7) target bundleno = 11 (0xb), region = 153 }
0x152b   : > { %s7485_s26 = smov %s7481_s19 }
0x152d   :  { %4252 = vsyncpa [#allocation3], 1 }
0x152e   :  { %4254 = vsyncpa [#allocation3 + $0x1], 1 }
0x152f   :  { %4255 = vsyncpa [#allocation6], 1 }
0x1530   :  { %4256 = vsyncpa [#allocation9], 1 }
0x1531   :  { %4257 = vsyncpa [#allocation4], 1 }
0x1532   :  { %4259 = vsyncpa [#allocation4 + $0x1], 1 }

</bundles_post_ra>
